<compile_context>
chip_gen: v7x
topology: tpu7x:2x2x1
jax: 0.10.0
libtpu: 0.0.40
codegen_flags: <defaults>
</compile_context>

<pallas_src>
import functools

import jax
import jax.numpy as jnp
from jax.experimental import pallas as pl
from jax.experimental.pallas import tpu as pltpu

EPS = 1e-5  # BatchNormTT2d default eps


# --------------------------------------------------------------------------- #
# One LIF -> depthwise(masked lane rolls) -> pointwise -> SiLU -> BN step.
# mem, spk_mask, x_t are in the fused (B*C, HW) sublane layout.
# --------------------------------------------------------------------------- #
def _lif_conv_bn_step(mem, spk_mask, x_t, gamma_t, tapf_ref, tap_offsets,
                      pww, pwb, beta, thr, B, C, inv_n):
    HW = x_t.shape[-1]

    # --- snn.Leaky, subtract reset.  reset == previous step's spike predicate.
    # (graded_spikes_factor is folded into the tap weights)
    mem = beta * mem + x_t - spk_mask * thr
    spk_mask = jnp.where(mem > thr, 1.0, 0.0)                 # (B*C, HW)

    # --- depthwise KxK conv (stride 1, zero pad) as masked lane rolls (XLU) ---
    acc = None
    for k, off in enumerate(tap_offsets):
        shifted = spk_mask if off == 0 else pltpu.roll(spk_mask, shift=(-off) % HW, axis=1)
        term = shifted * tapf_ref[k]                          # (B*C, HW) * (B*C, HW)
        acc = term if acc is None else acc + term

    # --- pointwise 1x1 conv (VPU broadcast FMAs) + SiLU (EUP) per batch row ---
    ys = []
    for b in range(B):
        y = acc[b * C:b * C + 1, :] * pww[0] + pwb            # (1,HW)*(OC,1) -> (OC,HW)
        for c in range(1, C):
            y = y + acc[b * C + c:b * C + c + 1, :] * pww[c]
        # SiLU with exact reciprocal (approx=True was the accuracy bug).
        y = y * pl.reciprocal(1.0 + jnp.exp(-y), approx=False)
        ys.append(y)

    # --- BatchNorm2d: train-mode batch stats (biased var), weight only, two-pass ---
    s1 = ys[0].sum(axis=1, keepdims=True)
    for b in range(1, B):
        s1 = s1 + ys[b].sum(axis=1, keepdims=True)
    mu = s1 * inv_n                                           # (OC, 1)
    ds = [y - mu for y in ys]
    s2 = (ds[0] * ds[0]).sum(axis=1, keepdims=True)
    for b in range(1, B):
        s2 = s2 + (ds[b] * ds[b]).sum(axis=1, keepdims=True)
    var = s2 * inv_n
    scale = gamma_t * jax.lax.rsqrt(var + EPS)                # 0.5 averaging folded in gamma_t
    return mem, spk_mask, tuple(d * scale for d in ds)        # B x (OC, HW)


# --------------------------------------------------------------------------- #
# Fused kernel (single TensorCore): both LIF direction chains interleaved.
# Writes the final (B, T, OC, HW) layout directly, each (b, t) exactly once.
# --------------------------------------------------------------------------- #
def _lcbv2_fused_kernel(lif_ref, x_ref, tapf_ref, pww_ref, pwb_ref, gamma_ref,
                        out_ref, *, tap_offsets, B):
    T, BC, HW = x_ref.shape
    C = BC // B
    beta = lif_ref[0]
    thr = lif_ref[1]
    inv_n = 1.0 / float(B * HW)

    pww = [pww_ref[c] for c in range(C)]   # hoisted (OC, 1) weight columns
    pwb = pwb_ref[...]                     # (OC, 1) fused bias

    mem_f = jnp.zeros((BC, HW), jnp.float32)
    msk_f = jnp.zeros((BC, HW), jnp.float32)
    mem_r = jnp.zeros((BC, HW), jnp.float32)
    msk_r = jnp.zeros((BC, HW), jnp.float32)

    pending = {}  # timestep -> first-arrived contribution (held in vregs/VMEM)

    def emit(t, contribs):
        if t in pending:
            prev = pending.pop(t)
            for b in range(B):
                out_ref[b, t] = prev[b] + contribs[b]
        else:
            pending[t] = contribs

    for s in range(T):                      # static unroll (T small)
        tr = T - 1 - s
        mem_f, msk_f, cf = _lif_conv_bn_step(mem_f, msk_f, x_ref[s], gamma_ref[s],
                                             tapf_ref, tap_offsets, pww, pwb,
                                             beta, thr, B, C, inv_n)
        emit(s, cf)
        mem_r, msk_r, cr = _lif_conv_bn_step(mem_r, msk_r, x_ref[tr], gamma_ref[tr],
                                             tapf_ref, tap_offsets, pww, pwb,
                                             beta, thr, B, C, inv_n)
        emit(tr, cr)
    assert not pending


# --------------------------------------------------------------------------- #
# Split kernel (multi-TensorCore parts): one direction chain per grid program.
# Each program writes its own (B, T, OC, HW) half-contribution slab.
# --------------------------------------------------------------------------- #
def _lcbv2_split_kernel(lif_ref, x_ref, tapf_ref, pww_ref, pwb_ref, gamma_ref,
                        out_ref, *, tap_offsets, B):
    T, BC, HW = x_ref.shape
    C = BC // B
    d = pl.program_id(0)                    # 0: forward-time chain, 1: reverse-time chain
    beta = lif_ref[0]
    thr = lif_ref[1]
    inv_n = 1.0 / float(B * HW)

    pww = [pww_ref[c] for c in range(C)]
    pwb = pwb_ref[...]

    mem = jnp.zeros((BC, HW), jnp.float32)
    msk = jnp.zeros((BC, HW), jnp.float32)
    for s in range(T):
        t = s + d * (T - 1 - 2 * s)         # forward: s ; reverse: T-1-s
        mem, msk, contribs = _lif_conv_bn_step(mem, msk, x_ref[t], gamma_ref[t],
                                               tapf_ref, tap_offsets, pww, pwb,
                                               beta, thr, B, C, inv_n)
        for b in range(B):
            out_ref[b, t] = contribs[b]


# --------------------------------------------------------------------------- #
# Wrapper
# --------------------------------------------------------------------------- #
def _make_dw_taps(dw_w, H, W, padding):
    """Pre-masked per-tap, per-channel depthwise weights over the flat H*W axis.

    dw_w: (KH, KW, C).  Returns (KH*KW, C, H*W) factors and flat roll offsets.
    """
    KH, KW, C = dw_w.shape
    hw = jnp.arange(H * W, dtype=jnp.int32)
    row, col = hw // W, hw % W
    facs, offs = [], []
    for ki in range(KH):
        for kj in range(KW):
            dh, dwc = ki - padding, kj - padding
            valid = ((row + dh >= 0) & (row + dh < H) &
                     (col + dwc >= 0) & (col + dwc < W)).astype(jnp.float32)   # (HW,)
            facs.append(dw_w[ki, kj][:, None] * valid[None, :])                # (C, HW)
            offs.append(dh * W + dwc)
    return jnp.stack(facs, axis=0), tuple(offs)


def _is_multi_tensorcore():
    """True on chips with 2 TensorCores per device (v4/v5p megacore, v7x)."""
    try:
        kind = jax.devices()[0].device_kind.lower()
    except Exception:
        return False
    return any(tag in kind for tag in ("v7", "v5p", "v4"))


def lcbv2_forward(x_btchw, params, padding=1):
    """x_btchw: (B, T, C, H, W) float32. Returns (B, T, OC, H, W)."""
    B, T, C, H, W = map(int, x_btchw.shape)
    HW = H * W
    OC = int(params["pw_w"].shape[1])

    # Fused sublane layout: rows = b*C + c, lanes = flattened H*W.
    x_k = (jnp.transpose(x_btchw, (1, 0, 2, 3, 4))
           .reshape(T, B * C, HW).astype(jnp.float32))

    # LIF scalars (beta pre-clamped; graded factor folded into tap weights below).
    lif = jnp.stack([jnp.clip(params["lif"][0], 0.0, 1.0),
                     params["lif"][1]]).astype(jnp.float32)

    tapf_c, tap_offsets = _make_dw_taps(params["dw_w"].astype(jnp.float32), H, W, padding)
    tapf = jnp.broadcast_to((tapf_c * params["lif"][2])[:, None, :, :],
                            (tapf_c.shape[0], B, C, HW)).reshape(-1, B * C, HW)
    pww = params["pw_w"].astype(jnp.float32)[:, :, None]                        # (C, OC, 1)
    pwb = (params["pw_b"] + params["dw_b"] @ params["pw_w"]).astype(jnp.float32).reshape(OC, 1)
    gamma = (0.5 * params["gamma"]).astype(jnp.float32)[:, :, None]             # (T, OC, 1)
    n_taps = int(tapf.shape[0])

    if _is_multi_tensorcore():
        # One direction chain per TensorCore (BatchNorm batch stats prevent a B split).
        kernel = functools.partial(_lcbv2_split_kernel, tap_offsets=tap_offsets, B=B)
        out2 = pl.pallas_call(
            kernel,
            out_shape=jax.ShapeDtypeStruct((2, B, T, OC, HW), jnp.float32),
            grid=(2,),
            in_specs=[
                pl.BlockSpec(memory_space=pltpu.MemorySpace.SMEM),            # LIF scalars
                pl.BlockSpec((T, B * C, HW), lambda d: (0, 0, 0)),            # x
                pl.BlockSpec((n_taps, B * C, HW), lambda d: (0, 0, 0)),       # masked dw taps
                pl.BlockSpec((C, OC, 1), lambda d: (0, 0, 0)),                # pointwise weights
                pl.BlockSpec((OC, 1), lambda d: (0, 0)),                      # fused bias
                pl.BlockSpec((T, OC, 1), lambda d: (0, 0, 0)),                # BN gammas (x0.5)
            ],
            out_specs=pl.BlockSpec((None, B, T, OC, HW), lambda d: (d, 0, 0, 0, 0)),
            compiler_params=pltpu.CompilerParams(dimension_semantics=("parallel",)),
        )(lif, x_k, tapf, pww, pwb, gamma)
        out = out2[0] + out2[1]                                               # (B, T, OC, HW)
    else:
        # Single TensorCore: fused kernel, final layout, no extra slab / wrapper add.
        kernel = functools.partial(_lcbv2_fused_kernel, tap_offsets=tap_offsets, B=B)
        out = pl.pallas_call(
            kernel,
            out_shape=jax.ShapeDtypeStruct((B, T, OC, HW), jnp.float32),
            in_specs=[
                pl.BlockSpec(memory_space=pltpu.MemorySpace.SMEM),            # LIF scalars
                pl.BlockSpec(memory_space=pltpu.MemorySpace.VMEM),            # x
                pl.BlockSpec(memory_space=pltpu.MemorySpace.VMEM),            # masked dw taps
                pl.BlockSpec(memory_space=pltpu.MemorySpace.VMEM),            # pointwise weights
                pl.BlockSpec(memory_space=pltpu.MemorySpace.VMEM),            # fused bias
                pl.BlockSpec(memory_space=pltpu.MemorySpace.VMEM),            # BN gammas (x0.5)
            ],
            out_specs=pl.BlockSpec(memory_space=pltpu.MemorySpace.VMEM),
        )(lif, x_k, tapf, pww, pwb, gamma)

    return out.reshape(B, T, OC, H, W)


# --------------------------------------------------------------------------- #
# Parameters + pure-JAX reference
# --------------------------------------------------------------------------- #
def make_params(key, in_channels, out_channels, kernel_size, time_steps):
    ks = jax.random.split(key, 6)
    lif = jax.random.uniform(ks[0], (3,), jnp.float32)  # beta, threshold, graded factor
    dw_w = jax.random.uniform(ks[1], (kernel_size, kernel_size, in_channels),
                              jnp.float32, -0.3, 0.3)
    dw_b = jax.random.uniform(ks[2], (1, in_channels), jnp.float32, -0.1, 0.1)
    pw_w = jax.random.uniform(ks[3], (in_channels, out_channels), jnp.float32, -0.5, 0.5)
    pw_b = jax.random.uniform(ks[4], (1, out_channels), jnp.float32, -0.1, 0.1)
    gamma = jax.random.uniform(ks[5], (time_steps, out_channels), jnp.float32, 0.5, 1.5)
    return dict(lif=lif, dw_w=dw_w, dw_b=dw_b, pw_w=pw_w, pw_b=pw_b, gamma=gamma)


def lcbv2_reference(x_btchw, p):
    """Pure-JAX reference (same math, NCHW + lax.conv) for verification."""
    B, T, C, H, W = x_btchw.shape
    beta = jnp.clip(p["lif"][0], 0.0, 1.0)
    thr = p["lif"][1]
    gf = p["lif"][2]
    dw_w = jnp.transpose(p["dw_w"], (2, 0, 1))[:, None, :, :]     # (C,1,KH,KW)
    dw_b = p["dw_b"][0]
    pw_w = jnp.transpose(p["pw_w"], (1, 0))[:, :, None, None]     # (OC,C,1,1)
    pw_b = p["pw_b"][0]
    gamma = p["gamma"]
    OC = pw_b.shape[0]
    dn = ("NCHW", "OIHW", "NCHW")
    x = jnp.transpose(x_btchw, (1, 0, 2, 3, 4))                   # (T,B,C,H,W)

    def conv_block(s):
        y = jax.lax.conv_general_dilated(s, dw_w, (1, 1), ((1, 1), (1, 1)),
                                         dimension_numbers=dn, feature_group_count=C)
        y = y + dw_b[None, :, None, None]
        y = jax.lax.conv_general_dilated(y, pw_w, (1, 1), ((0, 0), (0, 0)),
                                         dimension_numbers=dn)
        return y + pw_b[None, :, None, None]

    def bn(y, g):
        mu = jnp.mean(y, axis=(0, 2, 3), keepdims=True)
        var = jnp.mean((y - mu) ** 2, axis=(0, 2, 3), keepdims=True)
        return (y - mu) / jnp.sqrt(var + EPS) * g[None, :, None, None]

    def lif_step(x_t, mem):
        reset = (mem > thr).astype(jnp.float32)
        mem = beta * mem + x_t - reset * thr
        spk = (mem > thr).astype(jnp.float32) * gf
        return spk, mem

    rec = jnp.zeros((T, B, OC, H, W), jnp.float32)
    mem_f = jnp.zeros((B, C, H, W), jnp.float32)
    mem_i = jnp.zeros((B, C, H, W), jnp.float32)
    for s in range(T):
        inv = T - 1 - s
        spk_f, mem_f = lif_step(x[s], mem_f)
        rec = rec.at[s].add(0.5 * bn(jax.nn.silu(conv_block(spk_f)), gamma[s]))
        spk_i, mem_i = lif_step(x[inv], mem_i)
        rec = rec.at[inv].add(0.5 * bn(jax.nn.silu(conv_block(spk_i)), gamma[inv]))
    return jnp.transpose(rec, (1, 0, 2, 3, 4))


if __name__ == "__main__":
    B, T, C, OC, H, W, K = 2, 4, 4, 8, 16, 16, 3
    key = jax.random.PRNGKey(0)
    kx, kp = jax.random.split(key)
    params = make_params(kp, C, OC, K, T)
    x = jax.random.uniform(kx, (B, T, C, H, W), jnp.float32, 0.0, 2.0)

    out = jax.jit(lcbv2_forward)(x, params)
    out = jax.block_until_ready(out)

    ref = lcbv2_reference(x, params)
    assert out.shape == (B, T, OC, H, W)
    err = float(jnp.max(jnp.abs(out - ref)))
    assert jnp.allclose(out, ref, atol=2e-3, rtol=2e-3), err
    print("KERNEL_OK")
</pallas_src>

<mosaic_0001>
module attributes {stable_mosaic.version = 11 : i64} {
  func.func @_lcbv2_fused_kernel(%arg0: memref<2xf32, #tpu.memory_space<smem>>, %arg1: memref<4x8x256xf32, #tpu.memory_space<vmem>>, %arg2: memref<9x8x256xf32, #tpu.memory_space<vmem>>, %arg3: memref<4x8x1xf32, #tpu.memory_space<vmem>>, %arg4: memref<8x1xf32, #tpu.memory_space<vmem>>, %arg5: memref<4x8x1xf32, #tpu.memory_space<vmem>>, %arg6: memref<2x4x8x256xf32, #tpu.memory_space<vmem>>) attributes {dimension_semantics = [], scalar_prefetch = 0 : i64, scratch_operands = 0 : i64, tpu.core_type = #tpu.core_type<tc>} {
    %c0 = arith.constant 0 : index
    %0 = memref.load %arg0[%c0] : memref<2xf32, #tpu.memory_space<smem>>
    %c1 = arith.constant 1 : index
    %1 = memref.load %arg0[%c1] : memref<2xf32, #tpu.memory_space<smem>>
    %c0_0 = arith.constant 0 : index
    %c0_1 = arith.constant 0 : index
    %c0_2 = arith.constant 0 : index
    %2 = vector.load %arg3[%c0_0, %c0_1, %c0_2] : memref<4x8x1xf32, #tpu.memory_space<vmem>>, vector<1x8x1xf32>
    %3 = vector.shape_cast %2 : vector<1x8x1xf32> to vector<8x1xf32>
    %c1_3 = arith.constant 1 : index
    %c0_4 = arith.constant 0 : index
    %c0_5 = arith.constant 0 : index
    %4 = vector.load %arg3[%c1_3, %c0_4, %c0_5] : memref<4x8x1xf32, #tpu.memory_space<vmem>>, vector<1x8x1xf32>
    %5 = vector.shape_cast %4 : vector<1x8x1xf32> to vector<8x1xf32>
    %c2 = arith.constant 2 : index
    %c0_6 = arith.constant 0 : index
    %c0_7 = arith.constant 0 : index
    %6 = vector.load %arg3[%c2, %c0_6, %c0_7] : memref<4x8x1xf32, #tpu.memory_space<vmem>>, vector<1x8x1xf32>
    %7 = vector.shape_cast %6 : vector<1x8x1xf32> to vector<8x1xf32>
    %c3 = arith.constant 3 : index
    %c0_8 = arith.constant 0 : index
    %c0_9 = arith.constant 0 : index
    %8 = vector.load %arg3[%c3, %c0_8, %c0_9] : memref<4x8x1xf32, #tpu.memory_space<vmem>>, vector<1x8x1xf32>
    %9 = vector.shape_cast %8 : vector<1x8x1xf32> to vector<8x1xf32>
    %c0_10 = arith.constant 0 : index
    %c0_11 = arith.constant 0 : index
    %10 = vector.load %arg4[%c0_10, %c0_11] : memref<8x1xf32, #tpu.memory_space<vmem>>, vector<8x1xf32>
    %cst = arith.constant 0.000000e+00 : f32
    %11 = vector.broadcast %cst : f32 to vector<8x256xf32>
    %cst_12 = arith.constant 0.000000e+00 : f32
    %12 = vector.broadcast %cst_12 : f32 to vector<8x256xf32>
    %cst_13 = arith.constant 0.000000e+00 : f32
    %13 = vector.broadcast %cst_13 : f32 to vector<8x256xf32>
    %cst_14 = arith.constant 0.000000e+00 : f32
    %14 = vector.broadcast %cst_14 : f32 to vector<8x256xf32>
    %c0_15 = arith.constant 0 : index
    %c0_16 = arith.constant 0 : index
    %c0_17 = arith.constant 0 : index
    %15 = vector.load %arg1[%c0_15, %c0_16, %c0_17] : memref<4x8x256xf32, #tpu.memory_space<vmem>>, vector<1x8x256xf32>
    %16 = vector.shape_cast %15 : vector<1x8x256xf32> to vector<8x256xf32>
    %c0_18 = arith.constant 0 : index
    %c0_19 = arith.constant 0 : index
    %c0_20 = arith.constant 0 : index
    %17 = vector.load %arg5[%c0_18, %c0_19, %c0_20] : memref<4x8x1xf32, #tpu.memory_space<vmem>>, vector<1x8x1xf32>
    %18 = vector.shape_cast %17 : vector<1x8x1xf32> to vector<8x1xf32>
    %19 = vector.broadcast %0 : f32 to vector<8x256xf32>
    %20 = arith.mulf %19, %11 : vector<8x256xf32>
    %21 = arith.addf %20, %16 : vector<8x256xf32>
    %22 = vector.broadcast %1 : f32 to vector<8x256xf32>
    %23 = arith.mulf %12, %22 : vector<8x256xf32>
    %24 = arith.subf %21, %23 : vector<8x256xf32>
    %25 = vector.broadcast %1 : f32 to vector<8x256xf32>
    %26 = arith.cmpf ogt, %24, %25 : vector<8x256xf32>
    %cst_21 = arith.constant 1.000000e+00 : f32
    %cst_22 = arith.constant 0.000000e+00 : f32
    %27 = vector.broadcast %cst_21 : f32 to vector<8x256xf32>
    %28 = vector.broadcast %cst_22 : f32 to vector<8x256xf32>
    %29 = arith.select %26, %27, %28 : vector<8x256xi1>, vector<8x256xf32>
    %c17_i32 = arith.constant 17 : i32
    %30 = tpu.dynamic_rotate %29 by %c17_i32 dim 1 : vector<8x256xf32>, i32 -> vector<8x256xf32>
    %c0_23 = arith.constant 0 : index
    %c0_24 = arith.constant 0 : index
    %c0_25 = arith.constant 0 : index
    %31 = vector.load %arg2[%c0_23, %c0_24, %c0_25] : memref<9x8x256xf32, #tpu.memory_space<vmem>>, vector<1x8x256xf32>
    %32 = vector.shape_cast %31 : vector<1x8x256xf32> to vector<8x256xf32>
    %33 = arith.mulf %30, %32 : vector<8x256xf32>
    %c16_i32 = arith.constant 16 : i32
    %34 = tpu.dynamic_rotate %29 by %c16_i32 dim 1 : vector<8x256xf32>, i32 -> vector<8x256xf32>
    %c1_26 = arith.constant 1 : index
    %c0_27 = arith.constant 0 : index
    %c0_28 = arith.constant 0 : index
    %35 = vector.load %arg2[%c1_26, %c0_27, %c0_28] : memref<9x8x256xf32, #tpu.memory_space<vmem>>, vector<1x8x256xf32>
    %36 = vector.shape_cast %35 : vector<1x8x256xf32> to vector<8x256xf32>
    %37 = arith.mulf %34, %36 : vector<8x256xf32>
    %38 = arith.addf %33, %37 : vector<8x256xf32>
    %c15_i32 = arith.constant 15 : i32
    %39 = tpu.dynamic_rotate %29 by %c15_i32 dim 1 : vector<8x256xf32>, i32 -> vector<8x256xf32>
    %c2_29 = arith.constant 2 : index
    %c0_30 = arith.constant 0 : index
    %c0_31 = arith.constant 0 : index
    %40 = vector.load %arg2[%c2_29, %c0_30, %c0_31] : memref<9x8x256xf32, #tpu.memory_space<vmem>>, vector<1x8x256xf32>
    %41 = vector.shape_cast %40 : vector<1x8x256xf32> to vector<8x256xf32>
    %42 = arith.mulf %39, %41 : vector<8x256xf32>
    %43 = arith.addf %38, %42 : vector<8x256xf32>
    %c1_i32 = arith.constant 1 : i32
    %44 = tpu.dynamic_rotate %29 by %c1_i32 dim 1 : vector<8x256xf32>, i32 -> vector<8x256xf32>
    %c3_32 = arith.constant 3 : index
    %c0_33 = arith.constant 0 : index
    %c0_34 = arith.constant 0 : index
    %45 = vector.load %arg2[%c3_32, %c0_33, %c0_34] : memref<9x8x256xf32, #tpu.memory_space<vmem>>, vector<1x8x256xf32>
    %46 = vector.shape_cast %45 : vector<1x8x256xf32> to vector<8x256xf32>
    %47 = arith.mulf %44, %46 : vector<8x256xf32>
    %48 = arith.addf %43, %47 : vector<8x256xf32>
    %c4 = arith.constant 4 : index
    %c0_35 = arith.constant 0 : index
    %c0_36 = arith.constant 0 : index
    %49 = vector.load %arg2[%c4, %c0_35, %c0_36] : memref<9x8x256xf32, #tpu.memory_space<vmem>>, vector<1x8x256xf32>
    %50 = vector.shape_cast %49 : vector<1x8x256xf32> to vector<8x256xf32>
    %51 = arith.mulf %29, %50 : vector<8x256xf32>
    %52 = arith.addf %48, %51 : vector<8x256xf32>
    %c255_i32 = arith.constant 255 : i32
    %53 = tpu.dynamic_rotate %29 by %c255_i32 dim 1 : vector<8x256xf32>, i32 -> vector<8x256xf32>
    %c5 = arith.constant 5 : index
    %c0_37 = arith.constant 0 : index
    %c0_38 = arith.constant 0 : index
    %54 = vector.load %arg2[%c5, %c0_37, %c0_38] : memref<9x8x256xf32, #tpu.memory_space<vmem>>, vector<1x8x256xf32>
    %55 = vector.shape_cast %54 : vector<1x8x256xf32> to vector<8x256xf32>
    %56 = arith.mulf %53, %55 : vector<8x256xf32>
    %57 = arith.addf %52, %56 : vector<8x256xf32>
    %c241_i32 = arith.constant 241 : i32
    %58 = tpu.dynamic_rotate %29 by %c241_i32 dim 1 : vector<8x256xf32>, i32 -> vector<8x256xf32>
    %c6 = arith.constant 6 : index
    %c0_39 = arith.constant 0 : index
    %c0_40 = arith.constant 0 : index
    %59 = vector.load %arg2[%c6, %c0_39, %c0_40] : memref<9x8x256xf32, #tpu.memory_space<vmem>>, vector<1x8x256xf32>
    %60 = vector.shape_cast %59 : vector<1x8x256xf32> to vector<8x256xf32>
    %61 = arith.mulf %58, %60 : vector<8x256xf32>
    %62 = arith.addf %57, %61 : vector<8x256xf32>
    %c240_i32 = arith.constant 240 : i32
    %63 = tpu.dynamic_rotate %29 by %c240_i32 dim 1 : vector<8x256xf32>, i32 -> vector<8x256xf32>
    %c7 = arith.constant 7 : index
    %c0_41 = arith.constant 0 : index
    %c0_42 = arith.constant 0 : index
    %64 = vector.load %arg2[%c7, %c0_41, %c0_42] : memref<9x8x256xf32, #tpu.memory_space<vmem>>, vector<1x8x256xf32>
    %65 = vector.shape_cast %64 : vector<1x8x256xf32> to vector<8x256xf32>
    %66 = arith.mulf %63, %65 : vector<8x256xf32>
    %67 = arith.addf %62, %66 : vector<8x256xf32>
    %c239_i32 = arith.constant 239 : i32
    %68 = tpu.dynamic_rotate %29 by %c239_i32 dim 1 : vector<8x256xf32>, i32 -> vector<8x256xf32>
    %c8 = arith.constant 8 : index
    %c0_43 = arith.constant 0 : index
    %c0_44 = arith.constant 0 : index
    %69 = vector.load %arg2[%c8, %c0_43, %c0_44] : memref<9x8x256xf32, #tpu.memory_space<vmem>>, vector<1x8x256xf32>
    %70 = vector.shape_cast %69 : vector<1x8x256xf32> to vector<8x256xf32>
    %71 = arith.mulf %68, %70 : vector<8x256xf32>
    %72 = arith.addf %67, %71 : vector<8x256xf32>
    %73 = vector.extract_strided_slice %72 {offsets = [0, 0], sizes = [1, 256], strides = [1, 1]} : vector<8x256xf32> to vector<1x256xf32>
    %74 = vector.broadcast %73 : vector<1x256xf32> to vector<8x256xf32>
    %75 = vector.broadcast %3 : vector<8x1xf32> to vector<8x256xf32>
    %76 = arith.mulf %74, %75 : vector<8x256xf32>
    %77 = vector.broadcast %10 : vector<8x1xf32> to vector<8x256xf32>
    %78 = arith.addf %76, %77 : vector<8x256xf32>
    %79 = vector.extract_strided_slice %72 {offsets = [1, 0], sizes = [1, 256], strides = [1, 1]} : vector<8x256xf32> to vector<1x256xf32>
    %80 = vector.broadcast %79 : vector<1x256xf32> to vector<8x256xf32>
    %81 = vector.broadcast %5 : vector<8x1xf32> to vector<8x256xf32>
    %82 = arith.mulf %80, %81 : vector<8x256xf32>
    %83 = arith.addf %78, %82 : vector<8x256xf32>
    %84 = vector.extract_strided_slice %72 {offsets = [2, 0], sizes = [1, 256], strides = [1, 1]} : vector<8x256xf32> to vector<1x256xf32>
    %85 = vector.broadcast %84 : vector<1x256xf32> to vector<8x256xf32>
    %86 = vector.broadcast %7 : vector<8x1xf32> to vector<8x256xf32>
    %87 = arith.mulf %85, %86 : vector<8x256xf32>
    %88 = arith.addf %83, %87 : vector<8x256xf32>
    %89 = vector.extract_strided_slice %72 {offsets = [3, 0], sizes = [1, 256], strides = [1, 1]} : vector<8x256xf32> to vector<1x256xf32>
    %90 = vector.broadcast %89 : vector<1x256xf32> to vector<8x256xf32>
    %91 = vector.broadcast %9 : vector<8x1xf32> to vector<8x256xf32>
    %92 = arith.mulf %90, %91 : vector<8x256xf32>
    %93 = arith.addf %88, %92 : vector<8x256xf32>
    %cst_45 = arith.constant 0.000000e+00 : f32
    %94 = vector.broadcast %cst_45 : f32 to vector<8x256xf32>
    %95 = arith.subf %94, %93 : vector<8x256xf32>
    %96 = math.exp %95 : vector<8x256xf32>
    %cst_46 = arith.constant 1.000000e+00 : f32
    %97 = vector.broadcast %cst_46 : f32 to vector<8x256xf32>
    %98 = arith.addf %97, %96 : vector<8x256xf32>
    %99 = tpu.reciprocal %98 : vector<8x256xf32> -> vector<8x256xf32>
    %100 = arith.mulf %93, %99 : vector<8x256xf32>
    %101 = vector.extract_strided_slice %72 {offsets = [4, 0], sizes = [1, 256], strides = [1, 1]} : vector<8x256xf32> to vector<1x256xf32>
    %102 = vector.broadcast %101 : vector<1x256xf32> to vector<8x256xf32>
    %103 = vector.broadcast %3 : vector<8x1xf32> to vector<8x256xf32>
    %104 = arith.mulf %102, %103 : vector<8x256xf32>
    %105 = vector.broadcast %10 : vector<8x1xf32> to vector<8x256xf32>
    %106 = arith.addf %104, %105 : vector<8x256xf32>
    %107 = vector.extract_strided_slice %72 {offsets = [5, 0], sizes = [1, 256], strides = [1, 1]} : vector<8x256xf32> to vector<1x256xf32>
    %108 = vector.broadcast %107 : vector<1x256xf32> to vector<8x256xf32>
    %109 = vector.broadcast %5 : vector<8x1xf32> to vector<8x256xf32>
    %110 = arith.mulf %108, %109 : vector<8x256xf32>
    %111 = arith.addf %106, %110 : vector<8x256xf32>
    %112 = vector.extract_strided_slice %72 {offsets = [6, 0], sizes = [1, 256], strides = [1, 1]} : vector<8x256xf32> to vector<1x256xf32>
    %113 = vector.broadcast %112 : vector<1x256xf32> to vector<8x256xf32>
    %114 = vector.broadcast %7 : vector<8x1xf32> to vector<8x256xf32>
    %115 = arith.mulf %113, %114 : vector<8x256xf32>
    %116 = arith.addf %111, %115 : vector<8x256xf32>
    %117 = vector.extract_strided_slice %72 {offsets = [7, 0], sizes = [1, 256], strides = [1, 1]} : vector<8x256xf32> to vector<1x256xf32>
    %118 = vector.broadcast %117 : vector<1x256xf32> to vector<8x256xf32>
    %119 = vector.broadcast %9 : vector<8x1xf32> to vector<8x256xf32>
    %120 = arith.mulf %118, %119 : vector<8x256xf32>
    %121 = arith.addf %116, %120 : vector<8x256xf32>
    %cst_47 = arith.constant 0.000000e+00 : f32
    %122 = vector.broadcast %cst_47 : f32 to vector<8x256xf32>
    %123 = arith.subf %122, %121 : vector<8x256xf32>
    %124 = math.exp %123 : vector<8x256xf32>
    %cst_48 = arith.constant 1.000000e+00 : f32
    %125 = vector.broadcast %cst_48 : f32 to vector<8x256xf32>
    %126 = arith.addf %125, %124 : vector<8x256xf32>
    %127 = tpu.reciprocal %126 : vector<8x256xf32> -> vector<8x256xf32>
    %128 = arith.mulf %121, %127 : vector<8x256xf32>
    %cst_49 = arith.constant dense<0.000000e+00> : vector<8xf32>
    %129 = vector.multi_reduction <add>, %100, %cst_49 [1] : vector<8x256xf32> to vector<8xf32>
    %130 = vector.shape_cast %129 : vector<8xf32> to vector<8x1xf32>
    %cst_50 = arith.constant dense<0.000000e+00> : vector<8xf32>
    %131 = vector.multi_reduction <add>, %128, %cst_50 [1] : vector<8x256xf32> to vector<8xf32>
    %132 = vector.shape_cast %131 : vector<8xf32> to vector<8x1xf32>
    %133 = arith.addf %130, %132 : vector<8x1xf32>
    %cst_51 = arith.constant 0.001953125 : f32
    %134 = vector.broadcast %cst_51 : f32 to vector<8x1xf32>
    %135 = arith.mulf %133, %134 : vector<8x1xf32>
    %136 = vector.broadcast %135 : vector<8x1xf32> to vector<8x256xf32>
    %137 = arith.subf %100, %136 : vector<8x256xf32>
    %138 = vector.broadcast %135 : vector<8x1xf32> to vector<8x256xf32>
    %139 = arith.subf %128, %138 : vector<8x256xf32>
    %140 = arith.mulf %137, %137 : vector<8x256xf32>
    %cst_52 = arith.constant dense<0.000000e+00> : vector<8xf32>
    %141 = vector.multi_reduction <add>, %140, %cst_52 [1] : vector<8x256xf32> to vector<8xf32>
    %142 = vector.shape_cast %141 : vector<8xf32> to vector<8x1xf32>
    %143 = arith.mulf %139, %139 : vector<8x256xf32>
    %cst_53 = arith.constant dense<0.000000e+00> : vector<8xf32>
    %144 = vector.multi_reduction <add>, %143, %cst_53 [1] : vector<8x256xf32> to vector<8xf32>
    %145 = vector.shape_cast %144 : vector<8xf32> to vector<8x1xf32>
    %146 = arith.addf %142, %145 : vector<8x1xf32>
    %cst_54 = arith.constant 0.001953125 : f32
    %147 = vector.broadcast %cst_54 : f32 to vector<8x1xf32>
    %148 = arith.mulf %146, %147 : vector<8x1xf32>
    %cst_55 = arith.constant 9.99999974E-6 : f32
    %149 = vector.broadcast %cst_55 : f32 to vector<8x1xf32>
    %150 = arith.addf %148, %149 : vector<8x1xf32>
    %151 = math.rsqrt %150 : vector<8x1xf32>
    %152 = arith.mulf %18, %151 : vector<8x1xf32>
    %153 = vector.broadcast %152 : vector<8x1xf32> to vector<8x256xf32>
    %154 = arith.mulf %137, %153 : vector<8x256xf32>
    %155 = vector.broadcast %152 : vector<8x1xf32> to vector<8x256xf32>
    %156 = arith.mulf %139, %155 : vector<8x256xf32>
    %c3_56 = arith.constant 3 : index
    %c0_57 = arith.constant 0 : index
    %c0_58 = arith.constant 0 : index
    %157 = vector.load %arg1[%c3_56, %c0_57, %c0_58] : memref<4x8x256xf32, #tpu.memory_space<vmem>>, vector<1x8x256xf32>
    %158 = vector.shape_cast %157 : vector<1x8x256xf32> to vector<8x256xf32>
    %c3_59 = arith.constant 3 : index
    %c0_60 = arith.constant 0 : index
    %c0_61 = arith.constant 0 : index
    %159 = vector.load %arg5[%c3_59, %c0_60, %c0_61] : memref<4x8x1xf32, #tpu.memory_space<vmem>>, vector<1x8x1xf32>
    %160 = vector.shape_cast %159 : vector<1x8x1xf32> to vector<8x1xf32>
    %161 = vector.broadcast %0 : f32 to vector<8x256xf32>
    %162 = arith.mulf %161, %13 : vector<8x256xf32>
    %163 = arith.addf %162, %158 : vector<8x256xf32>
    %164 = vector.broadcast %1 : f32 to vector<8x256xf32>
    %165 = arith.mulf %14, %164 : vector<8x256xf32>
    %166 = arith.subf %163, %165 : vector<8x256xf32>
    %167 = vector.broadcast %1 : f32 to vector<8x256xf32>
    %168 = arith.cmpf ogt, %166, %167 : vector<8x256xf32>
    %cst_62 = arith.constant 1.000000e+00 : f32
    %cst_63 = arith.constant 0.000000e+00 : f32
    %169 = vector.broadcast %cst_62 : f32 to vector<8x256xf32>
    %170 = vector.broadcast %cst_63 : f32 to vector<8x256xf32>
    %171 = arith.select %168, %169, %170 : vector<8x256xi1>, vector<8x256xf32>
    %c17_i32_64 = arith.constant 17 : i32
    %172 = tpu.dynamic_rotate %171 by %c17_i32_64 dim 1 : vector<8x256xf32>, i32 -> vector<8x256xf32>
    %c0_65 = arith.constant 0 : index
    %c0_66 = arith.constant 0 : index
    %c0_67 = arith.constant 0 : index
    %173 = vector.load %arg2[%c0_65, %c0_66, %c0_67] : memref<9x8x256xf32, #tpu.memory_space<vmem>>, vector<1x8x256xf32>
    %174 = vector.shape_cast %173 : vector<1x8x256xf32> to vector<8x256xf32>
    %175 = arith.mulf %172, %174 : vector<8x256xf32>
    %c16_i32_68 = arith.constant 16 : i32
    %176 = tpu.dynamic_rotate %171 by %c16_i32_68 dim 1 : vector<8x256xf32>, i32 -> vector<8x256xf32>
    %c1_69 = arith.constant 1 : index
    %c0_70 = arith.constant 0 : index
    %c0_71 = arith.constant 0 : index
    %177 = vector.load %arg2[%c1_69, %c0_70, %c0_71] : memref<9x8x256xf32, #tpu.memory_space<vmem>>, vector<1x8x256xf32>
    %178 = vector.shape_cast %177 : vector<1x8x256xf32> to vector<8x256xf32>
    %179 = arith.mulf %176, %178 : vector<8x256xf32>
    %180 = arith.addf %175, %179 : vector<8x256xf32>
    %c15_i32_72 = arith.constant 15 : i32
    %181 = tpu.dynamic_rotate %171 by %c15_i32_72 dim 1 : vector<8x256xf32>, i32 -> vector<8x256xf32>
    %c2_73 = arith.constant 2 : index
    %c0_74 = arith.constant 0 : index
    %c0_75 = arith.constant 0 : index
    %182 = vector.load %arg2[%c2_73, %c0_74, %c0_75] : memref<9x8x256xf32, #tpu.memory_space<vmem>>, vector<1x8x256xf32>
    %183 = vector.shape_cast %182 : vector<1x8x256xf32> to vector<8x256xf32>
    %184 = arith.mulf %181, %183 : vector<8x256xf32>
    %185 = arith.addf %180, %184 : vector<8x256xf32>
    %c1_i32_76 = arith.constant 1 : i32
    %186 = tpu.dynamic_rotate %171 by %c1_i32_76 dim 1 : vector<8x256xf32>, i32 -> vector<8x256xf32>
    %c3_77 = arith.constant 3 : index
    %c0_78 = arith.constant 0 : index
    %c0_79 = arith.constant 0 : index
    %187 = vector.load %arg2[%c3_77, %c0_78, %c0_79] : memref<9x8x256xf32, #tpu.memory_space<vmem>>, vector<1x8x256xf32>
    %188 = vector.shape_cast %187 : vector<1x8x256xf32> to vector<8x256xf32>
    %189 = arith.mulf %186, %188 : vector<8x256xf32>
    %190 = arith.addf %185, %189 : vector<8x256xf32>
    %c4_80 = arith.constant 4 : index
    %c0_81 = arith.constant 0 : index
    %c0_82 = arith.constant 0 : index
    %191 = vector.load %arg2[%c4_80, %c0_81, %c0_82] : memref<9x8x256xf32, #tpu.memory_space<vmem>>, vector<1x8x256xf32>
    %192 = vector.shape_cast %191 : vector<1x8x256xf32> to vector<8x256xf32>
    %193 = arith.mulf %171, %192 : vector<8x256xf32>
    %194 = arith.addf %190, %193 : vector<8x256xf32>
    %c255_i32_83 = arith.constant 255 : i32
    %195 = tpu.dynamic_rotate %171 by %c255_i32_83 dim 1 : vector<8x256xf32>, i32 -> vector<8x256xf32>
    %c5_84 = arith.constant 5 : index
    %c0_85 = arith.constant 0 : index
    %c0_86 = arith.constant 0 : index
    %196 = vector.load %arg2[%c5_84, %c0_85, %c0_86] : memref<9x8x256xf32, #tpu.memory_space<vmem>>, vector<1x8x256xf32>
    %197 = vector.shape_cast %196 : vector<1x8x256xf32> to vector<8x256xf32>
    %198 = arith.mulf %195, %197 : vector<8x256xf32>
    %199 = arith.addf %194, %198 : vector<8x256xf32>
    %c241_i32_87 = arith.constant 241 : i32
    %200 = tpu.dynamic_rotate %171 by %c241_i32_87 dim 1 : vector<8x256xf32>, i32 -> vector<8x256xf32>
    %c6_88 = arith.constant 6 : index
    %c0_89 = arith.constant 0 : index
    %c0_90 = arith.constant 0 : index
    %201 = vector.load %arg2[%c6_88, %c0_89, %c0_90] : memref<9x8x256xf32, #tpu.memory_space<vmem>>, vector<1x8x256xf32>
    %202 = vector.shape_cast %201 : vector<1x8x256xf32> to vector<8x256xf32>
    %203 = arith.mulf %200, %202 : vector<8x256xf32>
    %204 = arith.addf %199, %203 : vector<8x256xf32>
    %c240_i32_91 = arith.constant 240 : i32
    %205 = tpu.dynamic_rotate %171 by %c240_i32_91 dim 1 : vector<8x256xf32>, i32 -> vector<8x256xf32>
    %c7_92 = arith.constant 7 : index
    %c0_93 = arith.constant 0 : index
    %c0_94 = arith.constant 0 : index
    %206 = vector.load %arg2[%c7_92, %c0_93, %c0_94] : memref<9x8x256xf32, #tpu.memory_space<vmem>>, vector<1x8x256xf32>
    %207 = vector.shape_cast %206 : vector<1x8x256xf32> to vector<8x256xf32>
    %208 = arith.mulf %205, %207 : vector<8x256xf32>
    %209 = arith.addf %204, %208 : vector<8x256xf32>
    %c239_i32_95 = arith.constant 239 : i32
    %210 = tpu.dynamic_rotate %171 by %c239_i32_95 dim 1 : vector<8x256xf32>, i32 -> vector<8x256xf32>
    %c8_96 = arith.constant 8 : index
    %c0_97 = arith.constant 0 : index
    %c0_98 = arith.constant 0 : index
    %211 = vector.load %arg2[%c8_96, %c0_97, %c0_98] : memref<9x8x256xf32, #tpu.memory_space<vmem>>, vector<1x8x256xf32>
    %212 = vector.shape_cast %211 : vector<1x8x256xf32> to vector<8x256xf32>
    %213 = arith.mulf %210, %212 : vector<8x256xf32>
    %214 = arith.addf %209, %213 : vector<8x256xf32>
    %215 = vector.extract_strided_slice %214 {offsets = [0, 0], sizes = [1, 256], strides = [1, 1]} : vector<8x256xf32> to vector<1x256xf32>
    %216 = vector.broadcast %215 : vector<1x256xf32> to vector<8x256xf32>
    %217 = vector.broadcast %3 : vector<8x1xf32> to vector<8x256xf32>
    %218 = arith.mulf %216, %217 : vector<8x256xf32>
    %219 = vector.broadcast %10 : vector<8x1xf32> to vector<8x256xf32>
    %220 = arith.addf %218, %219 : vector<8x256xf32>
    %221 = vector.extract_strided_slice %214 {offsets = [1, 0], sizes = [1, 256], strides = [1, 1]} : vector<8x256xf32> to vector<1x256xf32>
    %222 = vector.broadcast %221 : vector<1x256xf32> to vector<8x256xf32>
    %223 = vector.broadcast %5 : vector<8x1xf32> to vector<8x256xf32>
    %224 = arith.mulf %222, %223 : vector<8x256xf32>
    %225 = arith.addf %220, %224 : vector<8x256xf32>
    %226 = vector.extract_strided_slice %214 {offsets = [2, 0], sizes = [1, 256], strides = [1, 1]} : vector<8x256xf32> to vector<1x256xf32>
    %227 = vector.broadcast %226 : vector<1x256xf32> to vector<8x256xf32>
    %228 = vector.broadcast %7 : vector<8x1xf32> to vector<8x256xf32>
    %229 = arith.mulf %227, %228 : vector<8x256xf32>
    %230 = arith.addf %225, %229 : vector<8x256xf32>
    %231 = vector.extract_strided_slice %214 {offsets = [3, 0], sizes = [1, 256], strides = [1, 1]} : vector<8x256xf32> to vector<1x256xf32>
    %232 = vector.broadcast %231 : vector<1x256xf32> to vector<8x256xf32>
    %233 = vector.broadcast %9 : vector<8x1xf32> to vector<8x256xf32>
    %234 = arith.mulf %232, %233 : vector<8x256xf32>
    %235 = arith.addf %230, %234 : vector<8x256xf32>
    %cst_99 = arith.constant 0.000000e+00 : f32
    %236 = vector.broadcast %cst_99 : f32 to vector<8x256xf32>
    %237 = arith.subf %236, %235 : vector<8x256xf32>
    %238 = math.exp %237 : vector<8x256xf32>
    %cst_100 = arith.constant 1.000000e+00 : f32
    %239 = vector.broadcast %cst_100 : f32 to vector<8x256xf32>
    %240 = arith.addf %239, %238 : vector<8x256xf32>
    %241 = tpu.reciprocal %240 : vector<8x256xf32> -> vector<8x256xf32>
    %242 = arith.mulf %235, %241 : vector<8x256xf32>
    %243 = vector.extract_strided_slice %214 {offsets = [4, 0], sizes = [1, 256], strides = [1, 1]} : vector<8x256xf32> to vector<1x256xf32>
    %244 = vector.broadcast %243 : vector<1x256xf32> to vector<8x256xf32>
    %245 = vector.broadcast %3 : vector<8x1xf32> to vector<8x256xf32>
    %246 = arith.mulf %244, %245 : vector<8x256xf32>
    %247 = vector.broadcast %10 : vector<8x1xf32> to vector<8x256xf32>
    %248 = arith.addf %246, %247 : vector<8x256xf32>
    %249 = vector.extract_strided_slice %214 {offsets = [5, 0], sizes = [1, 256], strides = [1, 1]} : vector<8x256xf32> to vector<1x256xf32>
    %250 = vector.broadcast %249 : vector<1x256xf32> to vector<8x256xf32>
    %251 = vector.broadcast %5 : vector<8x1xf32> to vector<8x256xf32>
    %252 = arith.mulf %250, %251 : vector<8x256xf32>
    %253 = arith.addf %248, %252 : vector<8x256xf32>
    %254 = vector.extract_strided_slice %214 {offsets = [6, 0], sizes = [1, 256], strides = [1, 1]} : vector<8x256xf32> to vector<1x256xf32>
    %255 = vector.broadcast %254 : vector<1x256xf32> to vector<8x256xf32>
    %256 = vector.broadcast %7 : vector<8x1xf32> to vector<8x256xf32>
    %257 = arith.mulf %255, %256 : vector<8x256xf32>
    %258 = arith.addf %253, %257 : vector<8x256xf32>
    %259 = vector.extract_strided_slice %214 {offsets = [7, 0], sizes = [1, 256], strides = [1, 1]} : vector<8x256xf32> to vector<1x256xf32>
    %260 = vector.broadcast %259 : vector<1x256xf32> to vector<8x256xf32>
    %261 = vector.broadcast %9 : vector<8x1xf32> to vector<8x256xf32>
    %262 = arith.mulf %260, %261 : vector<8x256xf32>
    %263 = arith.addf %258, %262 : vector<8x256xf32>
    %cst_101 = arith.constant 0.000000e+00 : f32
    %264 = vector.broadcast %cst_101 : f32 to vector<8x256xf32>
    %265 = arith.subf %264, %263 : vector<8x256xf32>
    %266 = math.exp %265 : vector<8x256xf32>
    %cst_102 = arith.constant 1.000000e+00 : f32
    %267 = vector.broadcast %cst_102 : f32 to vector<8x256xf32>
    %268 = arith.addf %267, %266 : vector<8x256xf32>
    %269 = tpu.reciprocal %268 : vector<8x256xf32> -> vector<8x256xf32>
    %270 = arith.mulf %263, %269 : vector<8x256xf32>
    %cst_103 = arith.constant dense<0.000000e+00> : vector<8xf32>
    %271 = vector.multi_reduction <add>, %242, %cst_103 [1] : vector<8x256xf32> to vector<8xf32>
    %272 = vector.shape_cast %271 : vector<8xf32> to vector<8x1xf32>
    %cst_104 = arith.constant dense<0.000000e+00> : vector<8xf32>
    %273 = vector.multi_reduction <add>, %270, %cst_104 [1] : vector<8x256xf32> to vector<8xf32>
    %274 = vector.shape_cast %273 : vector<8xf32> to vector<8x1xf32>
    %275 = arith.addf %272, %274 : vector<8x1xf32>
    %cst_105 = arith.constant 0.001953125 : f32
    %276 = vector.broadcast %cst_105 : f32 to vector<8x1xf32>
    %277 = arith.mulf %275, %276 : vector<8x1xf32>
    %278 = vector.broadcast %277 : vector<8x1xf32> to vector<8x256xf32>
    %279 = arith.subf %242, %278 : vector<8x256xf32>
    %280 = vector.broadcast %277 : vector<8x1xf32> to vector<8x256xf32>
    %281 = arith.subf %270, %280 : vector<8x256xf32>
    %282 = arith.mulf %279, %279 : vector<8x256xf32>
    %cst_106 = arith.constant dense<0.000000e+00> : vector<8xf32>
    %283 = vector.multi_reduction <add>, %282, %cst_106 [1] : vector<8x256xf32> to vector<8xf32>
    %284 = vector.shape_cast %283 : vector<8xf32> to vector<8x1xf32>
    %285 = arith.mulf %281, %281 : vector<8x256xf32>
    %cst_107 = arith.constant dense<0.000000e+00> : vector<8xf32>
    %286 = vector.multi_reduction <add>, %285, %cst_107 [1] : vector<8x256xf32> to vector<8xf32>
    %287 = vector.shape_cast %286 : vector<8xf32> to vector<8x1xf32>
    %288 = arith.addf %284, %287 : vector<8x1xf32>
    %cst_108 = arith.constant 0.001953125 : f32
    %289 = vector.broadcast %cst_108 : f32 to vector<8x1xf32>
    %290 = arith.mulf %288, %289 : vector<8x1xf32>
    %cst_109 = arith.constant 9.99999974E-6 : f32
    %291 = vector.broadcast %cst_109 : f32 to vector<8x1xf32>
    %292 = arith.addf %290, %291 : vector<8x1xf32>
    %293 = math.rsqrt %292 : vector<8x1xf32>
    %294 = arith.mulf %160, %293 : vector<8x1xf32>
    %295 = vector.broadcast %294 : vector<8x1xf32> to vector<8x256xf32>
    %296 = arith.mulf %279, %295 : vector<8x256xf32>
    %297 = vector.broadcast %294 : vector<8x1xf32> to vector<8x256xf32>
    %298 = arith.mulf %281, %297 : vector<8x256xf32>
    %c1_110 = arith.constant 1 : index
    %c0_111 = arith.constant 0 : index
    %c0_112 = arith.constant 0 : index
    %299 = vector.load %arg1[%c1_110, %c0_111, %c0_112] : memref<4x8x256xf32, #tpu.memory_space<vmem>>, vector<1x8x256xf32>
    %300 = vector.shape_cast %299 : vector<1x8x256xf32> to vector<8x256xf32>
    %c1_113 = arith.constant 1 : index
    %c0_114 = arith.constant 0 : index
    %c0_115 = arith.constant 0 : index
    %301 = vector.load %arg5[%c1_113, %c0_114, %c0_115] : memref<4x8x1xf32, #tpu.memory_space<vmem>>, vector<1x8x1xf32>
    %302 = vector.shape_cast %301 : vector<1x8x1xf32> to vector<8x1xf32>
    %303 = vector.broadcast %0 : f32 to vector<8x256xf32>
    %304 = arith.mulf %303, %24 : vector<8x256xf32>
    %305 = arith.addf %304, %300 : vector<8x256xf32>
    %306 = vector.broadcast %1 : f32 to vector<8x256xf32>
    %307 = arith.mulf %29, %306 : vector<8x256xf32>
    %308 = arith.subf %305, %307 : vector<8x256xf32>
    %309 = vector.broadcast %1 : f32 to vector<8x256xf32>
    %310 = arith.cmpf ogt, %308, %309 : vector<8x256xf32>
    %cst_116 = arith.constant 1.000000e+00 : f32
    %cst_117 = arith.constant 0.000000e+00 : f32
    %311 = vector.broadcast %cst_116 : f32 to vector<8x256xf32>
    %312 = vector.broadcast %cst_117 : f32 to vector<8x256xf32>
    %313 = arith.select %310, %311, %312 : vector<8x256xi1>, vector<8x256xf32>
    %c17_i32_118 = arith.constant 17 : i32
    %314 = tpu.dynamic_rotate %313 by %c17_i32_118 dim 1 : vector<8x256xf32>, i32 -> vector<8x256xf32>
    %c0_119 = arith.constant 0 : index
    %c0_120 = arith.constant 0 : index
    %c0_121 = arith.constant 0 : index
    %315 = vector.load %arg2[%c0_119, %c0_120, %c0_121] : memref<9x8x256xf32, #tpu.memory_space<vmem>>, vector<1x8x256xf32>
    %316 = vector.shape_cast %315 : vector<1x8x256xf32> to vector<8x256xf32>
    %317 = arith.mulf %314, %316 : vector<8x256xf32>
    %c16_i32_122 = arith.constant 16 : i32
    %318 = tpu.dynamic_rotate %313 by %c16_i32_122 dim 1 : vector<8x256xf32>, i32 -> vector<8x256xf32>
    %c1_123 = arith.constant 1 : index
    %c0_124 = arith.constant 0 : index
    %c0_125 = arith.constant 0 : index
    %319 = vector.load %arg2[%c1_123, %c0_124, %c0_125] : memref<9x8x256xf32, #tpu.memory_space<vmem>>, vector<1x8x256xf32>
    %320 = vector.shape_cast %319 : vector<1x8x256xf32> to vector<8x256xf32>
    %321 = arith.mulf %318, %320 : vector<8x256xf32>
    %322 = arith.addf %317, %321 : vector<8x256xf32>
    %c15_i32_126 = arith.constant 15 : i32
    %323 = tpu.dynamic_rotate %313 by %c15_i32_126 dim 1 : vector<8x256xf32>, i32 -> vector<8x256xf32>
    %c2_127 = arith.constant 2 : index
    %c0_128 = arith.constant 0 : index
    %c0_129 = arith.constant 0 : index
    %324 = vector.load %arg2[%c2_127, %c0_128, %c0_129] : memref<9x8x256xf32, #tpu.memory_space<vmem>>, vector<1x8x256xf32>
    %325 = vector.shape_cast %324 : vector<1x8x256xf32> to vector<8x256xf32>
    %326 = arith.mulf %323, %325 : vector<8x256xf32>
    %327 = arith.addf %322, %326 : vector<8x256xf32>
    %c1_i32_130 = arith.constant 1 : i32
    %328 = tpu.dynamic_rotate %313 by %c1_i32_130 dim 1 : vector<8x256xf32>, i32 -> vector<8x256xf32>
    %c3_131 = arith.constant 3 : index
    %c0_132 = arith.constant 0 : index
    %c0_133 = arith.constant 0 : index
    %329 = vector.load %arg2[%c3_131, %c0_132, %c0_133] : memref<9x8x256xf32, #tpu.memory_space<vmem>>, vector<1x8x256xf32>
    %330 = vector.shape_cast %329 : vector<1x8x256xf32> to vector<8x256xf32>
    %331 = arith.mulf %328, %330 : vector<8x256xf32>
    %332 = arith.addf %327, %331 : vector<8x256xf32>
    %c4_134 = arith.constant 4 : index
    %c0_135 = arith.constant 0 : index
    %c0_136 = arith.constant 0 : index
    %333 = vector.load %arg2[%c4_134, %c0_135, %c0_136] : memref<9x8x256xf32, #tpu.memory_space<vmem>>, vector<1x8x256xf32>
    %334 = vector.shape_cast %333 : vector<1x8x256xf32> to vector<8x256xf32>
    %335 = arith.mulf %313, %334 : vector<8x256xf32>
    %336 = arith.addf %332, %335 : vector<8x256xf32>
    %c255_i32_137 = arith.constant 255 : i32
    %337 = tpu.dynamic_rotate %313 by %c255_i32_137 dim 1 : vector<8x256xf32>, i32 -> vector<8x256xf32>
    %c5_138 = arith.constant 5 : index
    %c0_139 = arith.constant 0 : index
    %c0_140 = arith.constant 0 : index
    %338 = vector.load %arg2[%c5_138, %c0_139, %c0_140] : memref<9x8x256xf32, #tpu.memory_space<vmem>>, vector<1x8x256xf32>
    %339 = vector.shape_cast %338 : vector<1x8x256xf32> to vector<8x256xf32>
    %340 = arith.mulf %337, %339 : vector<8x256xf32>
    %341 = arith.addf %336, %340 : vector<8x256xf32>
    %c241_i32_141 = arith.constant 241 : i32
    %342 = tpu.dynamic_rotate %313 by %c241_i32_141 dim 1 : vector<8x256xf32>, i32 -> vector<8x256xf32>
    %c6_142 = arith.constant 6 : index
    %c0_143 = arith.constant 0 : index
    %c0_144 = arith.constant 0 : index
    %343 = vector.load %arg2[%c6_142, %c0_143, %c0_144] : memref<9x8x256xf32, #tpu.memory_space<vmem>>, vector<1x8x256xf32>
    %344 = vector.shape_cast %343 : vector<1x8x256xf32> to vector<8x256xf32>
    %345 = arith.mulf %342, %344 : vector<8x256xf32>
    %346 = arith.addf %341, %345 : vector<8x256xf32>
    %c240_i32_145 = arith.constant 240 : i32
    %347 = tpu.dynamic_rotate %313 by %c240_i32_145 dim 1 : vector<8x256xf32>, i32 -> vector<8x256xf32>
    %c7_146 = arith.constant 7 : index
    %c0_147 = arith.constant 0 : index
    %c0_148 = arith.constant 0 : index
    %348 = vector.load %arg2[%c7_146, %c0_147, %c0_148] : memref<9x8x256xf32, #tpu.memory_space<vmem>>, vector<1x8x256xf32>
    %349 = vector.shape_cast %348 : vector<1x8x256xf32> to vector<8x256xf32>
    %350 = arith.mulf %347, %349 : vector<8x256xf32>
    %351 = arith.addf %346, %350 : vector<8x256xf32>
    %c239_i32_149 = arith.constant 239 : i32
    %352 = tpu.dynamic_rotate %313 by %c239_i32_149 dim 1 : vector<8x256xf32>, i32 -> vector<8x256xf32>
    %c8_150 = arith.constant 8 : index
    %c0_151 = arith.constant 0 : index
    %c0_152 = arith.constant 0 : index
    %353 = vector.load %arg2[%c8_150, %c0_151, %c0_152] : memref<9x8x256xf32, #tpu.memory_space<vmem>>, vector<1x8x256xf32>
    %354 = vector.shape_cast %353 : vector<1x8x256xf32> to vector<8x256xf32>
    %355 = arith.mulf %352, %354 : vector<8x256xf32>
    %356 = arith.addf %351, %355 : vector<8x256xf32>
    %357 = vector.extract_strided_slice %356 {offsets = [0, 0], sizes = [1, 256], strides = [1, 1]} : vector<8x256xf32> to vector<1x256xf32>
    %358 = vector.broadcast %357 : vector<1x256xf32> to vector<8x256xf32>
    %359 = vector.broadcast %3 : vector<8x1xf32> to vector<8x256xf32>
    %360 = arith.mulf %358, %359 : vector<8x256xf32>
    %361 = vector.broadcast %10 : vector<8x1xf32> to vector<8x256xf32>
    %362 = arith.addf %360, %361 : vector<8x256xf32>
    %363 = vector.extract_strided_slice %356 {offsets = [1, 0], sizes = [1, 256], strides = [1, 1]} : vector<8x256xf32> to vector<1x256xf32>
    %364 = vector.broadcast %363 : vector<1x256xf32> to vector<8x256xf32>
    %365 = vector.broadcast %5 : vector<8x1xf32> to vector<8x256xf32>
    %366 = arith.mulf %364, %365 : vector<8x256xf32>
    %367 = arith.addf %362, %366 : vector<8x256xf32>
    %368 = vector.extract_strided_slice %356 {offsets = [2, 0], sizes = [1, 256], strides = [1, 1]} : vector<8x256xf32> to vector<1x256xf32>
    %369 = vector.broadcast %368 : vector<1x256xf32> to vector<8x256xf32>
    %370 = vector.broadcast %7 : vector<8x1xf32> to vector<8x256xf32>
    %371 = arith.mulf %369, %370 : vector<8x256xf32>
    %372 = arith.addf %367, %371 : vector<8x256xf32>
    %373 = vector.extract_strided_slice %356 {offsets = [3, 0], sizes = [1, 256], strides = [1, 1]} : vector<8x256xf32> to vector<1x256xf32>
    %374 = vector.broadcast %373 : vector<1x256xf32> to vector<8x256xf32>
    %375 = vector.broadcast %9 : vector<8x1xf32> to vector<8x256xf32>
    %376 = arith.mulf %374, %375 : vector<8x256xf32>
    %377 = arith.addf %372, %376 : vector<8x256xf32>
    %cst_153 = arith.constant 0.000000e+00 : f32
    %378 = vector.broadcast %cst_153 : f32 to vector<8x256xf32>
    %379 = arith.subf %378, %377 : vector<8x256xf32>
    %380 = math.exp %379 : vector<8x256xf32>
    %cst_154 = arith.constant 1.000000e+00 : f32
    %381 = vector.broadcast %cst_154 : f32 to vector<8x256xf32>
    %382 = arith.addf %381, %380 : vector<8x256xf32>
    %383 = tpu.reciprocal %382 : vector<8x256xf32> -> vector<8x256xf32>
    %384 = arith.mulf %377, %383 : vector<8x256xf32>
    %385 = vector.extract_strided_slice %356 {offsets = [4, 0], sizes = [1, 256], strides = [1, 1]} : vector<8x256xf32> to vector<1x256xf32>
    %386 = vector.broadcast %385 : vector<1x256xf32> to vector<8x256xf32>
    %387 = vector.broadcast %3 : vector<8x1xf32> to vector<8x256xf32>
    %388 = arith.mulf %386, %387 : vector<8x256xf32>
    %389 = vector.broadcast %10 : vector<8x1xf32> to vector<8x256xf32>
    %390 = arith.addf %388, %389 : vector<8x256xf32>
    %391 = vector.extract_strided_slice %356 {offsets = [5, 0], sizes = [1, 256], strides = [1, 1]} : vector<8x256xf32> to vector<1x256xf32>
    %392 = vector.broadcast %391 : vector<1x256xf32> to vector<8x256xf32>
    %393 = vector.broadcast %5 : vector<8x1xf32> to vector<8x256xf32>
    %394 = arith.mulf %392, %393 : vector<8x256xf32>
    %395 = arith.addf %390, %394 : vector<8x256xf32>
    %396 = vector.extract_strided_slice %356 {offsets = [6, 0], sizes = [1, 256], strides = [1, 1]} : vector<8x256xf32> to vector<1x256xf32>
    %397 = vector.broadcast %396 : vector<1x256xf32> to vector<8x256xf32>
    %398 = vector.broadcast %7 : vector<8x1xf32> to vector<8x256xf32>
    %399 = arith.mulf %397, %398 : vector<8x256xf32>
    %400 = arith.addf %395, %399 : vector<8x256xf32>
    %401 = vector.extract_strided_slice %356 {offsets = [7, 0], sizes = [1, 256], strides = [1, 1]} : vector<8x256xf32> to vector<1x256xf32>
    %402 = vector.broadcast %401 : vector<1x256xf32> to vector<8x256xf32>
    %403 = vector.broadcast %9 : vector<8x1xf32> to vector<8x256xf32>
    %404 = arith.mulf %402, %403 : vector<8x256xf32>
    %405 = arith.addf %400, %404 : vector<8x256xf32>
    %cst_155 = arith.constant 0.000000e+00 : f32
    %406 = vector.broadcast %cst_155 : f32 to vector<8x256xf32>
    %407 = arith.subf %406, %405 : vector<8x256xf32>
    %408 = math.exp %407 : vector<8x256xf32>
    %cst_156 = arith.constant 1.000000e+00 : f32
    %409 = vector.broadcast %cst_156 : f32 to vector<8x256xf32>
    %410 = arith.addf %409, %408 : vector<8x256xf32>
    %411 = tpu.reciprocal %410 : vector<8x256xf32> -> vector<8x256xf32>
    %412 = arith.mulf %405, %411 : vector<8x256xf32>
    %cst_157 = arith.constant dense<0.000000e+00> : vector<8xf32>
    %413 = vector.multi_reduction <add>, %384, %cst_157 [1] : vector<8x256xf32> to vector<8xf32>
    %414 = vector.shape_cast %413 : vector<8xf32> to vector<8x1xf32>
    %cst_158 = arith.constant dense<0.000000e+00> : vector<8xf32>
    %415 = vector.multi_reduction <add>, %412, %cst_158 [1] : vector<8x256xf32> to vector<8xf32>
    %416 = vector.shape_cast %415 : vector<8xf32> to vector<8x1xf32>
    %417 = arith.addf %414, %416 : vector<8x1xf32>
    %cst_159 = arith.constant 0.001953125 : f32
    %418 = vector.broadcast %cst_159 : f32 to vector<8x1xf32>
    %419 = arith.mulf %417, %418 : vector<8x1xf32>
    %420 = vector.broadcast %419 : vector<8x1xf32> to vector<8x256xf32>
    %421 = arith.subf %384, %420 : vector<8x256xf32>
    %422 = vector.broadcast %419 : vector<8x1xf32> to vector<8x256xf32>
    %423 = arith.subf %412, %422 : vector<8x256xf32>
    %424 = arith.mulf %421, %421 : vector<8x256xf32>
    %cst_160 = arith.constant dense<0.000000e+00> : vector<8xf32>
    %425 = vector.multi_reduction <add>, %424, %cst_160 [1] : vector<8x256xf32> to vector<8xf32>
    %426 = vector.shape_cast %425 : vector<8xf32> to vector<8x1xf32>
    %427 = arith.mulf %423, %423 : vector<8x256xf32>
    %cst_161 = arith.constant dense<0.000000e+00> : vector<8xf32>
    %428 = vector.multi_reduction <add>, %427, %cst_161 [1] : vector<8x256xf32> to vector<8xf32>
    %429 = vector.shape_cast %428 : vector<8xf32> to vector<8x1xf32>
    %430 = arith.addf %426, %429 : vector<8x1xf32>
    %cst_162 = arith.constant 0.001953125 : f32
    %431 = vector.broadcast %cst_162 : f32 to vector<8x1xf32>
    %432 = arith.mulf %430, %431 : vector<8x1xf32>
    %cst_163 = arith.constant 9.99999974E-6 : f32
    %433 = vector.broadcast %cst_163 : f32 to vector<8x1xf32>
    %434 = arith.addf %432, %433 : vector<8x1xf32>
    %435 = math.rsqrt %434 : vector<8x1xf32>
    %436 = arith.mulf %302, %435 : vector<8x1xf32>
    %437 = vector.broadcast %436 : vector<8x1xf32> to vector<8x256xf32>
    %438 = arith.mulf %421, %437 : vector<8x256xf32>
    %439 = vector.broadcast %436 : vector<8x1xf32> to vector<8x256xf32>
    %440 = arith.mulf %423, %439 : vector<8x256xf32>
    %c2_164 = arith.constant 2 : index
    %c0_165 = arith.constant 0 : index
    %c0_166 = arith.constant 0 : index
    %441 = vector.load %arg1[%c2_164, %c0_165, %c0_166] : memref<4x8x256xf32, #tpu.memory_space<vmem>>, vector<1x8x256xf32>
    %442 = vector.shape_cast %441 : vector<1x8x256xf32> to vector<8x256xf32>
    %c2_167 = arith.constant 2 : index
    %c0_168 = arith.constant 0 : index
    %c0_169 = arith.constant 0 : index
    %443 = vector.load %arg5[%c2_167, %c0_168, %c0_169] : memref<4x8x1xf32, #tpu.memory_space<vmem>>, vector<1x8x1xf32>
    %444 = vector.shape_cast %443 : vector<1x8x1xf32> to vector<8x1xf32>
    %445 = vector.broadcast %0 : f32 to vector<8x256xf32>
    %446 = arith.mulf %445, %166 : vector<8x256xf32>
    %447 = arith.addf %446, %442 : vector<8x256xf32>
    %448 = vector.broadcast %1 : f32 to vector<8x256xf32>
    %449 = arith.mulf %171, %448 : vector<8x256xf32>
    %450 = arith.subf %447, %449 : vector<8x256xf32>
    %451 = vector.broadcast %1 : f32 to vector<8x256xf32>
    %452 = arith.cmpf ogt, %450, %451 : vector<8x256xf32>
    %cst_170 = arith.constant 1.000000e+00 : f32
    %cst_171 = arith.constant 0.000000e+00 : f32
    %453 = vector.broadcast %cst_170 : f32 to vector<8x256xf32>
    %454 = vector.broadcast %cst_171 : f32 to vector<8x256xf32>
    %455 = arith.select %452, %453, %454 : vector<8x256xi1>, vector<8x256xf32>
    %c17_i32_172 = arith.constant 17 : i32
    %456 = tpu.dynamic_rotate %455 by %c17_i32_172 dim 1 : vector<8x256xf32>, i32 -> vector<8x256xf32>
    %c0_173 = arith.constant 0 : index
    %c0_174 = arith.constant 0 : index
    %c0_175 = arith.constant 0 : index
    %457 = vector.load %arg2[%c0_173, %c0_174, %c0_175] : memref<9x8x256xf32, #tpu.memory_space<vmem>>, vector<1x8x256xf32>
    %458 = vector.shape_cast %457 : vector<1x8x256xf32> to vector<8x256xf32>
    %459 = arith.mulf %456, %458 : vector<8x256xf32>
    %c16_i32_176 = arith.constant 16 : i32
    %460 = tpu.dynamic_rotate %455 by %c16_i32_176 dim 1 : vector<8x256xf32>, i32 -> vector<8x256xf32>
    %c1_177 = arith.constant 1 : index
    %c0_178 = arith.constant 0 : index
    %c0_179 = arith.constant 0 : index
    %461 = vector.load %arg2[%c1_177, %c0_178, %c0_179] : memref<9x8x256xf32, #tpu.memory_space<vmem>>, vector<1x8x256xf32>
    %462 = vector.shape_cast %461 : vector<1x8x256xf32> to vector<8x256xf32>
    %463 = arith.mulf %460, %462 : vector<8x256xf32>
    %464 = arith.addf %459, %463 : vector<8x256xf32>
    %c15_i32_180 = arith.constant 15 : i32
    %465 = tpu.dynamic_rotate %455 by %c15_i32_180 dim 1 : vector<8x256xf32>, i32 -> vector<8x256xf32>
    %c2_181 = arith.constant 2 : index
    %c0_182 = arith.constant 0 : index
    %c0_183 = arith.constant 0 : index
    %466 = vector.load %arg2[%c2_181, %c0_182, %c0_183] : memref<9x8x256xf32, #tpu.memory_space<vmem>>, vector<1x8x256xf32>
    %467 = vector.shape_cast %466 : vector<1x8x256xf32> to vector<8x256xf32>
    %468 = arith.mulf %465, %467 : vector<8x256xf32>
    %469 = arith.addf %464, %468 : vector<8x256xf32>
    %c1_i32_184 = arith.constant 1 : i32
    %470 = tpu.dynamic_rotate %455 by %c1_i32_184 dim 1 : vector<8x256xf32>, i32 -> vector<8x256xf32>
    %c3_185 = arith.constant 3 : index
    %c0_186 = arith.constant 0 : index
    %c0_187 = arith.constant 0 : index
    %471 = vector.load %arg2[%c3_185, %c0_186, %c0_187] : memref<9x8x256xf32, #tpu.memory_space<vmem>>, vector<1x8x256xf32>
    %472 = vector.shape_cast %471 : vector<1x8x256xf32> to vector<8x256xf32>
    %473 = arith.mulf %470, %472 : vector<8x256xf32>
    %474 = arith.addf %469, %473 : vector<8x256xf32>
    %c4_188 = arith.constant 4 : index
    %c0_189 = arith.constant 0 : index
    %c0_190 = arith.constant 0 : index
    %475 = vector.load %arg2[%c4_188, %c0_189, %c0_190] : memref<9x8x256xf32, #tpu.memory_space<vmem>>, vector<1x8x256xf32>
    %476 = vector.shape_cast %475 : vector<1x8x256xf32> to vector<8x256xf32>
    %477 = arith.mulf %455, %476 : vector<8x256xf32>
    %478 = arith.addf %474, %477 : vector<8x256xf32>
    %c255_i32_191 = arith.constant 255 : i32
    %479 = tpu.dynamic_rotate %455 by %c255_i32_191 dim 1 : vector<8x256xf32>, i32 -> vector<8x256xf32>
    %c5_192 = arith.constant 5 : index
    %c0_193 = arith.constant 0 : index
    %c0_194 = arith.constant 0 : index
    %480 = vector.load %arg2[%c5_192, %c0_193, %c0_194] : memref<9x8x256xf32, #tpu.memory_space<vmem>>, vector<1x8x256xf32>
    %481 = vector.shape_cast %480 : vector<1x8x256xf32> to vector<8x256xf32>
    %482 = arith.mulf %479, %481 : vector<8x256xf32>
    %483 = arith.addf %478, %482 : vector<8x256xf32>
    %c241_i32_195 = arith.constant 241 : i32
    %484 = tpu.dynamic_rotate %455 by %c241_i32_195 dim 1 : vector<8x256xf32>, i32 -> vector<8x256xf32>
    %c6_196 = arith.constant 6 : index
    %c0_197 = arith.constant 0 : index
    %c0_198 = arith.constant 0 : index
    %485 = vector.load %arg2[%c6_196, %c0_197, %c0_198] : memref<9x8x256xf32, #tpu.memory_space<vmem>>, vector<1x8x256xf32>
    %486 = vector.shape_cast %485 : vector<1x8x256xf32> to vector<8x256xf32>
    %487 = arith.mulf %484, %486 : vector<8x256xf32>
    %488 = arith.addf %483, %487 : vector<8x256xf32>
    %c240_i32_199 = arith.constant 240 : i32
    %489 = tpu.dynamic_rotate %455 by %c240_i32_199 dim 1 : vector<8x256xf32>, i32 -> vector<8x256xf32>
    %c7_200 = arith.constant 7 : index
    %c0_201 = arith.constant 0 : index
    %c0_202 = arith.constant 0 : index
    %490 = vector.load %arg2[%c7_200, %c0_201, %c0_202] : memref<9x8x256xf32, #tpu.memory_space<vmem>>, vector<1x8x256xf32>
    %491 = vector.shape_cast %490 : vector<1x8x256xf32> to vector<8x256xf32>
    %492 = arith.mulf %489, %491 : vector<8x256xf32>
    %493 = arith.addf %488, %492 : vector<8x256xf32>
    %c239_i32_203 = arith.constant 239 : i32
    %494 = tpu.dynamic_rotate %455 by %c239_i32_203 dim 1 : vector<8x256xf32>, i32 -> vector<8x256xf32>
    %c8_204 = arith.constant 8 : index
    %c0_205 = arith.constant 0 : index
    %c0_206 = arith.constant 0 : index
    %495 = vector.load %arg2[%c8_204, %c0_205, %c0_206] : memref<9x8x256xf32, #tpu.memory_space<vmem>>, vector<1x8x256xf32>
    %496 = vector.shape_cast %495 : vector<1x8x256xf32> to vector<8x256xf32>
    %497 = arith.mulf %494, %496 : vector<8x256xf32>
    %498 = arith.addf %493, %497 : vector<8x256xf32>
    %499 = vector.extract_strided_slice %498 {offsets = [0, 0], sizes = [1, 256], strides = [1, 1]} : vector<8x256xf32> to vector<1x256xf32>
    %500 = vector.broadcast %499 : vector<1x256xf32> to vector<8x256xf32>
    %501 = vector.broadcast %3 : vector<8x1xf32> to vector<8x256xf32>
    %502 = arith.mulf %500, %501 : vector<8x256xf32>
    %503 = vector.broadcast %10 : vector<8x1xf32> to vector<8x256xf32>
    %504 = arith.addf %502, %503 : vector<8x256xf32>
    %505 = vector.extract_strided_slice %498 {offsets = [1, 0], sizes = [1, 256], strides = [1, 1]} : vector<8x256xf32> to vector<1x256xf32>
    %506 = vector.broadcast %505 : vector<1x256xf32> to vector<8x256xf32>
    %507 = vector.broadcast %5 : vector<8x1xf32> to vector<8x256xf32>
    %508 = arith.mulf %506, %507 : vector<8x256xf32>
    %509 = arith.addf %504, %508 : vector<8x256xf32>
    %510 = vector.extract_strided_slice %498 {offsets = [2, 0], sizes = [1, 256], strides = [1, 1]} : vector<8x256xf32> to vector<1x256xf32>
    %511 = vector.broadcast %510 : vector<1x256xf32> to vector<8x256xf32>
    %512 = vector.broadcast %7 : vector<8x1xf32> to vector<8x256xf32>
    %513 = arith.mulf %511, %512 : vector<8x256xf32>
    %514 = arith.addf %509, %513 : vector<8x256xf32>
    %515 = vector.extract_strided_slice %498 {offsets = [3, 0], sizes = [1, 256], strides = [1, 1]} : vector<8x256xf32> to vector<1x256xf32>
    %516 = vector.broadcast %515 : vector<1x256xf32> to vector<8x256xf32>
    %517 = vector.broadcast %9 : vector<8x1xf32> to vector<8x256xf32>
    %518 = arith.mulf %516, %517 : vector<8x256xf32>
    %519 = arith.addf %514, %518 : vector<8x256xf32>
    %cst_207 = arith.constant 0.000000e+00 : f32
    %520 = vector.broadcast %cst_207 : f32 to vector<8x256xf32>
    %521 = arith.subf %520, %519 : vector<8x256xf32>
    %522 = math.exp %521 : vector<8x256xf32>
    %cst_208 = arith.constant 1.000000e+00 : f32
    %523 = vector.broadcast %cst_208 : f32 to vector<8x256xf32>
    %524 = arith.addf %523, %522 : vector<8x256xf32>
    %525 = tpu.reciprocal %524 : vector<8x256xf32> -> vector<8x256xf32>
    %526 = arith.mulf %519, %525 : vector<8x256xf32>
    %527 = vector.extract_strided_slice %498 {offsets = [4, 0], sizes = [1, 256], strides = [1, 1]} : vector<8x256xf32> to vector<1x256xf32>
    %528 = vector.broadcast %527 : vector<1x256xf32> to vector<8x256xf32>
    %529 = vector.broadcast %3 : vector<8x1xf32> to vector<8x256xf32>
    %530 = arith.mulf %528, %529 : vector<8x256xf32>
    %531 = vector.broadcast %10 : vector<8x1xf32> to vector<8x256xf32>
    %532 = arith.addf %530, %531 : vector<8x256xf32>
    %533 = vector.extract_strided_slice %498 {offsets = [5, 0], sizes = [1, 256], strides = [1, 1]} : vector<8x256xf32> to vector<1x256xf32>
    %534 = vector.broadcast %533 : vector<1x256xf32> to vector<8x256xf32>
    %535 = vector.broadcast %5 : vector<8x1xf32> to vector<8x256xf32>
    %536 = arith.mulf %534, %535 : vector<8x256xf32>
    %537 = arith.addf %532, %536 : vector<8x256xf32>
    %538 = vector.extract_strided_slice %498 {offsets = [6, 0], sizes = [1, 256], strides = [1, 1]} : vector<8x256xf32> to vector<1x256xf32>
    %539 = vector.broadcast %538 : vector<1x256xf32> to vector<8x256xf32>
    %540 = vector.broadcast %7 : vector<8x1xf32> to vector<8x256xf32>
    %541 = arith.mulf %539, %540 : vector<8x256xf32>
    %542 = arith.addf %537, %541 : vector<8x256xf32>
    %543 = vector.extract_strided_slice %498 {offsets = [7, 0], sizes = [1, 256], strides = [1, 1]} : vector<8x256xf32> to vector<1x256xf32>
    %544 = vector.broadcast %543 : vector<1x256xf32> to vector<8x256xf32>
    %545 = vector.broadcast %9 : vector<8x1xf32> to vector<8x256xf32>
    %546 = arith.mulf %544, %545 : vector<8x256xf32>
    %547 = arith.addf %542, %546 : vector<8x256xf32>
    %cst_209 = arith.constant 0.000000e+00 : f32
    %548 = vector.broadcast %cst_209 : f32 to vector<8x256xf32>
    %549 = arith.subf %548, %547 : vector<8x256xf32>
    %550 = math.exp %549 : vector<8x256xf32>
    %cst_210 = arith.constant 1.000000e+00 : f32
    %551 = vector.broadcast %cst_210 : f32 to vector<8x256xf32>
    %552 = arith.addf %551, %550 : vector<8x256xf32>
    %553 = tpu.reciprocal %552 : vector<8x256xf32> -> vector<8x256xf32>
    %554 = arith.mulf %547, %553 : vector<8x256xf32>
    %cst_211 = arith.constant dense<0.000000e+00> : vector<8xf32>
    %555 = vector.multi_reduction <add>, %526, %cst_211 [1] : vector<8x256xf32> to vector<8xf32>
    %556 = vector.shape_cast %555 : vector<8xf32> to vector<8x1xf32>
    %cst_212 = arith.constant dense<0.000000e+00> : vector<8xf32>
    %557 = vector.multi_reduction <add>, %554, %cst_212 [1] : vector<8x256xf32> to vector<8xf32>
    %558 = vector.shape_cast %557 : vector<8xf32> to vector<8x1xf32>
    %559 = arith.addf %556, %558 : vector<8x1xf32>
    %cst_213 = arith.constant 0.001953125 : f32
    %560 = vector.broadcast %cst_213 : f32 to vector<8x1xf32>
    %561 = arith.mulf %559, %560 : vector<8x1xf32>
    %562 = vector.broadcast %561 : vector<8x1xf32> to vector<8x256xf32>
    %563 = arith.subf %526, %562 : vector<8x256xf32>
    %564 = vector.broadcast %561 : vector<8x1xf32> to vector<8x256xf32>
    %565 = arith.subf %554, %564 : vector<8x256xf32>
    %566 = arith.mulf %563, %563 : vector<8x256xf32>
    %cst_214 = arith.constant dense<0.000000e+00> : vector<8xf32>
    %567 = vector.multi_reduction <add>, %566, %cst_214 [1] : vector<8x256xf32> to vector<8xf32>
    %568 = vector.shape_cast %567 : vector<8xf32> to vector<8x1xf32>
    %569 = arith.mulf %565, %565 : vector<8x256xf32>
    %cst_215 = arith.constant dense<0.000000e+00> : vector<8xf32>
    %570 = vector.multi_reduction <add>, %569, %cst_215 [1] : vector<8x256xf32> to vector<8xf32>
    %571 = vector.shape_cast %570 : vector<8xf32> to vector<8x1xf32>
    %572 = arith.addf %568, %571 : vector<8x1xf32>
    %cst_216 = arith.constant 0.001953125 : f32
    %573 = vector.broadcast %cst_216 : f32 to vector<8x1xf32>
    %574 = arith.mulf %572, %573 : vector<8x1xf32>
    %cst_217 = arith.constant 9.99999974E-6 : f32
    %575 = vector.broadcast %cst_217 : f32 to vector<8x1xf32>
    %576 = arith.addf %574, %575 : vector<8x1xf32>
    %577 = math.rsqrt %576 : vector<8x1xf32>
    %578 = arith.mulf %444, %577 : vector<8x1xf32>
    %579 = vector.broadcast %578 : vector<8x1xf32> to vector<8x256xf32>
    %580 = arith.mulf %563, %579 : vector<8x256xf32>
    %581 = vector.broadcast %578 : vector<8x1xf32> to vector<8x256xf32>
    %582 = arith.mulf %565, %581 : vector<8x256xf32>
    %c2_218 = arith.constant 2 : index
    %c0_219 = arith.constant 0 : index
    %c0_220 = arith.constant 0 : index
    %583 = vector.load %arg1[%c2_218, %c0_219, %c0_220] : memref<4x8x256xf32, #tpu.memory_space<vmem>>, vector<1x8x256xf32>
    %584 = vector.shape_cast %583 : vector<1x8x256xf32> to vector<8x256xf32>
    %c2_221 = arith.constant 2 : index
    %c0_222 = arith.constant 0 : index
    %c0_223 = arith.constant 0 : index
    %585 = vector.load %arg5[%c2_221, %c0_222, %c0_223] : memref<4x8x1xf32, #tpu.memory_space<vmem>>, vector<1x8x1xf32>
    %586 = vector.shape_cast %585 : vector<1x8x1xf32> to vector<8x1xf32>
    %587 = vector.broadcast %0 : f32 to vector<8x256xf32>
    %588 = arith.mulf %587, %308 : vector<8x256xf32>
    %589 = arith.addf %588, %584 : vector<8x256xf32>
    %590 = vector.broadcast %1 : f32 to vector<8x256xf32>
    %591 = arith.mulf %313, %590 : vector<8x256xf32>
    %592 = arith.subf %589, %591 : vector<8x256xf32>
    %593 = vector.broadcast %1 : f32 to vector<8x256xf32>
    %594 = arith.cmpf ogt, %592, %593 : vector<8x256xf32>
    %cst_224 = arith.constant 1.000000e+00 : f32
    %cst_225 = arith.constant 0.000000e+00 : f32
    %595 = vector.broadcast %cst_224 : f32 to vector<8x256xf32>
    %596 = vector.broadcast %cst_225 : f32 to vector<8x256xf32>
    %597 = arith.select %594, %595, %596 : vector<8x256xi1>, vector<8x256xf32>
    %c17_i32_226 = arith.constant 17 : i32
    %598 = tpu.dynamic_rotate %597 by %c17_i32_226 dim 1 : vector<8x256xf32>, i32 -> vector<8x256xf32>
    %c0_227 = arith.constant 0 : index
    %c0_228 = arith.constant 0 : index
    %c0_229 = arith.constant 0 : index
    %599 = vector.load %arg2[%c0_227, %c0_228, %c0_229] : memref<9x8x256xf32, #tpu.memory_space<vmem>>, vector<1x8x256xf32>
    %600 = vector.shape_cast %599 : vector<1x8x256xf32> to vector<8x256xf32>
    %601 = arith.mulf %598, %600 : vector<8x256xf32>
    %c16_i32_230 = arith.constant 16 : i32
    %602 = tpu.dynamic_rotate %597 by %c16_i32_230 dim 1 : vector<8x256xf32>, i32 -> vector<8x256xf32>
    %c1_231 = arith.constant 1 : index
    %c0_232 = arith.constant 0 : index
    %c0_233 = arith.constant 0 : index
    %603 = vector.load %arg2[%c1_231, %c0_232, %c0_233] : memref<9x8x256xf32, #tpu.memory_space<vmem>>, vector<1x8x256xf32>
    %604 = vector.shape_cast %603 : vector<1x8x256xf32> to vector<8x256xf32>
    %605 = arith.mulf %602, %604 : vector<8x256xf32>
    %606 = arith.addf %601, %605 : vector<8x256xf32>
    %c15_i32_234 = arith.constant 15 : i32
    %607 = tpu.dynamic_rotate %597 by %c15_i32_234 dim 1 : vector<8x256xf32>, i32 -> vector<8x256xf32>
    %c2_235 = arith.constant 2 : index
    %c0_236 = arith.constant 0 : index
    %c0_237 = arith.constant 0 : index
    %608 = vector.load %arg2[%c2_235, %c0_236, %c0_237] : memref<9x8x256xf32, #tpu.memory_space<vmem>>, vector<1x8x256xf32>
    %609 = vector.shape_cast %608 : vector<1x8x256xf32> to vector<8x256xf32>
    %610 = arith.mulf %607, %609 : vector<8x256xf32>
    %611 = arith.addf %606, %610 : vector<8x256xf32>
    %c1_i32_238 = arith.constant 1 : i32
    %612 = tpu.dynamic_rotate %597 by %c1_i32_238 dim 1 : vector<8x256xf32>, i32 -> vector<8x256xf32>
    %c3_239 = arith.constant 3 : index
    %c0_240 = arith.constant 0 : index
    %c0_241 = arith.constant 0 : index
    %613 = vector.load %arg2[%c3_239, %c0_240, %c0_241] : memref<9x8x256xf32, #tpu.memory_space<vmem>>, vector<1x8x256xf32>
    %614 = vector.shape_cast %613 : vector<1x8x256xf32> to vector<8x256xf32>
    %615 = arith.mulf %612, %614 : vector<8x256xf32>
    %616 = arith.addf %611, %615 : vector<8x256xf32>
    %c4_242 = arith.constant 4 : index
    %c0_243 = arith.constant 0 : index
    %c0_244 = arith.constant 0 : index
    %617 = vector.load %arg2[%c4_242, %c0_243, %c0_244] : memref<9x8x256xf32, #tpu.memory_space<vmem>>, vector<1x8x256xf32>
    %618 = vector.shape_cast %617 : vector<1x8x256xf32> to vector<8x256xf32>
    %619 = arith.mulf %597, %618 : vector<8x256xf32>
    %620 = arith.addf %616, %619 : vector<8x256xf32>
    %c255_i32_245 = arith.constant 255 : i32
    %621 = tpu.dynamic_rotate %597 by %c255_i32_245 dim 1 : vector<8x256xf32>, i32 -> vector<8x256xf32>
    %c5_246 = arith.constant 5 : index
    %c0_247 = arith.constant 0 : index
    %c0_248 = arith.constant 0 : index
    %622 = vector.load %arg2[%c5_246, %c0_247, %c0_248] : memref<9x8x256xf32, #tpu.memory_space<vmem>>, vector<1x8x256xf32>
    %623 = vector.shape_cast %622 : vector<1x8x256xf32> to vector<8x256xf32>
    %624 = arith.mulf %621, %623 : vector<8x256xf32>
    %625 = arith.addf %620, %624 : vector<8x256xf32>
    %c241_i32_249 = arith.constant 241 : i32
    %626 = tpu.dynamic_rotate %597 by %c241_i32_249 dim 1 : vector<8x256xf32>, i32 -> vector<8x256xf32>
    %c6_250 = arith.constant 6 : index
    %c0_251 = arith.constant 0 : index
    %c0_252 = arith.constant 0 : index
    %627 = vector.load %arg2[%c6_250, %c0_251, %c0_252] : memref<9x8x256xf32, #tpu.memory_space<vmem>>, vector<1x8x256xf32>
    %628 = vector.shape_cast %627 : vector<1x8x256xf32> to vector<8x256xf32>
    %629 = arith.mulf %626, %628 : vector<8x256xf32>
    %630 = arith.addf %625, %629 : vector<8x256xf32>
    %c240_i32_253 = arith.constant 240 : i32
    %631 = tpu.dynamic_rotate %597 by %c240_i32_253 dim 1 : vector<8x256xf32>, i32 -> vector<8x256xf32>
    %c7_254 = arith.constant 7 : index
    %c0_255 = arith.constant 0 : index
    %c0_256 = arith.constant 0 : index
    %632 = vector.load %arg2[%c7_254, %c0_255, %c0_256] : memref<9x8x256xf32, #tpu.memory_space<vmem>>, vector<1x8x256xf32>
    %633 = vector.shape_cast %632 : vector<1x8x256xf32> to vector<8x256xf32>
    %634 = arith.mulf %631, %633 : vector<8x256xf32>
    %635 = arith.addf %630, %634 : vector<8x256xf32>
    %c239_i32_257 = arith.constant 239 : i32
    %636 = tpu.dynamic_rotate %597 by %c239_i32_257 dim 1 : vector<8x256xf32>, i32 -> vector<8x256xf32>
    %c8_258 = arith.constant 8 : index
    %c0_259 = arith.constant 0 : index
    %c0_260 = arith.constant 0 : index
    %637 = vector.load %arg2[%c8_258, %c0_259, %c0_260] : memref<9x8x256xf32, #tpu.memory_space<vmem>>, vector<1x8x256xf32>
    %638 = vector.shape_cast %637 : vector<1x8x256xf32> to vector<8x256xf32>
    %639 = arith.mulf %636, %638 : vector<8x256xf32>
    %640 = arith.addf %635, %639 : vector<8x256xf32>
    %641 = vector.extract_strided_slice %640 {offsets = [0, 0], sizes = [1, 256], strides = [1, 1]} : vector<8x256xf32> to vector<1x256xf32>
    %642 = vector.broadcast %641 : vector<1x256xf32> to vector<8x256xf32>
    %643 = vector.broadcast %3 : vector<8x1xf32> to vector<8x256xf32>
    %644 = arith.mulf %642, %643 : vector<8x256xf32>
    %645 = vector.broadcast %10 : vector<8x1xf32> to vector<8x256xf32>
    %646 = arith.addf %644, %645 : vector<8x256xf32>
    %647 = vector.extract_strided_slice %640 {offsets = [1, 0], sizes = [1, 256], strides = [1, 1]} : vector<8x256xf32> to vector<1x256xf32>
    %648 = vector.broadcast %647 : vector<1x256xf32> to vector<8x256xf32>
    %649 = vector.broadcast %5 : vector<8x1xf32> to vector<8x256xf32>
    %650 = arith.mulf %648, %649 : vector<8x256xf32>
    %651 = arith.addf %646, %650 : vector<8x256xf32>
    %652 = vector.extract_strided_slice %640 {offsets = [2, 0], sizes = [1, 256], strides = [1, 1]} : vector<8x256xf32> to vector<1x256xf32>
    %653 = vector.broadcast %652 : vector<1x256xf32> to vector<8x256xf32>
    %654 = vector.broadcast %7 : vector<8x1xf32> to vector<8x256xf32>
    %655 = arith.mulf %653, %654 : vector<8x256xf32>
    %656 = arith.addf %651, %655 : vector<8x256xf32>
    %657 = vector.extract_strided_slice %640 {offsets = [3, 0], sizes = [1, 256], strides = [1, 1]} : vector<8x256xf32> to vector<1x256xf32>
    %658 = vector.broadcast %657 : vector<1x256xf32> to vector<8x256xf32>
    %659 = vector.broadcast %9 : vector<8x1xf32> to vector<8x256xf32>
    %660 = arith.mulf %658, %659 : vector<8x256xf32>
    %661 = arith.addf %656, %660 : vector<8x256xf32>
    %cst_261 = arith.constant 0.000000e+00 : f32
    %662 = vector.broadcast %cst_261 : f32 to vector<8x256xf32>
    %663 = arith.subf %662, %661 : vector<8x256xf32>
    %664 = math.exp %663 : vector<8x256xf32>
    %cst_262 = arith.constant 1.000000e+00 : f32
    %665 = vector.broadcast %cst_262 : f32 to vector<8x256xf32>
    %666 = arith.addf %665, %664 : vector<8x256xf32>
    %667 = tpu.reciprocal %666 : vector<8x256xf32> -> vector<8x256xf32>
    %668 = arith.mulf %661, %667 : vector<8x256xf32>
    %669 = vector.extract_strided_slice %640 {offsets = [4, 0], sizes = [1, 256], strides = [1, 1]} : vector<8x256xf32> to vector<1x256xf32>
    %670 = vector.broadcast %669 : vector<1x256xf32> to vector<8x256xf32>
    %671 = vector.broadcast %3 : vector<8x1xf32> to vector<8x256xf32>
    %672 = arith.mulf %670, %671 : vector<8x256xf32>
    %673 = vector.broadcast %10 : vector<8x1xf32> to vector<8x256xf32>
    %674 = arith.addf %672, %673 : vector<8x256xf32>
    %675 = vector.extract_strided_slice %640 {offsets = [5, 0], sizes = [1, 256], strides = [1, 1]} : vector<8x256xf32> to vector<1x256xf32>
    %676 = vector.broadcast %675 : vector<1x256xf32> to vector<8x256xf32>
    %677 = vector.broadcast %5 : vector<8x1xf32> to vector<8x256xf32>
    %678 = arith.mulf %676, %677 : vector<8x256xf32>
    %679 = arith.addf %674, %678 : vector<8x256xf32>
    %680 = vector.extract_strided_slice %640 {offsets = [6, 0], sizes = [1, 256], strides = [1, 1]} : vector<8x256xf32> to vector<1x256xf32>
    %681 = vector.broadcast %680 : vector<1x256xf32> to vector<8x256xf32>
    %682 = vector.broadcast %7 : vector<8x1xf32> to vector<8x256xf32>
    %683 = arith.mulf %681, %682 : vector<8x256xf32>
    %684 = arith.addf %679, %683 : vector<8x256xf32>
    %685 = vector.extract_strided_slice %640 {offsets = [7, 0], sizes = [1, 256], strides = [1, 1]} : vector<8x256xf32> to vector<1x256xf32>
    %686 = vector.broadcast %685 : vector<1x256xf32> to vector<8x256xf32>
    %687 = vector.broadcast %9 : vector<8x1xf32> to vector<8x256xf32>
    %688 = arith.mulf %686, %687 : vector<8x256xf32>
    %689 = arith.addf %684, %688 : vector<8x256xf32>
    %cst_263 = arith.constant 0.000000e+00 : f32
    %690 = vector.broadcast %cst_263 : f32 to vector<8x256xf32>
    %691 = arith.subf %690, %689 : vector<8x256xf32>
    %692 = math.exp %691 : vector<8x256xf32>
    %cst_264 = arith.constant 1.000000e+00 : f32
    %693 = vector.broadcast %cst_264 : f32 to vector<8x256xf32>
    %694 = arith.addf %693, %692 : vector<8x256xf32>
    %695 = tpu.reciprocal %694 : vector<8x256xf32> -> vector<8x256xf32>
    %696 = arith.mulf %689, %695 : vector<8x256xf32>
    %cst_265 = arith.constant dense<0.000000e+00> : vector<8xf32>
    %697 = vector.multi_reduction <add>, %668, %cst_265 [1] : vector<8x256xf32> to vector<8xf32>
    %698 = vector.shape_cast %697 : vector<8xf32> to vector<8x1xf32>
    %cst_266 = arith.constant dense<0.000000e+00> : vector<8xf32>
    %699 = vector.multi_reduction <add>, %696, %cst_266 [1] : vector<8x256xf32> to vector<8xf32>
    %700 = vector.shape_cast %699 : vector<8xf32> to vector<8x1xf32>
    %701 = arith.addf %698, %700 : vector<8x1xf32>
    %cst_267 = arith.constant 0.001953125 : f32
    %702 = vector.broadcast %cst_267 : f32 to vector<8x1xf32>
    %703 = arith.mulf %701, %702 : vector<8x1xf32>
    %704 = vector.broadcast %703 : vector<8x1xf32> to vector<8x256xf32>
    %705 = arith.subf %668, %704 : vector<8x256xf32>
    %706 = vector.broadcast %703 : vector<8x1xf32> to vector<8x256xf32>
    %707 = arith.subf %696, %706 : vector<8x256xf32>
    %708 = arith.mulf %705, %705 : vector<8x256xf32>
    %cst_268 = arith.constant dense<0.000000e+00> : vector<8xf32>
    %709 = vector.multi_reduction <add>, %708, %cst_268 [1] : vector<8x256xf32> to vector<8xf32>
    %710 = vector.shape_cast %709 : vector<8xf32> to vector<8x1xf32>
    %711 = arith.mulf %707, %707 : vector<8x256xf32>
    %cst_269 = arith.constant dense<0.000000e+00> : vector<8xf32>
    %712 = vector.multi_reduction <add>, %711, %cst_269 [1] : vector<8x256xf32> to vector<8xf32>
    %713 = vector.shape_cast %712 : vector<8xf32> to vector<8x1xf32>
    %714 = arith.addf %710, %713 : vector<8x1xf32>
    %cst_270 = arith.constant 0.001953125 : f32
    %715 = vector.broadcast %cst_270 : f32 to vector<8x1xf32>
    %716 = arith.mulf %714, %715 : vector<8x1xf32>
    %cst_271 = arith.constant 9.99999974E-6 : f32
    %717 = vector.broadcast %cst_271 : f32 to vector<8x1xf32>
    %718 = arith.addf %716, %717 : vector<8x1xf32>
    %719 = math.rsqrt %718 : vector<8x1xf32>
    %720 = arith.mulf %586, %719 : vector<8x1xf32>
    %721 = vector.broadcast %720 : vector<8x1xf32> to vector<8x256xf32>
    %722 = arith.mulf %705, %721 : vector<8x256xf32>
    %723 = vector.broadcast %720 : vector<8x1xf32> to vector<8x256xf32>
    %724 = arith.mulf %707, %723 : vector<8x256xf32>
    %725 = arith.addf %580, %722 : vector<8x256xf32>
    %c0_272 = arith.constant 0 : index
    %c2_273 = arith.constant 2 : index
    %c0_274 = arith.constant 0 : index
    %c0_275 = arith.constant 0 : index
    %726 = vector.load %arg6[%c0_272, %c2_273, %c0_274, %c0_275] : memref<2x4x8x256xf32, #tpu.memory_space<vmem>>, vector<1x1x8x256xf32>
    %727 = vector.shape_cast %726 : vector<1x1x8x256xf32> to vector<8x256xf32>
    %728 = vector.shape_cast %725 : vector<8x256xf32> to vector<1x1x8x256xf32>
    tpu.vector_store %arg6[%c0_272, %c2_273, %c0_274, %c0_275], %728 {strides = array<i32>} : memref<2x4x8x256xf32, #tpu.memory_space<vmem>>, vector<1x1x8x256xf32>,
    %729 = arith.addf %582, %724 : vector<8x256xf32>
    %c1_276 = arith.constant 1 : index
    %c2_277 = arith.constant 2 : index
    %c0_278 = arith.constant 0 : index
    %c0_279 = arith.constant 0 : index
    %730 = vector.load %arg6[%c1_276, %c2_277, %c0_278, %c0_279] : memref<2x4x8x256xf32, #tpu.memory_space<vmem>>, vector<1x1x8x256xf32>
    %731 = vector.shape_cast %730 : vector<1x1x8x256xf32> to vector<8x256xf32>
    %732 = vector.shape_cast %729 : vector<8x256xf32> to vector<1x1x8x256xf32>
    tpu.vector_store %arg6[%c1_276, %c2_277, %c0_278, %c0_279], %732 {strides = array<i32>} : memref<2x4x8x256xf32, #tpu.memory_space<vmem>>, vector<1x1x8x256xf32>,
    %c1_280 = arith.constant 1 : index
    %c0_281 = arith.constant 0 : index
    %c0_282 = arith.constant 0 : index
    %733 = vector.load %arg1[%c1_280, %c0_281, %c0_282] : memref<4x8x256xf32, #tpu.memory_space<vmem>>, vector<1x8x256xf32>
    %734 = vector.shape_cast %733 : vector<1x8x256xf32> to vector<8x256xf32>
    %c1_283 = arith.constant 1 : index
    %c0_284 = arith.constant 0 : index
    %c0_285 = arith.constant 0 : index
    %735 = vector.load %arg5[%c1_283, %c0_284, %c0_285] : memref<4x8x1xf32, #tpu.memory_space<vmem>>, vector<1x8x1xf32>
    %736 = vector.shape_cast %735 : vector<1x8x1xf32> to vector<8x1xf32>
    %737 = vector.broadcast %0 : f32 to vector<8x256xf32>
    %738 = arith.mulf %737, %450 : vector<8x256xf32>
    %739 = arith.addf %738, %734 : vector<8x256xf32>
    %740 = vector.broadcast %1 : f32 to vector<8x256xf32>
    %741 = arith.mulf %455, %740 : vector<8x256xf32>
    %742 = arith.subf %739, %741 : vector<8x256xf32>
    %743 = vector.broadcast %1 : f32 to vector<8x256xf32>
    %744 = arith.cmpf ogt, %742, %743 : vector<8x256xf32>
    %cst_286 = arith.constant 1.000000e+00 : f32
    %cst_287 = arith.constant 0.000000e+00 : f32
    %745 = vector.broadcast %cst_286 : f32 to vector<8x256xf32>
    %746 = vector.broadcast %cst_287 : f32 to vector<8x256xf32>
    %747 = arith.select %744, %745, %746 : vector<8x256xi1>, vector<8x256xf32>
    %c17_i32_288 = arith.constant 17 : i32
    %748 = tpu.dynamic_rotate %747 by %c17_i32_288 dim 1 : vector<8x256xf32>, i32 -> vector<8x256xf32>
    %c0_289 = arith.constant 0 : index
    %c0_290 = arith.constant 0 : index
    %c0_291 = arith.constant 0 : index
    %749 = vector.load %arg2[%c0_289, %c0_290, %c0_291] : memref<9x8x256xf32, #tpu.memory_space<vmem>>, vector<1x8x256xf32>
    %750 = vector.shape_cast %749 : vector<1x8x256xf32> to vector<8x256xf32>
    %751 = arith.mulf %748, %750 : vector<8x256xf32>
    %c16_i32_292 = arith.constant 16 : i32
    %752 = tpu.dynamic_rotate %747 by %c16_i32_292 dim 1 : vector<8x256xf32>, i32 -> vector<8x256xf32>
    %c1_293 = arith.constant 1 : index
    %c0_294 = arith.constant 0 : index
    %c0_295 = arith.constant 0 : index
    %753 = vector.load %arg2[%c1_293, %c0_294, %c0_295] : memref<9x8x256xf32, #tpu.memory_space<vmem>>, vector<1x8x256xf32>
    %754 = vector.shape_cast %753 : vector<1x8x256xf32> to vector<8x256xf32>
    %755 = arith.mulf %752, %754 : vector<8x256xf32>
    %756 = arith.addf %751, %755 : vector<8x256xf32>
    %c15_i32_296 = arith.constant 15 : i32
    %757 = tpu.dynamic_rotate %747 by %c15_i32_296 dim 1 : vector<8x256xf32>, i32 -> vector<8x256xf32>
    %c2_297 = arith.constant 2 : index
    %c0_298 = arith.constant 0 : index
    %c0_299 = arith.constant 0 : index
    %758 = vector.load %arg2[%c2_297, %c0_298, %c0_299] : memref<9x8x256xf32, #tpu.memory_space<vmem>>, vector<1x8x256xf32>
    %759 = vector.shape_cast %758 : vector<1x8x256xf32> to vector<8x256xf32>
    %760 = arith.mulf %757, %759 : vector<8x256xf32>
    %761 = arith.addf %756, %760 : vector<8x256xf32>
    %c1_i32_300 = arith.constant 1 : i32
    %762 = tpu.dynamic_rotate %747 by %c1_i32_300 dim 1 : vector<8x256xf32>, i32 -> vector<8x256xf32>
    %c3_301 = arith.constant 3 : index
    %c0_302 = arith.constant 0 : index
    %c0_303 = arith.constant 0 : index
    %763 = vector.load %arg2[%c3_301, %c0_302, %c0_303] : memref<9x8x256xf32, #tpu.memory_space<vmem>>, vector<1x8x256xf32>
    %764 = vector.shape_cast %763 : vector<1x8x256xf32> to vector<8x256xf32>
    %765 = arith.mulf %762, %764 : vector<8x256xf32>
    %766 = arith.addf %761, %765 : vector<8x256xf32>
    %c4_304 = arith.constant 4 : index
    %c0_305 = arith.constant 0 : index
    %c0_306 = arith.constant 0 : index
    %767 = vector.load %arg2[%c4_304, %c0_305, %c0_306] : memref<9x8x256xf32, #tpu.memory_space<vmem>>, vector<1x8x256xf32>
    %768 = vector.shape_cast %767 : vector<1x8x256xf32> to vector<8x256xf32>
    %769 = arith.mulf %747, %768 : vector<8x256xf32>
    %770 = arith.addf %766, %769 : vector<8x256xf32>
    %c255_i32_307 = arith.constant 255 : i32
    %771 = tpu.dynamic_rotate %747 by %c255_i32_307 dim 1 : vector<8x256xf32>, i32 -> vector<8x256xf32>
    %c5_308 = arith.constant 5 : index
    %c0_309 = arith.constant 0 : index
    %c0_310 = arith.constant 0 : index
    %772 = vector.load %arg2[%c5_308, %c0_309, %c0_310] : memref<9x8x256xf32, #tpu.memory_space<vmem>>, vector<1x8x256xf32>
    %773 = vector.shape_cast %772 : vector<1x8x256xf32> to vector<8x256xf32>
    %774 = arith.mulf %771, %773 : vector<8x256xf32>
    %775 = arith.addf %770, %774 : vector<8x256xf32>
    %c241_i32_311 = arith.constant 241 : i32
    %776 = tpu.dynamic_rotate %747 by %c241_i32_311 dim 1 : vector<8x256xf32>, i32 -> vector<8x256xf32>
    %c6_312 = arith.constant 6 : index
    %c0_313 = arith.constant 0 : index
    %c0_314 = arith.constant 0 : index
    %777 = vector.load %arg2[%c6_312, %c0_313, %c0_314] : memref<9x8x256xf32, #tpu.memory_space<vmem>>, vector<1x8x256xf32>
    %778 = vector.shape_cast %777 : vector<1x8x256xf32> to vector<8x256xf32>
    %779 = arith.mulf %776, %778 : vector<8x256xf32>
    %780 = arith.addf %775, %779 : vector<8x256xf32>
    %c240_i32_315 = arith.constant 240 : i32
    %781 = tpu.dynamic_rotate %747 by %c240_i32_315 dim 1 : vector<8x256xf32>, i32 -> vector<8x256xf32>
    %c7_316 = arith.constant 7 : index
    %c0_317 = arith.constant 0 : index
    %c0_318 = arith.constant 0 : index
    %782 = vector.load %arg2[%c7_316, %c0_317, %c0_318] : memref<9x8x256xf32, #tpu.memory_space<vmem>>, vector<1x8x256xf32>
    %783 = vector.shape_cast %782 : vector<1x8x256xf32> to vector<8x256xf32>
    %784 = arith.mulf %781, %783 : vector<8x256xf32>
    %785 = arith.addf %780, %784 : vector<8x256xf32>
    %c239_i32_319 = arith.constant 239 : i32
    %786 = tpu.dynamic_rotate %747 by %c239_i32_319 dim 1 : vector<8x256xf32>, i32 -> vector<8x256xf32>
    %c8_320 = arith.constant 8 : index
    %c0_321 = arith.constant 0 : index
    %c0_322 = arith.constant 0 : index
    %787 = vector.load %arg2[%c8_320, %c0_321, %c0_322] : memref<9x8x256xf32, #tpu.memory_space<vmem>>, vector<1x8x256xf32>
    %788 = vector.shape_cast %787 : vector<1x8x256xf32> to vector<8x256xf32>
    %789 = arith.mulf %786, %788 : vector<8x256xf32>
    %790 = arith.addf %785, %789 : vector<8x256xf32>
    %791 = vector.extract_strided_slice %790 {offsets = [0, 0], sizes = [1, 256], strides = [1, 1]} : vector<8x256xf32> to vector<1x256xf32>
    %792 = vector.broadcast %791 : vector<1x256xf32> to vector<8x256xf32>
    %793 = vector.broadcast %3 : vector<8x1xf32> to vector<8x256xf32>
    %794 = arith.mulf %792, %793 : vector<8x256xf32>
    %795 = vector.broadcast %10 : vector<8x1xf32> to vector<8x256xf32>
    %796 = arith.addf %794, %795 : vector<8x256xf32>
    %797 = vector.extract_strided_slice %790 {offsets = [1, 0], sizes = [1, 256], strides = [1, 1]} : vector<8x256xf32> to vector<1x256xf32>
    %798 = vector.broadcast %797 : vector<1x256xf32> to vector<8x256xf32>
    %799 = vector.broadcast %5 : vector<8x1xf32> to vector<8x256xf32>
    %800 = arith.mulf %798, %799 : vector<8x256xf32>
    %801 = arith.addf %796, %800 : vector<8x256xf32>
    %802 = vector.extract_strided_slice %790 {offsets = [2, 0], sizes = [1, 256], strides = [1, 1]} : vector<8x256xf32> to vector<1x256xf32>
    %803 = vector.broadcast %802 : vector<1x256xf32> to vector<8x256xf32>
    %804 = vector.broadcast %7 : vector<8x1xf32> to vector<8x256xf32>
    %805 = arith.mulf %803, %804 : vector<8x256xf32>
    %806 = arith.addf %801, %805 : vector<8x256xf32>
    %807 = vector.extract_strided_slice %790 {offsets = [3, 0], sizes = [1, 256], strides = [1, 1]} : vector<8x256xf32> to vector<1x256xf32>
    %808 = vector.broadcast %807 : vector<1x256xf32> to vector<8x256xf32>
    %809 = vector.broadcast %9 : vector<8x1xf32> to vector<8x256xf32>
    %810 = arith.mulf %808, %809 : vector<8x256xf32>
    %811 = arith.addf %806, %810 : vector<8x256xf32>
    %cst_323 = arith.constant 0.000000e+00 : f32
    %812 = vector.broadcast %cst_323 : f32 to vector<8x256xf32>
    %813 = arith.subf %812, %811 : vector<8x256xf32>
    %814 = math.exp %813 : vector<8x256xf32>
    %cst_324 = arith.constant 1.000000e+00 : f32
    %815 = vector.broadcast %cst_324 : f32 to vector<8x256xf32>
    %816 = arith.addf %815, %814 : vector<8x256xf32>
    %817 = tpu.reciprocal %816 : vector<8x256xf32> -> vector<8x256xf32>
    %818 = arith.mulf %811, %817 : vector<8x256xf32>
    %819 = vector.extract_strided_slice %790 {offsets = [4, 0], sizes = [1, 256], strides = [1, 1]} : vector<8x256xf32> to vector<1x256xf32>
    %820 = vector.broadcast %819 : vector<1x256xf32> to vector<8x256xf32>
    %821 = vector.broadcast %3 : vector<8x1xf32> to vector<8x256xf32>
    %822 = arith.mulf %820, %821 : vector<8x256xf32>
    %823 = vector.broadcast %10 : vector<8x1xf32> to vector<8x256xf32>
    %824 = arith.addf %822, %823 : vector<8x256xf32>
    %825 = vector.extract_strided_slice %790 {offsets = [5, 0], sizes = [1, 256], strides = [1, 1]} : vector<8x256xf32> to vector<1x256xf32>
    %826 = vector.broadcast %825 : vector<1x256xf32> to vector<8x256xf32>
    %827 = vector.broadcast %5 : vector<8x1xf32> to vector<8x256xf32>
    %828 = arith.mulf %826, %827 : vector<8x256xf32>
    %829 = arith.addf %824, %828 : vector<8x256xf32>
    %830 = vector.extract_strided_slice %790 {offsets = [6, 0], sizes = [1, 256], strides = [1, 1]} : vector<8x256xf32> to vector<1x256xf32>
    %831 = vector.broadcast %830 : vector<1x256xf32> to vector<8x256xf32>
    %832 = vector.broadcast %7 : vector<8x1xf32> to vector<8x256xf32>
    %833 = arith.mulf %831, %832 : vector<8x256xf32>
    %834 = arith.addf %829, %833 : vector<8x256xf32>
    %835 = vector.extract_strided_slice %790 {offsets = [7, 0], sizes = [1, 256], strides = [1, 1]} : vector<8x256xf32> to vector<1x256xf32>
    %836 = vector.broadcast %835 : vector<1x256xf32> to vector<8x256xf32>
    %837 = vector.broadcast %9 : vector<8x1xf32> to vector<8x256xf32>
    %838 = arith.mulf %836, %837 : vector<8x256xf32>
    %839 = arith.addf %834, %838 : vector<8x256xf32>
    %cst_325 = arith.constant 0.000000e+00 : f32
    %840 = vector.broadcast %cst_325 : f32 to vector<8x256xf32>
    %841 = arith.subf %840, %839 : vector<8x256xf32>
    %842 = math.exp %841 : vector<8x256xf32>
    %cst_326 = arith.constant 1.000000e+00 : f32
    %843 = vector.broadcast %cst_326 : f32 to vector<8x256xf32>
    %844 = arith.addf %843, %842 : vector<8x256xf32>
    %845 = tpu.reciprocal %844 : vector<8x256xf32> -> vector<8x256xf32>
    %846 = arith.mulf %839, %845 : vector<8x256xf32>
    %cst_327 = arith.constant dense<0.000000e+00> : vector<8xf32>
    %847 = vector.multi_reduction <add>, %818, %cst_327 [1] : vector<8x256xf32> to vector<8xf32>
    %848 = vector.shape_cast %847 : vector<8xf32> to vector<8x1xf32>
    %cst_328 = arith.constant dense<0.000000e+00> : vector<8xf32>
    %849 = vector.multi_reduction <add>, %846, %cst_328 [1] : vector<8x256xf32> to vector<8xf32>
    %850 = vector.shape_cast %849 : vector<8xf32> to vector<8x1xf32>
    %851 = arith.addf %848, %850 : vector<8x1xf32>
    %cst_329 = arith.constant 0.001953125 : f32
    %852 = vector.broadcast %cst_329 : f32 to vector<8x1xf32>
    %853 = arith.mulf %851, %852 : vector<8x1xf32>
    %854 = vector.broadcast %853 : vector<8x1xf32> to vector<8x256xf32>
    %855 = arith.subf %818, %854 : vector<8x256xf32>
    %856 = vector.broadcast %853 : vector<8x1xf32> to vector<8x256xf32>
    %857 = arith.subf %846, %856 : vector<8x256xf32>
    %858 = arith.mulf %855, %855 : vector<8x256xf32>
    %cst_330 = arith.constant dense<0.000000e+00> : vector<8xf32>
    %859 = vector.multi_reduction <add>, %858, %cst_330 [1] : vector<8x256xf32> to vector<8xf32>
    %860 = vector.shape_cast %859 : vector<8xf32> to vector<8x1xf32>
    %861 = arith.mulf %857, %857 : vector<8x256xf32>
    %cst_331 = arith.constant dense<0.000000e+00> : vector<8xf32>
    %862 = vector.multi_reduction <add>, %861, %cst_331 [1] : vector<8x256xf32> to vector<8xf32>
    %863 = vector.shape_cast %862 : vector<8xf32> to vector<8x1xf32>
    %864 = arith.addf %860, %863 : vector<8x1xf32>
    %cst_332 = arith.constant 0.001953125 : f32
    %865 = vector.broadcast %cst_332 : f32 to vector<8x1xf32>
    %866 = arith.mulf %864, %865 : vector<8x1xf32>
    %cst_333 = arith.constant 9.99999974E-6 : f32
    %867 = vector.broadcast %cst_333 : f32 to vector<8x1xf32>
    %868 = arith.addf %866, %867 : vector<8x1xf32>
    %869 = math.rsqrt %868 : vector<8x1xf32>
    %870 = arith.mulf %736, %869 : vector<8x1xf32>
    %871 = vector.broadcast %870 : vector<8x1xf32> to vector<8x256xf32>
    %872 = arith.mulf %855, %871 : vector<8x256xf32>
    %873 = vector.broadcast %870 : vector<8x1xf32> to vector<8x256xf32>
    %874 = arith.mulf %857, %873 : vector<8x256xf32>
    %875 = arith.addf %438, %872 : vector<8x256xf32>
    %c0_334 = arith.constant 0 : index
    %c1_335 = arith.constant 1 : index
    %c0_336 = arith.constant 0 : index
    %c0_337 = arith.constant 0 : index
    %876 = vector.load %arg6[%c0_334, %c1_335, %c0_336, %c0_337] : memref<2x4x8x256xf32, #tpu.memory_space<vmem>>, vector<1x1x8x256xf32>
    %877 = vector.shape_cast %876 : vector<1x1x8x256xf32> to vector<8x256xf32>
    %878 = vector.shape_cast %875 : vector<8x256xf32> to vector<1x1x8x256xf32>
    tpu.vector_store %arg6[%c0_334, %c1_335, %c0_336, %c0_337], %878 {strides = array<i32>} : memref<2x4x8x256xf32, #tpu.memory_space<vmem>>, vector<1x1x8x256xf32>,
    %879 = arith.addf %440, %874 : vector<8x256xf32>
    %c1_338 = arith.constant 1 : index
    %c1_339 = arith.constant 1 : index
    %c0_340 = arith.constant 0 : index
    %c0_341 = arith.constant 0 : index
    %880 = vector.load %arg6[%c1_338, %c1_339, %c0_340, %c0_341] : memref<2x4x8x256xf32, #tpu.memory_space<vmem>>, vector<1x1x8x256xf32>
    %881 = vector.shape_cast %880 : vector<1x1x8x256xf32> to vector<8x256xf32>
    %882 = vector.shape_cast %879 : vector<8x256xf32> to vector<1x1x8x256xf32>
    tpu.vector_store %arg6[%c1_338, %c1_339, %c0_340, %c0_341], %882 {strides = array<i32>} : memref<2x4x8x256xf32, #tpu.memory_space<vmem>>, vector<1x1x8x256xf32>,
    %c3_342 = arith.constant 3 : index
    %c0_343 = arith.constant 0 : index
    %c0_344 = arith.constant 0 : index
    %883 = vector.load %arg1[%c3_342, %c0_343, %c0_344] : memref<4x8x256xf32, #tpu.memory_space<vmem>>, vector<1x8x256xf32>
    %884 = vector.shape_cast %883 : vector<1x8x256xf32> to vector<8x256xf32>
    %c3_345 = arith.constant 3 : index
    %c0_346 = arith.constant 0 : index
    %c0_347 = arith.constant 0 : index
    %885 = vector.load %arg5[%c3_345, %c0_346, %c0_347] : memref<4x8x1xf32, #tpu.memory_space<vmem>>, vector<1x8x1xf32>
    %886 = vector.shape_cast %885 : vector<1x8x1xf32> to vector<8x1xf32>
    %887 = vector.broadcast %0 : f32 to vector<8x256xf32>
    %888 = arith.mulf %887, %592 : vector<8x256xf32>
    %889 = arith.addf %888, %884 : vector<8x256xf32>
    %890 = vector.broadcast %1 : f32 to vector<8x256xf32>
    %891 = arith.mulf %597, %890 : vector<8x256xf32>
    %892 = arith.subf %889, %891 : vector<8x256xf32>
    %893 = vector.broadcast %1 : f32 to vector<8x256xf32>
    %894 = arith.cmpf ogt, %892, %893 : vector<8x256xf32>
    %cst_348 = arith.constant 1.000000e+00 : f32
    %cst_349 = arith.constant 0.000000e+00 : f32
    %895 = vector.broadcast %cst_348 : f32 to vector<8x256xf32>
    %896 = vector.broadcast %cst_349 : f32 to vector<8x256xf32>
    %897 = arith.select %894, %895, %896 : vector<8x256xi1>, vector<8x256xf32>
    %c17_i32_350 = arith.constant 17 : i32
    %898 = tpu.dynamic_rotate %897 by %c17_i32_350 dim 1 : vector<8x256xf32>, i32 -> vector<8x256xf32>
    %c0_351 = arith.constant 0 : index
    %c0_352 = arith.constant 0 : index
    %c0_353 = arith.constant 0 : index
    %899 = vector.load %arg2[%c0_351, %c0_352, %c0_353] : memref<9x8x256xf32, #tpu.memory_space<vmem>>, vector<1x8x256xf32>
    %900 = vector.shape_cast %899 : vector<1x8x256xf32> to vector<8x256xf32>
    %901 = arith.mulf %898, %900 : vector<8x256xf32>
    %c16_i32_354 = arith.constant 16 : i32
    %902 = tpu.dynamic_rotate %897 by %c16_i32_354 dim 1 : vector<8x256xf32>, i32 -> vector<8x256xf32>
    %c1_355 = arith.constant 1 : index
    %c0_356 = arith.constant 0 : index
    %c0_357 = arith.constant 0 : index
    %903 = vector.load %arg2[%c1_355, %c0_356, %c0_357] : memref<9x8x256xf32, #tpu.memory_space<vmem>>, vector<1x8x256xf32>
    %904 = vector.shape_cast %903 : vector<1x8x256xf32> to vector<8x256xf32>
    %905 = arith.mulf %902, %904 : vector<8x256xf32>
    %906 = arith.addf %901, %905 : vector<8x256xf32>
    %c15_i32_358 = arith.constant 15 : i32
    %907 = tpu.dynamic_rotate %897 by %c15_i32_358 dim 1 : vector<8x256xf32>, i32 -> vector<8x256xf32>
    %c2_359 = arith.constant 2 : index
    %c0_360 = arith.constant 0 : index
    %c0_361 = arith.constant 0 : index
    %908 = vector.load %arg2[%c2_359, %c0_360, %c0_361] : memref<9x8x256xf32, #tpu.memory_space<vmem>>, vector<1x8x256xf32>
    %909 = vector.shape_cast %908 : vector<1x8x256xf32> to vector<8x256xf32>
    %910 = arith.mulf %907, %909 : vector<8x256xf32>
    %911 = arith.addf %906, %910 : vector<8x256xf32>
    %c1_i32_362 = arith.constant 1 : i32
    %912 = tpu.dynamic_rotate %897 by %c1_i32_362 dim 1 : vector<8x256xf32>, i32 -> vector<8x256xf32>
    %c3_363 = arith.constant 3 : index
    %c0_364 = arith.constant 0 : index
    %c0_365 = arith.constant 0 : index
    %913 = vector.load %arg2[%c3_363, %c0_364, %c0_365] : memref<9x8x256xf32, #tpu.memory_space<vmem>>, vector<1x8x256xf32>
    %914 = vector.shape_cast %913 : vector<1x8x256xf32> to vector<8x256xf32>
    %915 = arith.mulf %912, %914 : vector<8x256xf32>
    %916 = arith.addf %911, %915 : vector<8x256xf32>
    %c4_366 = arith.constant 4 : index
    %c0_367 = arith.constant 0 : index
    %c0_368 = arith.constant 0 : index
    %917 = vector.load %arg2[%c4_366, %c0_367, %c0_368] : memref<9x8x256xf32, #tpu.memory_space<vmem>>, vector<1x8x256xf32>
    %918 = vector.shape_cast %917 : vector<1x8x256xf32> to vector<8x256xf32>
    %919 = arith.mulf %897, %918 : vector<8x256xf32>
    %920 = arith.addf %916, %919 : vector<8x256xf32>
    %c255_i32_369 = arith.constant 255 : i32
    %921 = tpu.dynamic_rotate %897 by %c255_i32_369 dim 1 : vector<8x256xf32>, i32 -> vector<8x256xf32>
    %c5_370 = arith.constant 5 : index
    %c0_371 = arith.constant 0 : index
    %c0_372 = arith.constant 0 : index
    %922 = vector.load %arg2[%c5_370, %c0_371, %c0_372] : memref<9x8x256xf32, #tpu.memory_space<vmem>>, vector<1x8x256xf32>
    %923 = vector.shape_cast %922 : vector<1x8x256xf32> to vector<8x256xf32>
    %924 = arith.mulf %921, %923 : vector<8x256xf32>
    %925 = arith.addf %920, %924 : vector<8x256xf32>
    %c241_i32_373 = arith.constant 241 : i32
    %926 = tpu.dynamic_rotate %897 by %c241_i32_373 dim 1 : vector<8x256xf32>, i32 -> vector<8x256xf32>
    %c6_374 = arith.constant 6 : index
    %c0_375 = arith.constant 0 : index
    %c0_376 = arith.constant 0 : index
    %927 = vector.load %arg2[%c6_374, %c0_375, %c0_376] : memref<9x8x256xf32, #tpu.memory_space<vmem>>, vector<1x8x256xf32>
    %928 = vector.shape_cast %927 : vector<1x8x256xf32> to vector<8x256xf32>
    %929 = arith.mulf %926, %928 : vector<8x256xf32>
    %930 = arith.addf %925, %929 : vector<8x256xf32>
    %c240_i32_377 = arith.constant 240 : i32
    %931 = tpu.dynamic_rotate %897 by %c240_i32_377 dim 1 : vector<8x256xf32>, i32 -> vector<8x256xf32>
    %c7_378 = arith.constant 7 : index
    %c0_379 = arith.constant 0 : index
    %c0_380 = arith.constant 0 : index
    %932 = vector.load %arg2[%c7_378, %c0_379, %c0_380] : memref<9x8x256xf32, #tpu.memory_space<vmem>>, vector<1x8x256xf32>
    %933 = vector.shape_cast %932 : vector<1x8x256xf32> to vector<8x256xf32>
    %934 = arith.mulf %931, %933 : vector<8x256xf32>
    %935 = arith.addf %930, %934 : vector<8x256xf32>
    %c239_i32_381 = arith.constant 239 : i32
    %936 = tpu.dynamic_rotate %897 by %c239_i32_381 dim 1 : vector<8x256xf32>, i32 -> vector<8x256xf32>
    %c8_382 = arith.constant 8 : index
    %c0_383 = arith.constant 0 : index
    %c0_384 = arith.constant 0 : index
    %937 = vector.load %arg2[%c8_382, %c0_383, %c0_384] : memref<9x8x256xf32, #tpu.memory_space<vmem>>, vector<1x8x256xf32>
    %938 = vector.shape_cast %937 : vector<1x8x256xf32> to vector<8x256xf32>
    %939 = arith.mulf %936, %938 : vector<8x256xf32>
    %940 = arith.addf %935, %939 : vector<8x256xf32>
    %941 = vector.extract_strided_slice %940 {offsets = [0, 0], sizes = [1, 256], strides = [1, 1]} : vector<8x256xf32> to vector<1x256xf32>
    %942 = vector.broadcast %941 : vector<1x256xf32> to vector<8x256xf32>
    %943 = vector.broadcast %3 : vector<8x1xf32> to vector<8x256xf32>
    %944 = arith.mulf %942, %943 : vector<8x256xf32>
    %945 = vector.broadcast %10 : vector<8x1xf32> to vector<8x256xf32>
    %946 = arith.addf %944, %945 : vector<8x256xf32>
    %947 = vector.extract_strided_slice %940 {offsets = [1, 0], sizes = [1, 256], strides = [1, 1]} : vector<8x256xf32> to vector<1x256xf32>
    %948 = vector.broadcast %947 : vector<1x256xf32> to vector<8x256xf32>
    %949 = vector.broadcast %5 : vector<8x1xf32> to vector<8x256xf32>
    %950 = arith.mulf %948, %949 : vector<8x256xf32>
    %951 = arith.addf %946, %950 : vector<8x256xf32>
    %952 = vector.extract_strided_slice %940 {offsets = [2, 0], sizes = [1, 256], strides = [1, 1]} : vector<8x256xf32> to vector<1x256xf32>
    %953 = vector.broadcast %952 : vector<1x256xf32> to vector<8x256xf32>
    %954 = vector.broadcast %7 : vector<8x1xf32> to vector<8x256xf32>
    %955 = arith.mulf %953, %954 : vector<8x256xf32>
    %956 = arith.addf %951, %955 : vector<8x256xf32>
    %957 = vector.extract_strided_slice %940 {offsets = [3, 0], sizes = [1, 256], strides = [1, 1]} : vector<8x256xf32> to vector<1x256xf32>
    %958 = vector.broadcast %957 : vector<1x256xf32> to vector<8x256xf32>
    %959 = vector.broadcast %9 : vector<8x1xf32> to vector<8x256xf32>
    %960 = arith.mulf %958, %959 : vector<8x256xf32>
    %961 = arith.addf %956, %960 : vector<8x256xf32>
    %cst_385 = arith.constant 0.000000e+00 : f32
    %962 = vector.broadcast %cst_385 : f32 to vector<8x256xf32>
    %963 = arith.subf %962, %961 : vector<8x256xf32>
    %964 = math.exp %963 : vector<8x256xf32>
    %cst_386 = arith.constant 1.000000e+00 : f32
    %965 = vector.broadcast %cst_386 : f32 to vector<8x256xf32>
    %966 = arith.addf %965, %964 : vector<8x256xf32>
    %967 = tpu.reciprocal %966 : vector<8x256xf32> -> vector<8x256xf32>
    %968 = arith.mulf %961, %967 : vector<8x256xf32>
    %969 = vector.extract_strided_slice %940 {offsets = [4, 0], sizes = [1, 256], strides = [1, 1]} : vector<8x256xf32> to vector<1x256xf32>
    %970 = vector.broadcast %969 : vector<1x256xf32> to vector<8x256xf32>
    %971 = vector.broadcast %3 : vector<8x1xf32> to vector<8x256xf32>
    %972 = arith.mulf %970, %971 : vector<8x256xf32>
    %973 = vector.broadcast %10 : vector<8x1xf32> to vector<8x256xf32>
    %974 = arith.addf %972, %973 : vector<8x256xf32>
    %975 = vector.extract_strided_slice %940 {offsets = [5, 0], sizes = [1, 256], strides = [1, 1]} : vector<8x256xf32> to vector<1x256xf32>
    %976 = vector.broadcast %975 : vector<1x256xf32> to vector<8x256xf32>
    %977 = vector.broadcast %5 : vector<8x1xf32> to vector<8x256xf32>
    %978 = arith.mulf %976, %977 : vector<8x256xf32>
    %979 = arith.addf %974, %978 : vector<8x256xf32>
    %980 = vector.extract_strided_slice %940 {offsets = [6, 0], sizes = [1, 256], strides = [1, 1]} : vector<8x256xf32> to vector<1x256xf32>
    %981 = vector.broadcast %980 : vector<1x256xf32> to vector<8x256xf32>
    %982 = vector.broadcast %7 : vector<8x1xf32> to vector<8x256xf32>
    %983 = arith.mulf %981, %982 : vector<8x256xf32>
    %984 = arith.addf %979, %983 : vector<8x256xf32>
    %985 = vector.extract_strided_slice %940 {offsets = [7, 0], sizes = [1, 256], strides = [1, 1]} : vector<8x256xf32> to vector<1x256xf32>
    %986 = vector.broadcast %985 : vector<1x256xf32> to vector<8x256xf32>
    %987 = vector.broadcast %9 : vector<8x1xf32> to vector<8x256xf32>
    %988 = arith.mulf %986, %987 : vector<8x256xf32>
    %989 = arith.addf %984, %988 : vector<8x256xf32>
    %cst_387 = arith.constant 0.000000e+00 : f32
    %990 = vector.broadcast %cst_387 : f32 to vector<8x256xf32>
    %991 = arith.subf %990, %989 : vector<8x256xf32>
    %992 = math.exp %991 : vector<8x256xf32>
    %cst_388 = arith.constant 1.000000e+00 : f32
    %993 = vector.broadcast %cst_388 : f32 to vector<8x256xf32>
    %994 = arith.addf %993, %992 : vector<8x256xf32>
    %995 = tpu.reciprocal %994 : vector<8x256xf32> -> vector<8x256xf32>
    %996 = arith.mulf %989, %995 : vector<8x256xf32>
    %cst_389 = arith.constant dense<0.000000e+00> : vector<8xf32>
    %997 = vector.multi_reduction <add>, %968, %cst_389 [1] : vector<8x256xf32> to vector<8xf32>
    %998 = vector.shape_cast %997 : vector<8xf32> to vector<8x1xf32>
    %cst_390 = arith.constant dense<0.000000e+00> : vector<8xf32>
    %999 = vector.multi_reduction <add>, %996, %cst_390 [1] : vector<8x256xf32> to vector<8xf32>
    %1000 = vector.shape_cast %999 : vector<8xf32> to vector<8x1xf32>
    %1001 = arith.addf %998, %1000 : vector<8x1xf32>
    %cst_391 = arith.constant 0.001953125 : f32
    %1002 = vector.broadcast %cst_391 : f32 to vector<8x1xf32>
    %1003 = arith.mulf %1001, %1002 : vector<8x1xf32>
    %1004 = vector.broadcast %1003 : vector<8x1xf32> to vector<8x256xf32>
    %1005 = arith.subf %968, %1004 : vector<8x256xf32>
    %1006 = vector.broadcast %1003 : vector<8x1xf32> to vector<8x256xf32>
    %1007 = arith.subf %996, %1006 : vector<8x256xf32>
    %1008 = arith.mulf %1005, %1005 : vector<8x256xf32>
    %cst_392 = arith.constant dense<0.000000e+00> : vector<8xf32>
    %1009 = vector.multi_reduction <add>, %1008, %cst_392 [1] : vector<8x256xf32> to vector<8xf32>
    %1010 = vector.shape_cast %1009 : vector<8xf32> to vector<8x1xf32>
    %1011 = arith.mulf %1007, %1007 : vector<8x256xf32>
    %cst_393 = arith.constant dense<0.000000e+00> : vector<8xf32>
    %1012 = vector.multi_reduction <add>, %1011, %cst_393 [1] : vector<8x256xf32> to vector<8xf32>
    %1013 = vector.shape_cast %1012 : vector<8xf32> to vector<8x1xf32>
    %1014 = arith.addf %1010, %1013 : vector<8x1xf32>
    %cst_394 = arith.constant 0.001953125 : f32
    %1015 = vector.broadcast %cst_394 : f32 to vector<8x1xf32>
    %1016 = arith.mulf %1014, %1015 : vector<8x1xf32>
    %cst_395 = arith.constant 9.99999974E-6 : f32
    %1017 = vector.broadcast %cst_395 : f32 to vector<8x1xf32>
    %1018 = arith.addf %1016, %1017 : vector<8x1xf32>
    %1019 = math.rsqrt %1018 : vector<8x1xf32>
    %1020 = arith.mulf %886, %1019 : vector<8x1xf32>
    %1021 = vector.broadcast %1020 : vector<8x1xf32> to vector<8x256xf32>
    %1022 = arith.mulf %1005, %1021 : vector<8x256xf32>
    %1023 = vector.broadcast %1020 : vector<8x1xf32> to vector<8x256xf32>
    %1024 = arith.mulf %1007, %1023 : vector<8x256xf32>
    %1025 = arith.addf %296, %1022 : vector<8x256xf32>
    %c0_396 = arith.constant 0 : index
    %c3_397 = arith.constant 3 : index
    %c0_398 = arith.constant 0 : index
    %c0_399 = arith.constant 0 : index
    %1026 = vector.load %arg6[%c0_396, %c3_397, %c0_398, %c0_399] : memref<2x4x8x256xf32, #tpu.memory_space<vmem>>, vector<1x1x8x256xf32>
    %1027 = vector.shape_cast %1026 : vector<1x1x8x256xf32> to vector<8x256xf32>
    %1028 = vector.shape_cast %1025 : vector<8x256xf32> to vector<1x1x8x256xf32>
    tpu.vector_store %arg6[%c0_396, %c3_397, %c0_398, %c0_399], %1028 {strides = array<i32>} : memref<2x4x8x256xf32, #tpu.memory_space<vmem>>, vector<1x1x8x256xf32>,
    %1029 = arith.addf %298, %1024 : vector<8x256xf32>
    %c1_400 = arith.constant 1 : index
    %c3_401 = arith.constant 3 : index
    %c0_402 = arith.constant 0 : index
    %c0_403 = arith.constant 0 : index
    %1030 = vector.load %arg6[%c1_400, %c3_401, %c0_402, %c0_403] : memref<2x4x8x256xf32, #tpu.memory_space<vmem>>, vector<1x1x8x256xf32>
    %1031 = vector.shape_cast %1030 : vector<1x1x8x256xf32> to vector<8x256xf32>
    %1032 = vector.shape_cast %1029 : vector<8x256xf32> to vector<1x1x8x256xf32>
    tpu.vector_store %arg6[%c1_400, %c3_401, %c0_402, %c0_403], %1032 {strides = array<i32>} : memref<2x4x8x256xf32, #tpu.memory_space<vmem>>, vector<1x1x8x256xf32>,
    %c0_404 = arith.constant 0 : index
    %c0_405 = arith.constant 0 : index
    %c0_406 = arith.constant 0 : index
    %1033 = vector.load %arg1[%c0_404, %c0_405, %c0_406] : memref<4x8x256xf32, #tpu.memory_space<vmem>>, vector<1x8x256xf32>
    %1034 = vector.shape_cast %1033 : vector<1x8x256xf32> to vector<8x256xf32>
    %c0_407 = arith.constant 0 : index
    %c0_408 = arith.constant 0 : index
    %c0_409 = arith.constant 0 : index
    %1035 = vector.load %arg5[%c0_407, %c0_408, %c0_409] : memref<4x8x1xf32, #tpu.memory_space<vmem>>, vector<1x8x1xf32>
    %1036 = vector.shape_cast %1035 : vector<1x8x1xf32> to vector<8x1xf32>
    %1037 = vector.broadcast %0 : f32 to vector<8x256xf32>
    %1038 = arith.mulf %1037, %742 : vector<8x256xf32>
    %1039 = arith.addf %1038, %1034 : vector<8x256xf32>
    %1040 = vector.broadcast %1 : f32 to vector<8x256xf32>
    %1041 = arith.mulf %747, %1040 : vector<8x256xf32>
    %1042 = arith.subf %1039, %1041 : vector<8x256xf32>
    %1043 = vector.broadcast %1 : f32 to vector<8x256xf32>
    %1044 = arith.cmpf ogt, %1042, %1043 : vector<8x256xf32>
    %cst_410 = arith.constant 1.000000e+00 : f32
    %cst_411 = arith.constant 0.000000e+00 : f32
    %1045 = vector.broadcast %cst_410 : f32 to vector<8x256xf32>
    %1046 = vector.broadcast %cst_411 : f32 to vector<8x256xf32>
    %1047 = arith.select %1044, %1045, %1046 : vector<8x256xi1>, vector<8x256xf32>
    %c17_i32_412 = arith.constant 17 : i32
    %1048 = tpu.dynamic_rotate %1047 by %c17_i32_412 dim 1 : vector<8x256xf32>, i32 -> vector<8x256xf32>
    %c0_413 = arith.constant 0 : index
    %c0_414 = arith.constant 0 : index
    %c0_415 = arith.constant 0 : index
    %1049 = vector.load %arg2[%c0_413, %c0_414, %c0_415] : memref<9x8x256xf32, #tpu.memory_space<vmem>>, vector<1x8x256xf32>
    %1050 = vector.shape_cast %1049 : vector<1x8x256xf32> to vector<8x256xf32>
    %1051 = arith.mulf %1048, %1050 : vector<8x256xf32>
    %c16_i32_416 = arith.constant 16 : i32
    %1052 = tpu.dynamic_rotate %1047 by %c16_i32_416 dim 1 : vector<8x256xf32>, i32 -> vector<8x256xf32>
    %c1_417 = arith.constant 1 : index
    %c0_418 = arith.constant 0 : index
    %c0_419 = arith.constant 0 : index
    %1053 = vector.load %arg2[%c1_417, %c0_418, %c0_419] : memref<9x8x256xf32, #tpu.memory_space<vmem>>, vector<1x8x256xf32>
    %1054 = vector.shape_cast %1053 : vector<1x8x256xf32> to vector<8x256xf32>
    %1055 = arith.mulf %1052, %1054 : vector<8x256xf32>
    %1056 = arith.addf %1051, %1055 : vector<8x256xf32>
    %c15_i32_420 = arith.constant 15 : i32
    %1057 = tpu.dynamic_rotate %1047 by %c15_i32_420 dim 1 : vector<8x256xf32>, i32 -> vector<8x256xf32>
    %c2_421 = arith.constant 2 : index
    %c0_422 = arith.constant 0 : index
    %c0_423 = arith.constant 0 : index
    %1058 = vector.load %arg2[%c2_421, %c0_422, %c0_423] : memref<9x8x256xf32, #tpu.memory_space<vmem>>, vector<1x8x256xf32>
    %1059 = vector.shape_cast %1058 : vector<1x8x256xf32> to vector<8x256xf32>
    %1060 = arith.mulf %1057, %1059 : vector<8x256xf32>
    %1061 = arith.addf %1056, %1060 : vector<8x256xf32>
    %c1_i32_424 = arith.constant 1 : i32
    %1062 = tpu.dynamic_rotate %1047 by %c1_i32_424 dim 1 : vector<8x256xf32>, i32 -> vector<8x256xf32>
    %c3_425 = arith.constant 3 : index
    %c0_426 = arith.constant 0 : index
    %c0_427 = arith.constant 0 : index
    %1063 = vector.load %arg2[%c3_425, %c0_426, %c0_427] : memref<9x8x256xf32, #tpu.memory_space<vmem>>, vector<1x8x256xf32>
    %1064 = vector.shape_cast %1063 : vector<1x8x256xf32> to vector<8x256xf32>
    %1065 = arith.mulf %1062, %1064 : vector<8x256xf32>
    %1066 = arith.addf %1061, %1065 : vector<8x256xf32>
    %c4_428 = arith.constant 4 : index
    %c0_429 = arith.constant 0 : index
    %c0_430 = arith.constant 0 : index
    %1067 = vector.load %arg2[%c4_428, %c0_429, %c0_430] : memref<9x8x256xf32, #tpu.memory_space<vmem>>, vector<1x8x256xf32>
    %1068 = vector.shape_cast %1067 : vector<1x8x256xf32> to vector<8x256xf32>
    %1069 = arith.mulf %1047, %1068 : vector<8x256xf32>
    %1070 = arith.addf %1066, %1069 : vector<8x256xf32>
    %c255_i32_431 = arith.constant 255 : i32
    %1071 = tpu.dynamic_rotate %1047 by %c255_i32_431 dim 1 : vector<8x256xf32>, i32 -> vector<8x256xf32>
    %c5_432 = arith.constant 5 : index
    %c0_433 = arith.constant 0 : index
    %c0_434 = arith.constant 0 : index
    %1072 = vector.load %arg2[%c5_432, %c0_433, %c0_434] : memref<9x8x256xf32, #tpu.memory_space<vmem>>, vector<1x8x256xf32>
    %1073 = vector.shape_cast %1072 : vector<1x8x256xf32> to vector<8x256xf32>
    %1074 = arith.mulf %1071, %1073 : vector<8x256xf32>
    %1075 = arith.addf %1070, %1074 : vector<8x256xf32>
    %c241_i32_435 = arith.constant 241 : i32
    %1076 = tpu.dynamic_rotate %1047 by %c241_i32_435 dim 1 : vector<8x256xf32>, i32 -> vector<8x256xf32>
    %c6_436 = arith.constant 6 : index
    %c0_437 = arith.constant 0 : index
    %c0_438 = arith.constant 0 : index
    %1077 = vector.load %arg2[%c6_436, %c0_437, %c0_438] : memref<9x8x256xf32, #tpu.memory_space<vmem>>, vector<1x8x256xf32>
    %1078 = vector.shape_cast %1077 : vector<1x8x256xf32> to vector<8x256xf32>
    %1079 = arith.mulf %1076, %1078 : vector<8x256xf32>
    %1080 = arith.addf %1075, %1079 : vector<8x256xf32>
    %c240_i32_439 = arith.constant 240 : i32
    %1081 = tpu.dynamic_rotate %1047 by %c240_i32_439 dim 1 : vector<8x256xf32>, i32 -> vector<8x256xf32>
    %c7_440 = arith.constant 7 : index
    %c0_441 = arith.constant 0 : index
    %c0_442 = arith.constant 0 : index
    %1082 = vector.load %arg2[%c7_440, %c0_441, %c0_442] : memref<9x8x256xf32, #tpu.memory_space<vmem>>, vector<1x8x256xf32>
    %1083 = vector.shape_cast %1082 : vector<1x8x256xf32> to vector<8x256xf32>
    %1084 = arith.mulf %1081, %1083 : vector<8x256xf32>
    %1085 = arith.addf %1080, %1084 : vector<8x256xf32>
    %c239_i32_443 = arith.constant 239 : i32
    %1086 = tpu.dynamic_rotate %1047 by %c239_i32_443 dim 1 : vector<8x256xf32>, i32 -> vector<8x256xf32>
    %c8_444 = arith.constant 8 : index
    %c0_445 = arith.constant 0 : index
    %c0_446 = arith.constant 0 : index
    %1087 = vector.load %arg2[%c8_444, %c0_445, %c0_446] : memref<9x8x256xf32, #tpu.memory_space<vmem>>, vector<1x8x256xf32>
    %1088 = vector.shape_cast %1087 : vector<1x8x256xf32> to vector<8x256xf32>
    %1089 = arith.mulf %1086, %1088 : vector<8x256xf32>
    %1090 = arith.addf %1085, %1089 : vector<8x256xf32>
    %1091 = vector.extract_strided_slice %1090 {offsets = [0, 0], sizes = [1, 256], strides = [1, 1]} : vector<8x256xf32> to vector<1x256xf32>
    %1092 = vector.broadcast %1091 : vector<1x256xf32> to vector<8x256xf32>
    %1093 = vector.broadcast %3 : vector<8x1xf32> to vector<8x256xf32>
    %1094 = arith.mulf %1092, %1093 : vector<8x256xf32>
    %1095 = vector.broadcast %10 : vector<8x1xf32> to vector<8x256xf32>
    %1096 = arith.addf %1094, %1095 : vector<8x256xf32>
    %1097 = vector.extract_strided_slice %1090 {offsets = [1, 0], sizes = [1, 256], strides = [1, 1]} : vector<8x256xf32> to vector<1x256xf32>
    %1098 = vector.broadcast %1097 : vector<1x256xf32> to vector<8x256xf32>
    %1099 = vector.broadcast %5 : vector<8x1xf32> to vector<8x256xf32>
    %1100 = arith.mulf %1098, %1099 : vector<8x256xf32>
    %1101 = arith.addf %1096, %1100 : vector<8x256xf32>
    %1102 = vector.extract_strided_slice %1090 {offsets = [2, 0], sizes = [1, 256], strides = [1, 1]} : vector<8x256xf32> to vector<1x256xf32>
    %1103 = vector.broadcast %1102 : vector<1x256xf32> to vector<8x256xf32>
    %1104 = vector.broadcast %7 : vector<8x1xf32> to vector<8x256xf32>
    %1105 = arith.mulf %1103, %1104 : vector<8x256xf32>
    %1106 = arith.addf %1101, %1105 : vector<8x256xf32>
    %1107 = vector.extract_strided_slice %1090 {offsets = [3, 0], sizes = [1, 256], strides = [1, 1]} : vector<8x256xf32> to vector<1x256xf32>
    %1108 = vector.broadcast %1107 : vector<1x256xf32> to vector<8x256xf32>
    %1109 = vector.broadcast %9 : vector<8x1xf32> to vector<8x256xf32>
    %1110 = arith.mulf %1108, %1109 : vector<8x256xf32>
    %1111 = arith.addf %1106, %1110 : vector<8x256xf32>
    %cst_447 = arith.constant 0.000000e+00 : f32
    %1112 = vector.broadcast %cst_447 : f32 to vector<8x256xf32>
    %1113 = arith.subf %1112, %1111 : vector<8x256xf32>
    %1114 = math.exp %1113 : vector<8x256xf32>
    %cst_448 = arith.constant 1.000000e+00 : f32
    %1115 = vector.broadcast %cst_448 : f32 to vector<8x256xf32>
    %1116 = arith.addf %1115, %1114 : vector<8x256xf32>
    %1117 = tpu.reciprocal %1116 : vector<8x256xf32> -> vector<8x256xf32>
    %1118 = arith.mulf %1111, %1117 : vector<8x256xf32>
    %1119 = vector.extract_strided_slice %1090 {offsets = [4, 0], sizes = [1, 256], strides = [1, 1]} : vector<8x256xf32> to vector<1x256xf32>
    %1120 = vector.broadcast %1119 : vector<1x256xf32> to vector<8x256xf32>
    %1121 = vector.broadcast %3 : vector<8x1xf32> to vector<8x256xf32>
    %1122 = arith.mulf %1120, %1121 : vector<8x256xf32>
    %1123 = vector.broadcast %10 : vector<8x1xf32> to vector<8x256xf32>
    %1124 = arith.addf %1122, %1123 : vector<8x256xf32>
    %1125 = vector.extract_strided_slice %1090 {offsets = [5, 0], sizes = [1, 256], strides = [1, 1]} : vector<8x256xf32> to vector<1x256xf32>
    %1126 = vector.broadcast %1125 : vector<1x256xf32> to vector<8x256xf32>
    %1127 = vector.broadcast %5 : vector<8x1xf32> to vector<8x256xf32>
    %1128 = arith.mulf %1126, %1127 : vector<8x256xf32>
    %1129 = arith.addf %1124, %1128 : vector<8x256xf32>
    %1130 = vector.extract_strided_slice %1090 {offsets = [6, 0], sizes = [1, 256], strides = [1, 1]} : vector<8x256xf32> to vector<1x256xf32>
    %1131 = vector.broadcast %1130 : vector<1x256xf32> to vector<8x256xf32>
    %1132 = vector.broadcast %7 : vector<8x1xf32> to vector<8x256xf32>
    %1133 = arith.mulf %1131, %1132 : vector<8x256xf32>
    %1134 = arith.addf %1129, %1133 : vector<8x256xf32>
    %1135 = vector.extract_strided_slice %1090 {offsets = [7, 0], sizes = [1, 256], strides = [1, 1]} : vector<8x256xf32> to vector<1x256xf32>
    %1136 = vector.broadcast %1135 : vector<1x256xf32> to vector<8x256xf32>
    %1137 = vector.broadcast %9 : vector<8x1xf32> to vector<8x256xf32>
    %1138 = arith.mulf %1136, %1137 : vector<8x256xf32>
    %1139 = arith.addf %1134, %1138 : vector<8x256xf32>
    %cst_449 = arith.constant 0.000000e+00 : f32
    %1140 = vector.broadcast %cst_449 : f32 to vector<8x256xf32>
    %1141 = arith.subf %1140, %1139 : vector<8x256xf32>
    %1142 = math.exp %1141 : vector<8x256xf32>
    %cst_450 = arith.constant 1.000000e+00 : f32
    %1143 = vector.broadcast %cst_450 : f32 to vector<8x256xf32>
    %1144 = arith.addf %1143, %1142 : vector<8x256xf32>
    %1145 = tpu.reciprocal %1144 : vector<8x256xf32> -> vector<8x256xf32>
    %1146 = arith.mulf %1139, %1145 : vector<8x256xf32>
    %cst_451 = arith.constant dense<0.000000e+00> : vector<8xf32>
    %1147 = vector.multi_reduction <add>, %1118, %cst_451 [1] : vector<8x256xf32> to vector<8xf32>
    %1148 = vector.shape_cast %1147 : vector<8xf32> to vector<8x1xf32>
    %cst_452 = arith.constant dense<0.000000e+00> : vector<8xf32>
    %1149 = vector.multi_reduction <add>, %1146, %cst_452 [1] : vector<8x256xf32> to vector<8xf32>
    %1150 = vector.shape_cast %1149 : vector<8xf32> to vector<8x1xf32>
    %1151 = arith.addf %1148, %1150 : vector<8x1xf32>
    %cst_453 = arith.constant 0.001953125 : f32
    %1152 = vector.broadcast %cst_453 : f32 to vector<8x1xf32>
    %1153 = arith.mulf %1151, %1152 : vector<8x1xf32>
    %1154 = vector.broadcast %1153 : vector<8x1xf32> to vector<8x256xf32>
    %1155 = arith.subf %1118, %1154 : vector<8x256xf32>
    %1156 = vector.broadcast %1153 : vector<8x1xf32> to vector<8x256xf32>
    %1157 = arith.subf %1146, %1156 : vector<8x256xf32>
    %1158 = arith.mulf %1155, %1155 : vector<8x256xf32>
    %cst_454 = arith.constant dense<0.000000e+00> : vector<8xf32>
    %1159 = vector.multi_reduction <add>, %1158, %cst_454 [1] : vector<8x256xf32> to vector<8xf32>
    %1160 = vector.shape_cast %1159 : vector<8xf32> to vector<8x1xf32>
    %1161 = arith.mulf %1157, %1157 : vector<8x256xf32>
    %cst_455 = arith.constant dense<0.000000e+00> : vector<8xf32>
    %1162 = vector.multi_reduction <add>, %1161, %cst_455 [1] : vector<8x256xf32> to vector<8xf32>
    %1163 = vector.shape_cast %1162 : vector<8xf32> to vector<8x1xf32>
    %1164 = arith.addf %1160, %1163 : vector<8x1xf32>
    %cst_456 = arith.constant 0.001953125 : f32
    %1165 = vector.broadcast %cst_456 : f32 to vector<8x1xf32>
    %1166 = arith.mulf %1164, %1165 : vector<8x1xf32>
    %cst_457 = arith.constant 9.99999974E-6 : f32
    %1167 = vector.broadcast %cst_457 : f32 to vector<8x1xf32>
    %1168 = arith.addf %1166, %1167 : vector<8x1xf32>
    %1169 = math.rsqrt %1168 : vector<8x1xf32>
    %1170 = arith.mulf %1036, %1169 : vector<8x1xf32>
    %1171 = vector.broadcast %1170 : vector<8x1xf32> to vector<8x256xf32>
    %1172 = arith.mulf %1155, %1171 : vector<8x256xf32>
    %1173 = vector.broadcast %1170 : vector<8x1xf32> to vector<8x256xf32>
    %1174 = arith.mulf %1157, %1173 : vector<8x256xf32>
    %1175 = arith.addf %154, %1172 : vector<8x256xf32>
    %c0_458 = arith.constant 0 : index
    %c0_459 = arith.constant 0 : index
    %c0_460 = arith.constant 0 : index
    %c0_461 = arith.constant 0 : index
    %1176 = vector.load %arg6[%c0_458, %c0_459, %c0_460, %c0_461] : memref<2x4x8x256xf32, #tpu.memory_space<vmem>>, vector<1x1x8x256xf32>
    %1177 = vector.shape_cast %1176 : vector<1x1x8x256xf32> to vector<8x256xf32>
    %1178 = vector.shape_cast %1175 : vector<8x256xf32> to vector<1x1x8x256xf32>
    tpu.vector_store %arg6[%c0_458, %c0_459, %c0_460, %c0_461], %1178 {strides = array<i32>} : memref<2x4x8x256xf32, #tpu.memory_space<vmem>>, vector<1x1x8x256xf32>,
    %1179 = arith.addf %156, %1174 : vector<8x256xf32>
    %c1_462 = arith.constant 1 : index
    %c0_463 = arith.constant 0 : index
    %c0_464 = arith.constant 0 : index
    %c0_465 = arith.constant 0 : index
    %1180 = vector.load %arg6[%c1_462, %c0_463, %c0_464, %c0_465] : memref<2x4x8x256xf32, #tpu.memory_space<vmem>>, vector<1x1x8x256xf32>
    %1181 = vector.shape_cast %1180 : vector<1x1x8x256xf32> to vector<8x256xf32>
    %1182 = vector.shape_cast %1179 : vector<8x256xf32> to vector<1x1x8x256xf32>
    tpu.vector_store %arg6[%c1_462, %c0_463, %c0_464, %c0_465], %1182 {strides = array<i32>} : memref<2x4x8x256xf32, #tpu.memory_space<vmem>>, vector<1x1x8x256xf32>,
    return
  }
}

</mosaic_0001>

<bundles_post_ra>
// kernel: lcbv2_forward.1
= control target key start
LH: loop header
LB: loop body
LE: loop exit
PB: predicated region body
PF: predicated region fallthrough
CT: control target
= control target key end

     0   :  { %11 = vsyncpa [#allocation3], 0  ;;  %s4755_s0 = inlined_call_operand.vmem [shape: f32[2], index: 0, kind: input, shape index: {}]   ;;  %s4756_s1 = inlined_call_operand.vmem [shape: f32[4,8,256], index: 1, kind: input, shape index: {}]   ;;  %s4757_s2 = inlined_call_operand.vmem [shape: f32[9,8,256], index: 2, kind: input, shape index: {}]   ;;  %s4758_s3 = inlined_call_operand.vmem [shape: f32[4,8,1], index: 3, kind: input, shape index: {}]   ;;  %s4759_s4 = inlined_call_operand.vmem [shape: f32[8,1], index: 4, kind: input, shape index: {}]   ;;  %s4760_s5 = inlined_call_operand.vmem [shape: f32[4,8,1], index: 5, kind: input, shape index: {}]   ;;  %s4761_s6 = inlined_call_operand.vmem [shape: f32[2,4,8,256], index: 6, kind: output, shape index: {}]  }
   0x1   :  { %s18_s23 = sshll.u32 %s4755_s0, 4  ;;  %s19_s23 = int_to_ptr.vmem [resolvable:$true] %s18_s23 }
   0x2   :  { %s2820_s24 = scalar_lea.vmem %s19_s23, 16  ;;  %p2825_p1 = scmp.lt.s32.totalorder %s19_s23, %s19_s23 }
   0x3   :  { %p2821_p0 = scmp.ne.s32.totalorder %s19_s23, %s2820_s24  ;;  %p2826_p2 = scmp.lt.s32.totalorder %s2820_s24, %s2820_s24 }
   0x5   :  { %p2827_p3 = por %p2826_p2, %p2825_p1 }
   0x7   :  { %p2828_p4 = pnand %p2827_p3, %p2821_p0 }
   0x9   :  { %2831 = shalt.err (!%p2828_p4)
}
   0xa   :  { %s2834_s25 = smov [#allocation2]  }
   0xb   :  { %21 = dma.vmem_to_smem %s19_s23, 16, %s2834_s25, [#allocation3]  }
   0xc   :  { %2832 = dma.done.wait [#allocation3], 16  }
   0xd   :  { %2833 = vsyncadd [#allocation3], 4294967280 }
   0xe   :  { %35 = sfence }
   0xf   :  { %s36_s26 = sld [smem:[#allocation2]]  ;;  %s2228_s27 = sld [smem:[#allocation2 + $0x1]]  ;;  %v2835_v0 = vmov 0   ;;  %v46_v1 = vld [vmem:[%s4756_s1] sm:$0xff]  ;;  %v47_v2 = vld [vmem:[%s4756_s1 + $0x8] sm:$0xff]  ;;  %v4762_v11 = vmov 0.0  }
  0x10   :  { %2377 = vset.pattern.permute.xlu1 %v2835_v0  ;;  %2371 = vset.pattern.permute.xlu0 %v2835_v0  ;;  %s2837_s7 = smov 15   ;;  %s2838_s8 = smov 17   ;;  %v2248_v15 = vld [vmem:[%s4756_s1 + $0x30] sm:$0xff]  ;;  %v2249_v16 = vld [vmem:[%s4756_s1 + $0x38] sm:$0xff]  ;;  %v45_v21 = vld [vmem:[%s4759_s4] sm:$0xff] }
  0x11   :  { %s2839_s13 = smov 1   ;;  %s2840_s14 = smov 16   ;;  %v38_v22 = vld [vmem:[%s4758_s3] sm:$0xff]  ;;  %v2229_v23 = vld [vmem:[%s4758_s3 + $0x8] sm:$0xff]  ;;  %v2230_v24 = vld [vmem:[%s4758_s3 + $0x10] sm:$0xff] }
  0x12   :  { %s2841_s15 = smov 113   ;;  %s2842_s16 = smov 127   ;;  %v2251_v29 = vld [vmem:[%s4756_s1 + $0x10] sm:$0xff]  ;;  %v2252_v30 = vld [vmem:[%s4756_s1 + $0x18] sm:$0xff]  ;;  %v2254_v41 = vld [vmem:[%s4756_s1 + $0x20] sm:$0xff] }
  0x13   :  { %s2843_s17 = smov 111   ;;  %s2844_s18 = smov 112   ;;  %v2231_v32 = vld [vmem:[%s4758_s3 + $0x18] sm:$0xff]  ;;  %v2255_v42 = vld [vmem:[%s4756_s1 + $0x28] sm:$0xff] }
  0x15   :  { %v2889_v3 = vstv %s36_s26  ;;  %v2891_v4 = vstv %s2228_s27 }
  0x16   :  { %4797 = vst [vmem:[#allocation5_spill] sm:$0xff] %v2889_v3  ;;  %4798 = vst [vmem:[#allocation6_spill] sm:$0xff] %v2891_v4  ;;  %v50_v5 = vmul.f32 0.0, %v2889_v3  ;;  %v54_v6 = vmul.f32 0.0, %v2891_v4 }
  0x18   :  { %v51_v7 = vadd.f32 %v50_v5, %v46_v1  ;;  %v52_v8 = vadd.f32 %v50_v5, %v47_v2  ;;  %v365_v17 = vadd.f32 %v2248_v15, %v50_v5  ;;  %v366_v18 = vadd.f32 %v2249_v16, %v50_v5 }
  0x1a   :  { %v55_v9 = vsub.f32 %v51_v7, %v54_v6  ;;  %v56_v10 = vsub.f32 %v52_v8, %v54_v6  ;;  %v367_v19 = vsub.f32 %v365_v17, %v54_v6  ;;  %v368_v20 = vsub.f32 %v366_v18, %v54_v6 }
  0x1b   :  { %v65_v18 = vlaneseq }
  0x1c   :  { %vm57_vm0 = vcmp.gt.f32.partialorder %v55_v9, %v2891_v4  ;;  %vm58_vm1 = vcmp.gt.f32.partialorder %v56_v10, %v2891_v4  ;;  %vm369_vm2 = vcmp.gt.f32.partialorder %v367_v19, %v2891_v4  ;;  %vm370_vm3 = vcmp.gt.f32.partialorder %v368_v20, %v2891_v4 }
  0x1d   :  { %v2898_v12 = vsel %vm57_vm0, 1.0, %v4762_v11  ;;  %v2901_v13 = vsel %vm58_vm1, 1.0, %v4762_v11  ;;  %v2934_v25 = vsel %vm369_vm2, 1.0, %v4762_v11  ;;  %v2937_v26 = vsel %vm370_vm3, 1.0, %v4762_v11 }
  0x1e   :  { %v2346_v14 = vpack.i.bf16 %v2901_v13, %v2898_v12  ;;  %v616_v27 = vmul.f32 %v55_v9, %v2889_v3  ;;  %v617_v28 = vmul.f32 %v56_v10, %v2889_v3  ;;  %v2378_v31 = vpack.i.bf16 %v2937_v26, %v2934_v25 }
  0x1f   :  { %v620_v35 = vmul.f32 %v2898_v12, %v2891_v4  ;;  %v621_v36 = vmul.f32 %v2901_v13, %v2891_v4  ;;  %v871_v39 = vmul.f32 %v367_v19, %v2889_v3  ;;  %v872_v40 = vmul.f32 %v368_v20, %v2889_v3 }
  0x20   :  { %2347 = vrot.lane.b32.xlu1 %v2346_v14, %s2837_s7  ;;  %2337 = vrot.lane.b32.xlu0 %v2346_v14, %s2838_s8  ;;  %v618_v33 = vadd.f32 %v2251_v29, %v616_v27  ;;  %v619_v34 = vadd.f32 %v2252_v30, %v617_v28  ;;  %v875_v45 = vmul.f32 %v2934_v25, %v2891_v4  ;;  %v3071_v19 = vand.u32 127, %v65_v18  ;;  %v3077_v28 = vld [vmem:[%s4757_s2] sm:$0xff] }
  0x21   :  { %v873_v43 = vadd.f32 %v2254_v41, %v871_v39  ;;  %v874_v44 = vadd.f32 %v2255_v42, %v872_v40  ;;  %v876_v46 = vmul.f32 %v2937_v26, %v2891_v4 }
  0x22   :  { %v622_v37 = vsub.f32 %v618_v33, %v620_v35  ;;  %v623_v38 = vsub.f32 %v619_v34, %v621_v36  ;;  %vm67_vm12 = vcmp.lt.s32.totalorder %v3071_v19, 17  ;;  %vm92_vm13 = vcmp.lt.s32.totalorder %v3071_v19, 15 }
  0x23   :  { %v877_v52 = vsub.f32 %v873_v43, %v875_v45  ;;  %v878_v53 = vsub.f32 %v874_v44, %v876_v46  ;;  %vm106_vm14 = vcmp.lt.s32.totalorder %v3071_v19, 1  ;;  %vm78_vm15 = vcmp.lt.s32.totalorder %v3071_v19, 16  ;;  %v3115_v44 = vld [vmem:[%s4757_s2 + $0x20] sm:$0xff]  ;;  %v3120_v45 = vld [vmem:[%s4757_s2 + $0x28] sm:$0xff] }
  0x24   :  { %2352 = vrot.lane.b32.xlu1 %v2346_v14, %s2839_s13  ;;  %2342 = vrot.lane.b32.xlu0 %v2346_v14, %s2840_s14  ;;  %vm624_vm4 = vcmp.gt.f32.partialorder %v622_v37, %v2891_v4  ;;  %vm625_vm5 = vcmp.gt.f32.partialorder %v623_v38, %v2891_v4  ;;  %v1121_v49 = vmul.f32 %v622_v37, %v2889_v3  ;;  %vm141_vm0 = vcmp.lt.s32.totalorder %v3071_v19, 113  ;;  %v3100_v37 = vld [vmem:[%s4757_s2 + $0x10] sm:$0xff] }
  0x25   :  { %v2976_v47 = vsel %vm624_vm4, 1.0, %v4762_v11  ;;  %v2979_v48 = vsel %vm625_vm5, 1.0, %v4762_v11  ;;  %v1122_v50 = vmul.f32 %v623_v38, %v2889_v3  ;;  %vm879_vm6 = vcmp.gt.f32.partialorder %v877_v52, %v2891_v4  ;;  %v3105_v38 = vld [vmem:[%s4757_s2 + $0x18] sm:$0xff] }
  0x26   :  { %v2418_v51 = vpack.i.bf16 %v2979_v48, %v2976_v47  ;;  %v1123_v54 = vadd.f32 %v2254_v41, %v1121_v49  ;;  %v1125_v56 = vmul.f32 %v2976_v47, %v2891_v4  ;;  %v1126_v57 = vmul.f32 %v2979_v48, %v2891_v4 }
  0x27   :  { %v1124_v55 = vadd.f32 %v2255_v42, %v1122_v50  ;;  %vm880_vm7 = vcmp.gt.f32.partialorder %v878_v53, %v2891_v4  ;;  %v1384_v58 = vmul.f32 %v877_v52, %v2889_v3  ;;  %v1385_v59 = vmul.f32 %v878_v53, %v2889_v3 }
  0x28   :  { %2362 = vrot.lane.b32.xlu1 %v2346_v14, %s2841_s15  ;;  %2357 = vrot.lane.b32.xlu0 %v2346_v14, %s2842_s16  ;;  %v3000_v60 = vsel %vm879_vm6, 1.0, %v4762_v11  ;;  %v3003_v61 = vsel %vm880_vm7, 1.0, %v4762_v11  ;;  %v3005_v62 = vsub.f32 %v1123_v54, %v1125_v56  ;;  %vm127_vm1 = vcmp.lt.s32.totalorder %v3071_v19, 127  ;;  %v3139_v56 = vld [vmem:[%s4757_s2 + $0x40] sm:$0xff] }
  0x29   :  { %4799 = vst [vmem:[#allocation7_spill] sm:$0xff] %v3000_v60  ;;  %4800 = vst [vmem:[#allocation8_spill] sm:$0xff] %v3003_v61  ;;  %v3007_v63 = vsub.f32 %v1124_v55, %v1126_v57  ;;  %v1386_v0 = vadd.f32 %v2251_v29, %v1384_v58  ;;  %v1387_v1 = vadd.f32 %v2252_v30, %v1385_v59  ;;  %v3082_v29 = vld [vmem:[%s4757_s2 + $0x8] sm:$0xff]  ;;  %v3144_v58 = vld [vmem:[%s4757_s2 + $0x30] sm:$0xff]  ;;  %vm155_vm2 = vcmp.lt.s32.totalorder %v3071_v19, 112 }
  0x2a   :  { %4801 = vst [vmem:[#allocation9_spill] sm:$0xff] %v3005_v62  ;;  %v1388_v2 = vmul.f32 %v3000_v60, %v2891_v4  ;;  %v1389_v5 = vmul.f32 %v3003_v61, %v2891_v4  ;;  %v3017_v6 = vpack.i.bf16 %v3003_v61, %v3000_v60  ;;  %vm1129_vm8 = vcmp.gt.f32.partialorder %v3005_v62, %v2891_v4  ;;  %v3149_v59 = vld [vmem:[%s4757_s2 + $0x38] sm:$0xff] }
  0x2b   :  { %4802 = vst [vmem:[#allocation10_spill] sm:$0xff] %v3007_v63  ;;  %vm1130_vm9 = vcmp.gt.f32.partialorder %v3007_v63, %v2891_v4  ;;  %v3031_v9 = vsel %vm1129_vm8, 1.0, %v4762_v11  ;;  %vm169_vm3 = vcmp.lt.s32.totalorder %v3071_v19, 111 }
  0x2c   :  { %2373 = vrot.lane.b32.xlu1 %v2346_v14, %s2843_s17  ;;  %2367 = vrot.lane.b32.xlu0 %v2346_v14, %s2844_s18  ;;  %4803 = vst [vmem:[#allocation11_spill] sm:$0xff] %v3017_v6  ;;  %v3023_v7 = vsub.f32 %v1386_v0, %v1388_v2  ;;  %v3025_v8 = vsub.f32 %v1387_v1, %v1389_v5  ;;  %4806 = vst [vmem:[#allocation14_spill] sm:$0xff] %v3031_v9  ;;  %v3034_v10 = vsel %vm1130_vm9, 1.0, %v4762_v11 }
  0x2d   :  { %4807 = vst [vmem:[#allocation15_spill] sm:$0xff] %v3034_v10  ;;  %v3045_v14 = vpack.i.bf16 %v3034_v10, %v3031_v9 }
  0x2e   :  { %4804 = vst [vmem:[#allocation12_spill] sm:$0xff] %v3023_v7  ;;  %4805 = vst [vmem:[#allocation13_spill] sm:$0xff] %v3025_v8  ;;  %vm1392_vm10 = vcmp.gt.f32.partialorder %v3023_v7, %v2891_v4  ;;  %vm1393_vm11 = vcmp.gt.f32.partialorder %v3025_v8, %v2891_v4 }
  0x2f   :  { %4808 = vst [vmem:[#allocation16_spill] sm:$0xff] %v3045_v14  ;;  %v3048_v15 = vsel %vm1392_vm10, 1.0, %v4762_v11  ;;  %v3051_v16 = vsel %vm1393_vm11, 1.0, %v4762_v11 }
  0x30   :  { %196 = vperm.xlu1 %2377, %v45_v21   ;;  %189 = vperm.xlu0 %2371, %v38_v22   ;;  %4809 = vst [vmem:[#allocation17_spill] sm:$0xff] %v3048_v15  ;;  %4810 = vst [vmem:[#allocation18_spill] sm:$0xff] %v3051_v16  ;;  %v3058_v17 = vpack.i.bf16 %v3051_v16, %v3048_v15 }
  0x32   :  { %4811 = vst [vmem:[#allocation19_spill] sm:$0xff] %v3058_v17 }
  0x34   :  { %211 = vperm.xlu1 %2377, %v2229_v23   ;;  %228 = vperm.xlu0 %2371, %v2230_v24  }
  0x38   :  { %245 = vperm.xlu1 %2377, %v2231_v32   ;;  %2379 = vrot.lane.b32.xlu0 %v2378_v31, %s2838_s8  ;;  %v3091_v32 = vld [vmem:[%s4757_s2 + $0x48] sm:$0xff] }
  0x39   :  { %v120_v43 = vmul.f32 %v3091_v32, %v2901_v13 }
  0x3c   :  { %2384 = vrot.lane.b32.xlu1 %v2378_v31, %s2840_s14  ;;  %2394 = vrot.lane.b32.xlu0 %v2378_v31, %s2839_s13 }
  0x40   :  { %2389 = vrot.lane.b32.xlu1 %v2378_v31, %s2837_s7  ;;  %2404 = vrot.lane.b32.xlu0 %v2378_v31, %s2841_s15 }
  0x44   :  { %2399 = vrot.lane.b32.xlu1 %v2378_v31, %s2842_s16  ;;  %2414 = vrot.lane.b32.xlu0 %v2378_v31, %s2843_s17 }
  0x48   :  { %2409 = vrot.lane.b32.xlu1 %v2378_v31, %s2844_s18  ;;  %2429 = vrot.lane.b32.xlu0 %v2418_v51, %s2837_s7 }
  0x4c   :  { %2419 = vrot.lane.b32.xlu1 %v2418_v51, %s2838_s8  ;;  %2439 = vrot.lane.b32.xlu0 %v2418_v51, %s2842_s16 }
  0x50   :  { %2424 = vrot.lane.b32.xlu1 %v2418_v51, %s2840_s14  ;;  %2449 = vrot.lane.b32.xlu0 %v2418_v51, %s2844_s18 }
  0x54   :  { %2434 = vrot.lane.b32.xlu1 %v2418_v51, %s2839_s13  ;;  %2459 = vrot.lane.b32.xlu0 %v3017_v6, %s2838_s8 }
  0x58   :  { %2444 = vrot.lane.b32.xlu1 %v2418_v51, %s2841_s15  ;;  %2474 = vrot.lane.b32.xlu0 %v3017_v6, %s2839_s13 }
  0x5c   :  { %2454 = vrot.lane.b32.xlu1 %v2418_v51, %s2843_s17  ;;  %2484 = vrot.lane.b32.xlu0 %v3045_v14, %s2838_s8 }
  0x60   :  { %2464 = vrot.lane.b32.xlu1 %v3017_v6, %s2840_s14  ;;  %2494 = vrot.lane.b32.xlu0 %v3058_v17, %s2838_s8 }
  0x64   :  { %2469 = vrot.lane.b32.xlu1 %v3017_v6, %s2837_s7 }
  0x68   :  { %2479 = vrot.lane.b32.xlu1 %v3017_v6, %s2842_s16 }
  0x6c   :  { %2489 = vrot.lane.b32.xlu1 %v3045_v14, %s2840_s14 }
  0x92   :  { %v2348_v20 = vpop.permute.xlu1 %2347  ;;  %v2338_v21 = vpop.permute.xlu0 %2337 }
  0x93   :  { %v2340_v22 = vunpack.i.h.bf16 %v2338_v21  ;;  %v2339_v23 = vunpack.i.l.bf16 %v2338_v21  ;;  %v2350_v24 = vunpack.i.h.bf16 %v2348_v20  ;;  %v2349_v27 = vunpack.i.l.bf16 %v2348_v20 }
  0x95   :  { %v68_v30 = vsel %vm67_vm12, %v2339_v23, %v2340_v22  ;;  %v69_v31 = vsel %vm67_vm12, %v2340_v22, %v2339_v23  ;;  %v93_v46 = vsel %vm92_vm13, %v2349_v27, %v2350_v24  ;;  %v94_v49 = vsel %vm92_vm13, %v2350_v24, %v2349_v27  ;;  %v3156_v24 = vld [vmem:[%s4757_s2 + $0x50] sm:$0xff]  ;;  %v3161_v27 = vld [vmem:[%s4757_s2 + $0x58] sm:$0xff] }
  0x96   :  { %v2353_v33 = vpop.permute.xlu1 %2352  ;;  %v2343_v34 = vpop.permute.xlu0 %2342  ;;  %v72_v41 = vmul.f32 %v3077_v28, %v69_v31  ;;  %v73_v42 = vmul.f32 %v3082_v29, %v68_v30  ;;  %v98_v20 = vmul.f32 %v3115_v44, %v94_v49  ;;  %v99_v21 = vmul.f32 %v3120_v45, %v93_v46 }
  0x97   :  { %v2355_v35 = vunpack.i.h.bf16 %v2353_v33  ;;  %v2354_v36 = vunpack.i.l.bf16 %v2353_v33  ;;  %v2345_v39 = vunpack.i.h.bf16 %v2343_v34  ;;  %v2344_v40 = vunpack.i.l.bf16 %v2343_v34 }
  0x98   :  { %v119_v30 = vmul.f32 %v3139_v56, %v2898_v12 }
  0x99   :  { %v79_v13 = vsel %vm78_vm15, %v2344_v40, %v2345_v39  ;;  %v80_v50 = vsel %vm78_vm15, %v2345_v39, %v2344_v40  ;;  %v107_v51 = vsel %vm106_vm14, %v2354_v36, %v2355_v35  ;;  %v108_v52 = vsel %vm106_vm14, %v2355_v35, %v2354_v36 }
  0x9a   :  { %v84_v53 = vmul.f32 %v3100_v37, %v80_v50  ;;  %v85_v54 = vmul.f32 %v3105_v38, %v79_v13  ;;  %v2363_v55 = vpop.permute.xlu1 %2362  ;;  %v2358_v57 = vpop.permute.xlu0 %2357  ;;  %v112_v34 = vmul.f32 %v3144_v58, %v108_v52  ;;  %v113_v35 = vmul.f32 %v3149_v59, %v107_v51  ;;  %v3181_v13 = vld [vmem:[%s4757_s2 + $0x60] sm:$0xff]  ;;  %v3186_v50 = vld [vmem:[%s4757_s2 + $0x68] sm:$0xff] }
  0x9b   :  { %v2365_v0 = vunpack.i.h.bf16 %v2363_v55  ;;  %v2364_v1 = vunpack.i.l.bf16 %v2363_v55  ;;  %v2360_v2 = vunpack.i.h.bf16 %v2358_v57  ;;  %v2359_v5 = vunpack.i.l.bf16 %v2358_v57 }
  0x9c   :  { %v86_v22 = vadd.f32 %v84_v53, %v72_v41  ;;  %v87_v23 = vadd.f32 %v85_v54, %v73_v42 }
  0x9d   :  { %v128_v31 = vsel %vm127_vm1, %v2359_v5, %v2360_v2  ;;  %v129_v33 = vsel %vm127_vm1, %v2360_v2, %v2359_v5  ;;  %v142_v42 = vsel %vm141_vm0, %v2364_v1, %v2365_v0  ;;  %v143_v12 = vsel %vm141_vm0, %v2365_v0, %v2364_v1  ;;  %v3191_v0 = vld [vmem:[%s4757_s2 + $0x70] sm:$0xff]  ;;  %v3196_v1 = vld [vmem:[%s4757_s2 + $0x78] sm:$0xff] }
  0x9e   :  { %v100_v36 = vadd.f32 %v98_v20, %v86_v22  ;;  %v101_v39 = vadd.f32 %v99_v21, %v87_v23  ;;  %v2374_v40 = vpop.permute.xlu1 %2373  ;;  %v2368_v41 = vpop.permute.xlu0 %2367  ;;  %v133_v46 = vmul.f32 %v3156_v24, %v128_v31  ;;  %v134_v49 = vmul.f32 %v3161_v27, %v129_v33 }
  0x9f   :  { %v2370_v53 = vunpack.i.h.bf16 %v2368_v41  ;;  %v2369_v54 = vunpack.i.l.bf16 %v2368_v41  ;;  %v2376_v55 = vunpack.i.h.bf16 %v2374_v40  ;;  %v2375_v57 = vunpack.i.l.bf16 %v2374_v40 }
  0xa0   :  { %v114_v51 = vadd.f32 %v112_v34, %v100_v36  ;;  %v115_v52 = vadd.f32 %v113_v35, %v101_v39  ;;  %v147_v20 = vmul.f32 %v3181_v13, %v142_v42  ;;  %v148_v21 = vmul.f32 %v3186_v50, %v143_v12 }
  0xa1   :  { %v156_v22 = vsel %vm155_vm2, %v2369_v54, %v2370_v53  ;;  %v157_v23 = vsel %vm155_vm2, %v2370_v53, %v2369_v54  ;;  %v170_v36 = vsel %vm169_vm3, %v2375_v57, %v2376_v55  ;;  %v171_v39 = vsel %vm169_vm3, %v2376_v55, %v2375_v57 }
  0xa2   :  { %v121_v2 = vadd.f32 %v119_v30, %v114_v51  ;;  %v122_v5 = vadd.f32 %v120_v43, %v115_v52  ;;  %v161_v34 = vmul.f32 %v3191_v0, %v156_v22  ;;  %v162_v35 = vmul.f32 %v3196_v1, %v157_v23  ;;  %v3210_v43 = vld [vmem:[%s4757_s2 + $0x80] sm:$0xff]  ;;  %v3215_v30 = vld [vmem:[%s4757_s2 + $0x88] sm:$0xff] }
  0xa3   :  { %v180_v40 = vshrl.u32 %v65_v18, 7  ;;  %v175_v12 = vmul.f32 %v3210_v43, %v170_v36  ;;  %v3246_v22 = vmul.f32 %v3139_v56, %v2934_v25  ;;  %v3250_v23 = vmul.f32 %v3091_v32, %v2937_v26 }
  0xa4   :  { %v135_v31 = vadd.f32 %v133_v46, %v121_v2  ;;  %v136_v33 = vadd.f32 %v134_v49, %v122_v5  ;;  %v176_v46 = vmul.f32 %v3215_v30, %v171_v39  ;;  %v3262_v36 = vmul.f32 %v3091_v32, %v2979_v48 }
  0xa5   :  { %v3224_v52 = vsub.s32 4, %v180_v40  ;;  %v3230_v2 = vsub.s32 0, %v180_v40  ;;  %v3232_v5 = vsub.s32 1, %v180_v40  ;;  %v3234_v55 = vsub.s32 5, %v180_v40 }
  0xa6   :  { %v149_v41 = vadd.f32 %v147_v20, %v135_v31  ;;  %v150_v42 = vadd.f32 %v148_v21, %v136_v33  ;;  %v3236_v18 = vsub.s32 6, %v180_v40  ;;  %v3238_v57 = vsub.s32 7, %v180_v40 }
  0xa7   :  { %v3240_v20 = vsub.s32 2, %v180_v40  ;;  %v3242_v21 = vsub.s32 3, %v180_v40  ;;  %v3266_v25 = vmul.f32 %v3139_v56, %v2976_v47 }
  0xa8   :  { %v163_v49 = vadd.f32 %v161_v34, %v149_v41  ;;  %v164_v51 = vadd.f32 %v162_v35, %v150_v42 }
  0xaa   :  { %v3226_v53 = vadd.f32 %v175_v12, %v163_v49  ;;  %v3228_v54 = vadd.f32 %v176_v46, %v164_v51 }
  0xac   :  { %v267_v31 = vrot.slane %v3226_v53, %v3224_v52  ;;  %v271_v33 = vrot.slane %v3228_v54, %v3224_v52  ;;  %v182_v26 = vrot.slane %v3226_v53, %v3230_v2  ;;  %v186_v39 = vrot.slane %v3228_v54, %v3230_v2 }
  0xad   :  { %v279_v42 = vrot.slane %v3226_v53, %v3234_v55  ;;  %v283_v48 = vrot.slane %v3228_v54, %v3234_v55  ;;  %v291_v47 = vrot.slane %v3226_v53, %v3236_v18  ;;  %v295_v32 = vrot.slane %v3228_v54, %v3236_v18 }
  0xae   :  { %v303_v46 = vrot.slane %v3226_v53, %v3238_v57  ;;  %v307_v49 = vrot.slane %v3228_v54, %v3238_v57  ;;  %v204_v51 = vrot.slane %v3226_v53, %v3232_v5  ;;  %v238_v61 = vrot.slane %v3226_v53, %v3242_v21 }
  0xaf   :  { %v3256_v34 = vpop.permute.xlu1 %196  ;;  %v3258_v35 = vpop.permute.xlu0 %189  ;;  %v242_v60 = vrot.slane %v3228_v54, %v3242_v21 }
  0xb0   :  { %v272_v40 = vmul.f32 %v267_v31, %v3258_v35  ;;  %v273_v41 = vmul.f32 %v271_v33, %v3258_v35  ;;  %v192_v56 = vmul.f32 %v3258_v35, %v182_v26  ;;  %v193_v12 = vmul.f32 %v3258_v35, %v186_v39 }
  0xb1   :  { %v208_v31 = vrot.slane %v3228_v54, %v3232_v5  ;;  %v221_v26 = vrot.slane %v3226_v53, %v3240_v20  ;;  %v225_v39 = vrot.slane %v3228_v54, %v3240_v20 }
  0xb2   :  { %v274_v6 = vadd.f32 %v272_v40, %v3256_v34  ;;  %v275_v14 = vadd.f32 %v273_v41, %v3256_v34  ;;  %v199_v15 = vadd.f32 %v3256_v34, %v192_v56  ;;  %v200_v8 = vadd.f32 %v3256_v34, %v193_v12 }
  0xb3   :  { %v3292_v33 = vpop.permute.xlu1 %211  ;;  %v3294_v11 = vpop.permute.xlu0 %228 }
  0xb4   :  { %v284_v17 = vmul.f32 %v279_v42, %v3292_v33  ;;  %v285_v16 = vmul.f32 %v283_v48, %v3292_v33  ;;  %v214_v7 = vmul.f32 %v3292_v33, %v204_v51  ;;  %v215_v10 = vmul.f32 %v3292_v33, %v208_v31 }
  0xb5   :  { %v296_v54 = vmul.f32 %v291_v47, %v3294_v11  ;;  %v297_v40 = vmul.f32 %v295_v32, %v3294_v11  ;;  %v231_v48 = vmul.f32 %v3294_v11, %v221_v26  ;;  %v232_v56 = vmul.f32 %v3294_v11, %v225_v39 }
  0xb6   :  { %v286_v53 = vadd.f32 %v284_v17, %v274_v6  ;;  %v287_v9 = vadd.f32 %v285_v16, %v275_v14  ;;  %v216_v42 = vadd.f32 %v214_v7, %v199_v15  ;;  %v217_v63 = vadd.f32 %v215_v10, %v200_v8 }
  0xb7   :  { %v3314_v4 = vpop.permute.xlu1 %245  ;;  %v2380_v41 = vpop.permute.xlu0 %2379 }
  0xb8   :  { %v2382_v12 = vunpack.i.h.bf16 %v2380_v41  ;;  %v2381_v62 = vunpack.i.l.bf16 %v2380_v41  ;;  %v298_v51 = vadd.f32 %v296_v54, %v286_v53  ;;  %v299_v3 = vadd.f32 %v297_v40, %v287_v9 }
  0xb9   :  { %v308_v6 = vmul.f32 %v303_v46, %v3314_v4  ;;  %v309_v14 = vmul.f32 %v307_v49, %v3314_v4  ;;  %v233_v16 = vadd.f32 %v231_v48, %v216_v42  ;;  %v234_v17 = vadd.f32 %v232_v56, %v217_v63 }
  0xba   :  { %v377_v47 = vsel %vm67_vm12, %v2381_v62, %v2382_v12  ;;  %v378_v7 = vsel %vm67_vm12, %v2382_v12, %v2381_v62  ;;  %v248_v8 = vmul.f32 %v3314_v4, %v238_v61  ;;  %v249_v10 = vmul.f32 %v3314_v4, %v242_v60 }
  0xbb   :  { %v2385_v15 = vpop.permute.xlu1 %2384  ;;  %v379_v32 = vmul.f32 %v378_v7, %v3077_v28  ;;  %v380_v9 = vmul.f32 %v377_v47, %v3082_v29  ;;  %v2395_v46 = vpop.permute.xlu0 %2394  ;;  %v3328_v31 = vadd.f32 %v308_v6, %v298_v51  ;;  %v3330_v49 = vadd.f32 %v309_v14, %v299_v3 }
  0xbc   :  { %v2387_v63 = vunpack.i.h.bf16 %v2385_v15  ;;  %v2386_v26 = vunpack.i.l.bf16 %v2385_v15  ;;  %v2397_v39 = vunpack.i.h.bf16 %v2395_v46  ;;  %v2396_v53 = vunpack.i.l.bf16 %v2395_v46 }
  0xbd   :  { %v312_v62 = vsub.f32 0.0, %v3328_v31  ;;  %v313_v61 = vsub.f32 0.0, %v3330_v49  ;;  %v3334_v54 = vadd.f32 %v248_v8, %v233_v16  ;;  %v3336_v60 = vadd.f32 %v249_v10, %v234_v17 }
  0xbe   :  { %v385_v40 = vsel %vm78_vm15, %v2386_v26, %v2387_v63  ;;  %v386_v41 = vsel %vm78_vm15, %v2387_v63, %v2386_v26  ;;  %v405_v3 = vsel %vm106_vm14, %v2396_v53, %v2397_v39  ;;  %v406_v42 = vsel %vm106_vm14, %v2397_v39, %v2396_v53 }
  0xbf   :  { %v387_v48 = vmul.f32 %v3100_v37, %v386_v41  ;;  %v388_v56 = vmul.f32 %v3105_v38, %v385_v40  ;;  %v2390_v12 = vpop.permute.xlu1 %2389  ;;  %v407_v51 = vmul.f32 %v3144_v58, %v406_v42  ;;  %v408_v6 = vmul.f32 %v3149_v59, %v405_v3  ;;  %v2405_v14 = vpop.permute.xlu0 %2404 }
  0xc0   :  { %v2392_v16 = vunpack.i.h.bf16 %v2390_v12  ;;  %v2391_v17 = vunpack.i.l.bf16 %v2390_v12  ;;  %v2407_v47 = vunpack.i.h.bf16 %v2405_v14  ;;  %v2406_v7 = vunpack.i.l.bf16 %v2405_v14 }
  0xc1   :  { %v389_v8 = vadd.f32 %v387_v48, %v379_v32  ;;  %v390_v10 = vadd.f32 %v388_v56, %v380_v9  ;;  %v314_v15 = vmul.f32 1.442695, %v312_v62  ;;  %v316_v46 = vmul.f32 1.442695, %v313_v61 }
  0xc2   :  { %v395_v63 = vsel %vm92_vm13, %v2391_v17, %v2392_v16  ;;  %v396_v26 = vsel %vm92_vm13, %v2392_v16, %v2391_v17  ;;  %v429_v39 = vsel %vm141_vm0, %v2406_v7, %v2407_v47  ;;  %v430_v53 = vsel %vm141_vm0, %v2407_v47, %v2406_v7 }
  0xc3   :  { %v397_v40 = vmul.f32 %v3115_v44, %v396_v26  ;;  %v398_v41 = vmul.f32 %v3120_v45, %v395_v63  ;;  %v2400_v32 = vpop.permute.xlu1 %2399  ;;  %v431_v9 = vmul.f32 %v3181_v13, %v429_v39  ;;  %v432_v62 = vmul.f32 %v3186_v50, %v430_v53  ;;  %v2415_v61 = vpop.permute.xlu0 %2414 }
  0xc4   :  { %v2402_v3 = vunpack.i.h.bf16 %v2400_v32  ;;  %v2401_v42 = vunpack.i.l.bf16 %v2400_v32  ;;  %v2417_v48 = vunpack.i.h.bf16 %v2415_v61  ;;  %v2416_v56 = vunpack.i.l.bf16 %v2415_v61 }
  0xc5   :  { %v399_v12 = vadd.f32 %v397_v40, %v389_v8  ;;  %v400_v14 = vadd.f32 %v398_v41, %v390_v10  ;;  %2658 = vpow2.f32 %v314_v15 }
  0xc6   :  { %v419_v17 = vsel %vm127_vm1, %v2401_v42, %v2402_v3  ;;  %v420_v47 = vsel %vm127_vm1, %v2402_v3, %v2401_v42  ;;  %v449_v7 = vsel %vm169_vm3, %v2416_v56, %v2417_v48  ;;  %v450_v63 = vsel %vm169_vm3, %v2417_v48, %v2416_v56 }
  0xc7   :  { %v409_v26 = vadd.f32 %v407_v51, %v399_v12  ;;  %v410_v39 = vadd.f32 %v408_v6, %v400_v14  ;;  %v421_v8 = vmul.f32 %v3156_v24, %v419_v17  ;;  %v422_v10 = vmul.f32 %v3161_v27, %v420_v47  ;;  %v2410_v15 = vpop.permute.xlu1 %2409  ;;  %v2430_v53 = vpop.permute.xlu0 %2429 }
  0xc8   :  { %v2412_v40 = vunpack.i.h.bf16 %v2410_v15  ;;  %v2411_v41 = vunpack.i.l.bf16 %v2410_v15  ;;  %v451_v32 = vmul.f32 %v3210_v43, %v449_v7  ;;  %v452_v61 = vmul.f32 %v3215_v30, %v450_v63 }
  0xc9   :  { %v413_v3 = vadd.f32 %v3246_v22, %v409_v26  ;;  %v414_v42 = vadd.f32 %v3250_v23, %v410_v39  ;;  %v2432_v16 = vunpack.i.h.bf16 %v2430_v53  ;;  %v2431_v48 = vunpack.i.l.bf16 %v2430_v53 }
  0xca   :  { %v439_v51 = vsel %vm155_vm2, %v2411_v41, %v2412_v40  ;;  %v440_v6 = vsel %vm155_vm2, %v2412_v40, %v2411_v41  ;;  %2660 = vpow2.f32 %v316_v46  ;;  %v253_v56 = vsub.f32 0.0, %v3336_v60 }
  0xcb   :  { %v423_v12 = vadd.f32 %v421_v8, %v413_v3  ;;  %v424_v14 = vadd.f32 %v422_v10, %v414_v42  ;;  %v441_v17 = vmul.f32 %v3191_v0, %v439_v51  ;;  %v442_v47 = vmul.f32 %v3196_v1, %v440_v6  ;;  %v2420_v22 = vpop.permute.xlu1 %2419  ;;  %v2440_v7 = vpop.permute.xlu0 %2439 }
  0xcc   :  { %v2422_v23 = vunpack.i.h.bf16 %v2420_v22  ;;  %v2421_v63 = vunpack.i.l.bf16 %v2420_v22  ;;  %v650_v26 = vsel %vm92_vm13, %v2431_v48, %v2432_v16  ;;  %v651_v39 = vsel %vm92_vm13, %v2432_v16, %v2431_v48 }
  0xcd   :  { %v433_v15 = vadd.f32 %v431_v9, %v423_v12  ;;  %v434_v46 = vadd.f32 %v432_v62, %v424_v14  ;;  %v652_v53 = vmul.f32 %v3115_v44, %v651_v39  ;;  %v653_v8 = vmul.f32 %v3120_v45, %v650_v26 }
  0xce   :  { %v632_v10 = vsel %vm67_vm12, %v2421_v63, %v2422_v23  ;;  %v633_v40 = vsel %vm67_vm12, %v2422_v23, %v2421_v63  ;;  %v2442_v41 = vunpack.i.h.bf16 %v2440_v7  ;;  %v2441_v3 = vunpack.i.l.bf16 %v2440_v7 }
  0xcf   :  { %v2659_v42 = vpop.eup %2658  ;;  %v443_v51 = vadd.f32 %v441_v17, %v433_v15  ;;  %v444_v6 = vadd.f32 %v442_v47, %v434_v46  ;;  %v634_v22 = vmul.f32 %v633_v40, %v3077_v28  ;;  %v635_v9 = vmul.f32 %v632_v10, %v3082_v29  ;;  %v2425_v62 = vpop.permute.xlu1 %2424 }
  0xd0   :  { %v2450_v16 = vpop.permute.xlu0 %2449  ;;  %v2427_v48 = vunpack.i.h.bf16 %v2425_v62  ;;  %v2426_v12 = vunpack.i.l.bf16 %v2425_v62  ;;  %v674_v14 = vsel %vm127_vm1, %v2441_v3, %v2442_v41  ;;  %v675_v26 = vsel %vm127_vm1, %v2442_v41, %v2441_v3 }
  0xd1   :  { %v3400_v23 = vadd.f32 %v451_v32, %v443_v51  ;;  %v3402_v7 = vadd.f32 %v452_v61, %v444_v6  ;;  %v676_v17 = vmul.f32 %v3156_v24, %v674_v14  ;;  %v677_v47 = vmul.f32 %v3161_v27, %v675_v26 }
  0xd2   :  { %v640_v63 = vsel %vm78_vm15, %v2426_v12, %v2427_v48  ;;  %v641_v39 = vsel %vm78_vm15, %v2427_v48, %v2426_v12  ;;  %v2452_v15 = vunpack.i.h.bf16 %v2450_v16  ;;  %v2451_v46 = vunpack.i.l.bf16 %v2450_v16 }
  0xd3   :  { %v642_v10 = vmul.f32 %v3100_v37, %v641_v39  ;;  %v643_v40 = vmul.f32 %v3105_v38, %v640_v63  ;;  %v2435_v32 = vpop.permute.xlu1 %2434  ;;  %v318_v41 = vadd.f32 1.0, %v2659_v42  ;;  %v4812_v61 = vsub.f32 0.0, %v3334_v54 }
  0xd4   :  { %v2661_v24 = vpop.eup %2660  ;;  %v2437_v51 = vunpack.i.h.bf16 %v2435_v32  ;;  %v2436_v27 = vunpack.i.l.bf16 %v2435_v32  ;;  %v694_v6 = vsel %vm155_vm2, %v2451_v46, %v2452_v15  ;;  %v695_v62 = vsel %vm155_vm2, %v2452_v15, %v2451_v46 }
  0xd5   :  { %v254_v3 = vmul.f32 1.442695, %v4812_v61  ;;  %v644_v48 = vadd.f32 %v642_v10, %v634_v22  ;;  %v645_v16 = vadd.f32 %v643_v40, %v635_v9  ;;  %v696_v12 = vmul.f32 %v3191_v0, %v694_v6 }
  0xd6   :  { %v697_v14 = vmul.f32 %v3196_v1, %v695_v62  ;;  %v660_v42 = vsel %vm106_vm14, %v2436_v27, %v2437_v51  ;;  %v661_v26 = vsel %vm106_vm14, %v2437_v51, %v2436_v27  ;;  %v319_v63 = vadd.f32 1.0, %v2661_v24 }
  0xd7   :  { %2662 = vrcp.f32 %v318_v41  ;;  %v654_v39 = vadd.f32 %v652_v53, %v644_v48  ;;  %v655_v32 = vadd.f32 %v653_v8, %v645_v16  ;;  %v662_v61 = vmul.f32 %v3144_v58, %v661_v26  ;;  %v2445_v22 = vpop.permute.xlu1 %2444 }
  0xd8   :  { %v663_v15 = vmul.f32 %v3149_v59, %v660_v42  ;;  %v2447_v9 = vunpack.i.h.bf16 %v2445_v22  ;;  %v2446_v46 = vunpack.i.l.bf16 %v2445_v22  ;;  %2664 = vrcp.f32 %v319_v63 }
  0xd9   :  { %v256_v0 = vmul.f32 1.442695, %v253_v56  ;;  %v664_v1 = vadd.f32 %v662_v61, %v654_v39  ;;  %2666 = vpow2.f32 %v254_v3  ;;  %v458_v40 = vrot.slane %v3400_v23, %v3230_v2 }
  0xda   :  { %v665_v10 = vadd.f32 %v663_v15, %v655_v32  ;;  %v684_v53 = vsel %vm141_vm0, %v2446_v46, %v2447_v9  ;;  %v685_v8 = vsel %vm141_vm0, %v2447_v9, %v2446_v46  ;;  %v462_v41 = vrot.slane %v3402_v7, %v3230_v2 }
  0xdb   :  { %2668 = vpow2.f32 %v256_v0  ;;  %v668_v24 = vadd.f32 %v3266_v25, %v664_v1  ;;  %v686_v51 = vmul.f32 %v3181_v13, %v684_v53  ;;  %v687_v3 = vmul.f32 %v3186_v50, %v685_v8  ;;  %v2455_v27 = vpop.permute.xlu1 %2454 }
  0xdc   :  { %v669_v56 = vadd.f32 %v3262_v36, %v665_v10  ;;  %v2457_v6 = vunpack.i.h.bf16 %v2455_v27  ;;  %v2456_v62 = vunpack.i.l.bf16 %v2455_v27  ;;  %v463_v48 = vmul.f32 %v458_v40, %v3258_v35 }
  0xdd   :  { %v464_v16 = vmul.f32 %v462_v41, %v3258_v35  ;;  %v678_v42 = vadd.f32 %v676_v17, %v668_v24  ;;  %v470_v63 = vrot.slane %v3400_v23, %v3232_v5  ;;  %v474_v25 = vrot.slane %v3402_v7, %v3232_v5 }
  0xde   :  { %v679_v26 = vadd.f32 %v677_v47, %v669_v56  ;;  %v704_v13 = vsel %vm169_vm3, %v2456_v62, %v2457_v6  ;;  %v705_v50 = vsel %vm169_vm3, %v2457_v6, %v2456_v62  ;;  %v465_v36 = vadd.f32 %v463_v48, %v3256_v34 }
  0xdf   :  { %v466_v39 = vadd.f32 %v464_v16, %v3256_v34  ;;  %v688_v32 = vadd.f32 %v686_v51, %v678_v42  ;;  %v706_v17 = vmul.f32 %v3210_v43, %v704_v13  ;;  %v707_v47 = vmul.f32 %v3215_v30, %v705_v50 }
  0xe0   :  { %v689_v61 = vadd.f32 %v687_v3, %v679_v26  ;;  %v475_v22 = vmul.f32 %v470_v63, %v3292_v33  ;;  %v476_v9 = vmul.f32 %v474_v25, %v3292_v33  ;;  %v482_v46 = vrot.slane %v3400_v23, %v3240_v20 }
  0xe1   :  { %v2663_v15 = vpop.eup %2662  ;;  %v486_v0 = vrot.slane %v3402_v7, %v3240_v20  ;;  %v698_v1 = vadd.f32 %v696_v12, %v688_v32  ;;  %v494_v43 = vrot.slane %v3400_v23, %v3242_v21  ;;  %v518_v26 = vrot.slane %v3400_v23, %v3224_v52 }
  0xe2   :  { %v699_v10 = vadd.f32 %v697_v14, %v689_v61  ;;  %v3461_v40 = vmul.f32 %v2663_v15, %v3328_v31  ;;  %v2665_v30 = vpop.eup %2664  ;;  %v477_v53 = vadd.f32 %v475_v22, %v465_v36  ;;  %v478_v8 = vadd.f32 %v476_v9, %v466_v39 }
  0xe3   :  { %v487_v41 = vmul.f32 %v482_v46, %v3294_v11  ;;  %v488_v24 = vmul.f32 %v486_v0, %v3294_v11  ;;  %v2667_v56 = vpop.eup %2666  ;;  %v3468_v51 = vmul.f32 %v2665_v30, %v3330_v49  ;;  %v3470_v3 = vadd.f32 %v706_v17, %v698_v1 }
  0xe4   :  { %4813 = vst [vmem:[#allocation20_spill] sm:$0xff] %v3461_v40  ;;  %v3472_v12 = vadd.f32 %v707_v47, %v699_v10  ;;  %v498_v31 = vrot.slane %v3402_v7, %v3242_v21  ;;  %v258_v27 = vadd.f32 1.0, %v2667_v56  ;;  %v499_v48 = vmul.f32 %v494_v43, %v3314_v4 }
  0xe5   :  { %4814 = vst [vmem:[#allocation21_spill] sm:$0xff] %v3468_v51  ;;  %v2669_v14 = vpop.eup %2668  ;;  %v489_v6 = vadd.f32 %v487_v41, %v477_v53  ;;  %v490_v62 = vadd.f32 %v488_v24, %v478_v8  ;;  %v327_v16 = vadd.f32 %v3468_v51, %v3461_v40  ;;  %v522_v25 = vrot.slane %v3402_v7, %v3224_v52 }
  0xe6   :  { %v259_v42 = vadd.f32 1.0, %v2669_v14  ;;  %v500_v49 = vmul.f32 %v498_v31, %v3314_v4  ;;  %2670 = vrcp.f32 %v258_v27  ;;  %v530_v13 = vrot.slane %v3400_v23, %v3234_v55 }
  0xe7   :  { %v3482_v63 = vadd.f32 %v499_v48, %v489_v6  ;;  %328 = vadd.xlane.f32.xlu1 %v327_v16  ;;  %v523_v36 = vmul.f32 %v518_v26, %v3258_v35  ;;  %v534_v39 = vrot.slane %v3402_v7, %v3234_v55  ;;  %v524_v61 = vmul.f32 %v522_v25, %v3258_v35 }
  0xe8   :  { %2672 = vrcp.f32 %v259_v42  ;;  %v3488_v50 = vadd.f32 %v500_v49, %v490_v62  ;;  %v535_v17 = vmul.f32 %v530_v13, %v3292_v33  ;;  %v542_v47 = vrot.slane %v3400_v23, %v3236_v18 }
  0xe9   :  { %v503_v32 = vsub.f32 0.0, %v3482_v63  ;;  %v525_v22 = vadd.f32 %v523_v36, %v3256_v34  ;;  %v536_v9 = vmul.f32 %v534_v39, %v3292_v33  ;;  %v546_v46 = vrot.slane %v3402_v7, %v3236_v18 }
  0xea   :  { %v504_v15 = vsub.f32 0.0, %v3488_v50  ;;  %v526_v1 = vadd.f32 %v524_v61, %v3256_v34  ;;  %v547_v10 = vmul.f32 %v542_v47, %v3294_v11  ;;  %v554_v43 = vrot.slane %v3400_v23, %v3238_v57 }
  0xeb   :  { %v505_v0 = vmul.f32 1.442695, %v503_v32  ;;  %v537_v53 = vadd.f32 %v535_v17, %v525_v22  ;;  %v548_v8 = vmul.f32 %v546_v46, %v3294_v11  ;;  %v558_v41 = vrot.slane %v3402_v7, %v3238_v57 }
  0xec   :  { %v507_v30 = vmul.f32 1.442695, %v504_v15  ;;  %v538_v24 = vadd.f32 %v536_v9, %v526_v1  ;;  %v559_v56 = vmul.f32 %v554_v43, %v3314_v4  ;;  %v773_v31 = vrot.slane %v3470_v3, %v3224_v52 }
  0xed   :  { %2674 = vpow2.f32 %v505_v0  ;;  %v549_v14 = vadd.f32 %v547_v10, %v537_v53  ;;  %v560_v27 = vmul.f32 %v558_v41, %v3314_v4  ;;  %v777_v23 = vrot.slane %v3472_v12, %v3224_v52 }
  0xee   :  { %2676 = vpow2.f32 %v507_v30  ;;  %v550_v6 = vadd.f32 %v548_v8, %v538_v24  ;;  %v778_v62 = vmul.f32 %v773_v31, %v3258_v35  ;;  %v785_v7 = vrot.slane %v3470_v3, %v3234_v55 }
  0xef   :  { %v789_v48 = vrot.slane %v3472_v12, %v3234_v55  ;;  %v3521_v16 = vadd.f32 %v559_v56, %v549_v14  ;;  %v779_v42 = vmul.f32 %v777_v23, %v3258_v35  ;;  %v797_v49 = vrot.slane %v3470_v3, %v3236_v18 }
  0xf0   :  { %v801_v26 = vrot.slane %v3472_v12, %v3236_v18  ;;  %v2671_v25 = vpop.eup %2670  ;;  %v3528_v13 = vadd.f32 %v560_v27, %v550_v6  ;;  %v780_v36 = vadd.f32 %v778_v62, %v3256_v34  ;;  %v790_v39 = vmul.f32 %v785_v7, %v3292_v33 }
  0xf1   :  { %v791_v32 = vmul.f32 %v789_v48, %v3292_v33  ;;  %v3534_v17 = vmul.f32 %v2671_v25, %v3334_v54  ;;  %v563_v47 = vsub.f32 0.0, %v3521_v16  ;;  %v781_v15 = vadd.f32 %v779_v42, %v3256_v34 }
  0xf2   :  { %v2673_v61 = vpop.eup %2672  ;;  %v802_v22 = vmul.f32 %v797_v49, %v3294_v11  ;;  %v564_v46 = vsub.f32 0.0, %v3528_v13  ;;  %v792_v0 = vadd.f32 %v790_v39, %v780_v36  ;;  %v803_v1 = vmul.f32 %v801_v26, %v3294_v11 }
  0xf3   :  { %v3540_v9 = vmul.f32 %v2673_v61, %v3336_v60  ;;  %v565_v10 = vmul.f32 1.442695, %v563_v47  ;;  %v793_v43 = vadd.f32 %v791_v32, %v781_v15  ;;  %v809_v54 = vrot.slane %v3470_v3, %v3238_v57 }
  0xf4   :  { %v813_v30 = vrot.slane %v3472_v12, %v3238_v57  ;;  %v567_v8 = vmul.f32 1.442695, %v564_v46  ;;  %v804_v41 = vadd.f32 %v802_v22, %v792_v0  ;;  %v713_v60 = vrot.slane %v3470_v3, %v3230_v2 }
  0xf5   :  { %4815 = vst [vmem:[#allocation22_spill] sm:$0xff] %v3540_v9  ;;  %v324_v53 = vadd.f32 %v3540_v9, %v3534_v17  ;;  %2678 = vpow2.f32 %v565_v10  ;;  %v805_v24 = vadd.f32 %v803_v1, %v793_v43  ;;  %v814_v56 = vmul.f32 %v809_v54, %v3314_v4 }
  0xf6   :  { %v815_v31 = vmul.f32 %v813_v30, %v3314_v4  ;;  %2680 = vpow2.f32 %v567_v8  ;;  %v717_v27 = vrot.slane %v3472_v12, %v3230_v2  ;;  %v718_v23 = vmul.f32 %v713_v60, %v3258_v35 }
  0xf7   :  { %v2675_v14 = vpop.eup %2674  ;;  %325 = vadd.xlane.f32.xlu0 %v324_v53  ;;  %v725_v6 = vrot.slane %v3470_v3, %v3232_v5  ;;  %v3559_v48 = vadd.f32 %v814_v56, %v804_v41  ;;  %v729_v49 = vrot.slane %v3472_v12, %v3232_v5  ;;  %v737_v46 = vrot.slane %v3470_v3, %v3240_v20 }
  0xf8   :  { %v2677_v62 = vpop.eup %2676  ;;  %v509_v7 = vadd.f32 1.0, %v2675_v14  ;;  %v3561_v42 = vadd.f32 %v815_v31, %v805_v24  ;;  %v719_v25 = vmul.f32 %v717_v27, %v3258_v35  ;;  %v720_v36 = vadd.f32 %v718_v23, %v3256_v34  ;;  %v2465_v24 = vpop.permute.xlu1 %2464 }
  0xf9   :  { %v510_v26 = vadd.f32 1.0, %v2677_v62  ;;  %v730_v39 = vmul.f32 %v725_v6, %v3292_v33  ;;  %v818_v32 = vsub.f32 0.0, %v3559_v48  ;;  %v731_v47 = vmul.f32 %v729_v49, %v3292_v33  ;;  %v2460_v27 = vpop.permute.xlu0 %2459 }
  0xfa   :  { %2682 = vrcp.f32 %v509_v7  ;;  %v819_v61 = vsub.f32 0.0, %v3561_v42  ;;  %v721_v15 = vadd.f32 %v719_v25, %v3256_v34  ;;  %v741_v10 = vrot.slane %v3472_v12, %v3240_v20 }
  0xfb   :  { %2684 = vrcp.f32 %v510_v26  ;;  %v732_v22 = vadd.f32 %v730_v39, %v720_v36  ;;  %v820_v0 = vmul.f32 1.442695, %v818_v32  ;;  %v749_v43 = vrot.slane %v3470_v3, %v3242_v21 }
  0xfc   :  { %v822_v1 = vmul.f32 1.442695, %v819_v61  ;;  %v733_v54 = vadd.f32 %v731_v47, %v721_v15  ;;  %v742_v30 = vmul.f32 %v737_v46, %v3294_v11  ;;  %v753_v53 = vrot.slane %v3472_v12, %v3242_v21  ;;  %v2470_v15 = vpop.permute.xlu1 %2469 }
  0xfd   :  { %2686 = vpow2.f32 %v820_v0  ;;  %v743_v8 = vmul.f32 %v741_v10, %v3294_v11  ;;  %v754_v60 = vmul.f32 %v749_v43, %v3314_v4  ;;  %v2467_v62 = vunpack.i.h.bf16 %v2465_v24  ;;  %v2475_v10 = vpop.permute.xlu0 %2474 }
  0xfe   :  { %2688 = vpow2.f32 %v822_v1  ;;  %v744_v41 = vadd.f32 %v742_v30, %v732_v22  ;;  %v755_v14 = vmul.f32 %v753_v53, %v3314_v4  ;;  %v2466_v49 = vunpack.i.l.bf16 %v2465_v24 }
  0xff   :  { %v2679_v56 = vpop.eup %2678  ;;  %v745_v31 = vadd.f32 %v743_v8, %v733_v54  ;;  %v2462_v1 = vunpack.i.h.bf16 %v2460_v27  ;;  %v2461_v53 = vunpack.i.l.bf16 %v2460_v27  ;;  %v2472_v8 = vunpack.i.h.bf16 %v2470_v15 }
 0x100   :  { %v2681_v3 = vpop.eup %2680  ;;  %v569_v23 = vadd.f32 1.0, %v2679_v56  ;;  %v3584_v6 = vadd.f32 %v754_v60, %v744_v41  ;;  %v895_v39 = vsel %vm78_vm15, %v2466_v49, %v2467_v62  ;;  %v896_v0 = vsel %vm78_vm15, %v2467_v62, %v2466_v49 }
 0x101   :  { %v570_v7 = vadd.f32 1.0, %v2681_v3  ;;  %v3586_v12 = vadd.f32 %v755_v14, %v745_v31  ;;  %v897_v43 = vmul.f32 %v3100_v37, %v896_v0  ;;  %v898_v54 = vmul.f32 %v3105_v38, %v895_v39 }
 0x102   :  { %2690 = vrcp.f32 %v569_v23  ;;  %v758_v26 = vsub.f32 0.0, %v3584_v6  ;;  %v2471_v60 = vunpack.i.l.bf16 %v2470_v15  ;;  %v2477_v24 = vunpack.i.h.bf16 %v2475_v10 }
 0x103   :  { %2692 = vrcp.f32 %v570_v7  ;;  %v759_v36 = vsub.f32 0.0, %v3586_v12  ;;  %v2476_v56 = vunpack.i.l.bf16 %v2475_v10  ;;  %v887_v14 = vsel %vm67_vm12, %v2461_v53, %v2462_v1 }
 0x104   :  { %v2683_v25 = vpop.eup %2682  ;;  %v760_v47 = vmul.f32 1.442695, %v758_v26  ;;  %v888_v37 = vsel %vm67_vm12, %v2462_v1, %v2461_v53  ;;  %v890_v3 = vmul.f32 %v887_v14, %v3082_v29  ;;  %v905_v27 = vsel %vm92_vm13, %v2471_v60, %v2472_v8  ;;  %v4820_v53 = vld [vmem:[#allocation5_spill] sm:$0xff] }
 0x105   :  { %v2685_v32 = vpop.eup %2684  ;;  %v3593_v61 = vmul.f32 %v2683_v25, %v3482_v63  ;;  %v762_v46 = vmul.f32 1.442695, %v759_v36  ;;  %v889_v38 = vmul.f32 %v888_v37, %v3077_v28  ;;  %v906_v23 = vsel %vm92_vm13, %v2472_v8, %v2471_v60  ;;  %v4821_v8 = vld [vmem:[#allocation9_spill] sm:$0xff] }
 0x106   :  { %v3596_v22 = vmul.f32 %v2685_v32, %v3488_v50  ;;  %2694 = vpow2.f32 %v760_v47  ;;  %v908_v62 = vmul.f32 %v3120_v45, %v905_v27  ;;  %v915_v7 = vsel %vm106_vm14, %v2476_v56, %v2477_v24 }
 0x107   :  { %4816 = vst [vmem:[#allocation23_spill] sm:$0xff] %v3593_v61  ;;  %v2687_v30 = vpop.eup %2686  ;;  %2696 = vpow2.f32 %v762_v46  ;;  %v899_v26 = vadd.f32 %v897_v43, %v889_v38  ;;  %v900_v25 = vadd.f32 %v898_v54, %v890_v3  ;;  %v907_v36 = vmul.f32 %v3115_v44, %v906_v23  ;;  %v4826_v23 = vld [vmem:[#allocation15_spill] sm:$0xff] }
 0x108   :  { %4817 = vst [vmem:[#allocation24_spill] sm:$0xff] %v3596_v22  ;;  %v575_v63 = vadd.f32 %v3596_v22, %v3593_v61  ;;  %v2689_v50 = vpop.eup %2688  ;;  %v824_v41 = vadd.f32 1.0, %v2687_v30  ;;  %v916_v28 = vsel %vm106_vm14, %v2477_v24, %v2476_v56  ;;  %v918_v47 = vmul.f32 %v3149_v59, %v915_v7  ;;  %v2284_v24 = vld [vmem:[%s4756_s1 + $0x30] sm:$0xff]  ;;  %v4823_v56 = vld [vmem:[#allocation6_spill] sm:$0xff] }
 0x109   :  { %v825_v31 = vadd.f32 1.0, %v2689_v50  ;;  %v917_v32 = vmul.f32 %v3144_v58, %v916_v28  ;;  %v909_v15 = vadd.f32 %v907_v36, %v899_v26  ;;  %v910_v46 = vadd.f32 %v908_v62, %v900_v25  ;;  %v4829_v25 = vld [vmem:[#allocation13_spill] sm:$0xff] }
 0x10a   :  { %576 = vadd.xlane.f32.xlu1 %v575_v63  ;;  %2698 = vrcp.f32 %v824_v41  ;;  %v1665_v50 = vmul.f32 %v4821_v8, %v4820_v53  ;;  %v4822_v41 = vld [vmem:[#allocation10_spill] sm:$0xff]  ;;  %v1670_v62 = vmul.f32 %v4826_v23, %v4823_v56  ;;  %v1947_v36 = vmul.f32 %v4829_v25, %v4820_v53  ;;  %v1943_v28 = vld [vmem:[%s4756_s1] sm:$0xff] }
 0x10b   :  { %2700 = vrcp.f32 %v825_v31  ;;  %v3630_v1 = vadd.f32 %v917_v32, %v909_v15  ;;  %v3632_v10 = vadd.f32 %v918_v47, %v910_v46  ;;  %v1666_v60 = vmul.f32 %v4822_v41, %v4820_v53  ;;  %v4824_v31 = vld [vmem:[#allocation14_spill] sm:$0xff]  ;;  %v4830_v46 = vld [vmem:[#allocation17_spill] sm:$0xff] }
 0x10c   :  { %v2691_v49 = vpop.eup %2690  ;;  %v1669_v14 = vmul.f32 %v4824_v31, %v4823_v56  ;;  %v1667_v3 = vadd.f32 %v2284_v24, %v1665_v50  ;;  %v4834_v24 = vld [vmem:[#allocation16_spill] sm:$0xff] }
 0x10d   :  { %v2693_v29 = vpop.eup %2692  ;;  %v3621_v39 = vmul.f32 %v2691_v49, %v3521_v16  ;;  %v4828_v49 = vld [vmem:[#allocation12_spill] sm:$0xff] }
 0x10e   :  { %v3626_v45 = vmul.f32 %v2693_v29, %v3528_v13  ;;  %v1946_v26 = vmul.f32 %v4828_v49, %v4820_v53  ;;  %v1671_v32 = vsub.f32 %v1667_v3, %v1669_v14  ;;  %v4833_v53 = vld [vmem:[#allocation19_spill] sm:$0xff] }
 0x110   :  { %v2695_v0 = vpop.eup %2694  ;;  %v578_v44 = vadd.f32 %v3626_v45, %v3621_v39  ;;  %v1948_v47 = vadd.f32 %v1946_v26, %v1943_v28  ;;  %vm1673_vm4 = vcmp.gt.f32.partialorder %v1671_v32, %v4823_v56 }
 0x111   :  { %v2697_v43 = vpop.eup %2696  ;;  %v764_v16 = vadd.f32 1.0, %v2695_v0  ;;  %v1950_v0 = vmul.f32 %v4830_v46, %v4823_v56 }
 0x112   :  { %579 = vadd.xlane.f32.xlu0 %v578_v44  ;;  %v765_v54 = vadd.f32 1.0, %v2697_v43  ;;  %v4831_v44 = vld [vmem:[#allocation18_spill] sm:$0xff] }
 0x113   :  { %2702 = vrcp.f32 %v764_v16  ;;  %v1951_v43 = vmul.f32 %v4831_v44, %v4823_v56  ;;  %v1952_v16 = vsub.f32 %v1948_v47, %v1950_v0  ;;  %v2802_v47 = vld [vmem:[%s4757_s2 + $0x40] sm:$0xff] }
 0x114   :  { %v2699_v58 = vpop.eup %2698  ;;  %2704 = vrcp.f32 %v765_v54 }
 0x115   :  { %v2701_v59 = vpop.eup %2700  ;;  %v3635_v13 = vmul.f32 %v2699_v58, %v3559_v48  ;;  %v2285_v48 = vld [vmem:[%s4756_s1 + $0x38] sm:$0xff]  ;;  %v4832_v58 = vmov 0.0   ;;  %vm1954_vm6 = vcmp.gt.f32.partialorder %v1952_v16, %v4823_v56 }
 0x116   :  { %v3638_v30 = vmul.f32 %v2701_v59, %v3561_v42  ;;  %v1668_v27 = vadd.f32 %v2285_v48, %v1666_v60  ;;  %v3681_v59 = vsel %vm1673_vm4, 1.0, %v4832_v58  ;;  %v3693_v50 = vsel %vm1954_vm6, 1.0, %v4832_v58  ;;  %v4835_v48 = vld [vmem:[#allocation11_spill] sm:$0xff]  ;;  %v4837_v16 = vld [vmem:[#allocation8_spill] sm:$0xff] }
 0x117   :  { %4818 = vst [vmem:[#allocation25_spill] sm:$0xff] %v3635_v13 }
 0x118   :  { %4819 = vst [vmem:[#allocation26_spill] sm:$0xff] %v3638_v30  ;;  %v833_v63 = vadd.f32 %v3638_v30, %v3635_v13 }
 0x11a   :  { %834 = vadd.xlane.f32.xlu1 %v833_v63 }
 0x11d   :  { %v2703_v42 = vpop.eup %2702 }
 0x11e   :  { %v2705_v37 = vpop.eup %2704  ;;  %v3655_v38 = vmul.f32 %v2703_v42, %v3584_v6  ;;  %v1944_v6 = vld [vmem:[%s4756_s1 + $0x8] sm:$0xff]  ;;  %v2480_v42 = vpop.permute.xlu1 %2479 }
 0x11f   :  { %v3660_v7 = vmul.f32 %v2705_v37, %v3586_v12  ;;  %v1672_v12 = vsub.f32 %v1668_v27, %v1670_v62  ;;  %v1949_v15 = vadd.f32 %v1947_v36, %v1944_v6  ;;  %v2482_v36 = vunpack.i.h.bf16 %v2480_v42 }
 0x120   :  { %4825 = vst [vmem:[#allocation5_spill] sm:$0xff] %v3655_v38  ;;  %v2481_v28 = vunpack.i.l.bf16 %v2480_v42 }
 0x121   :  { %4827 = vst [vmem:[#allocation9_spill] sm:$0xff] %v3660_v7  ;;  %v830_v29 = vadd.f32 %v3660_v7, %v3655_v38  ;;  %vm1674_vm5 = vcmp.gt.f32.partialorder %v1672_v12, %v4823_v56  ;;  %v1953_v54 = vsub.f32 %v1949_v15, %v1951_v43  ;;  %v4836_v15 = vld [vmem:[#allocation7_spill] sm:$0xff]  ;;  %v2803_v43 = vld [vmem:[%s4757_s2 + $0x48] sm:$0xff]  ;;  %v3839_v38 = vmul.f32 %v2802_v47, %v4824_v31 }
 0x122   :  { %v3684_v63 = vsel %vm1674_vm5, 1.0, %v4832_v58  ;;  %v2490_v14 = vpop.permute.xlu1 %2489  ;;  %v921_v0 = vmul.f32 %v2802_v47, %v4836_v15  ;;  %v2807_v15 = vld [vmem:[%s4757_s2 + $0x18] sm:$0xff]  ;;  %v3842_v22 = vmul.f32 %v2803_v43, %v4826_v23 }
 0x123   :  { %831 = vadd.xlane.f32.xlu0 %v830_v29  ;;  %vm1955_vm7 = vcmp.gt.f32.partialorder %v1953_v54, %v4823_v56  ;;  %v2503_v8 = vpack.i.bf16 %v3684_v63, %v3681_v59  ;;  %v2485_v56 = vpop.permute.xlu0 %2484  ;;  %v2492_v6 = vunpack.i.h.bf16 %v2490_v14  ;;  %v2491_v29 = vunpack.i.l.bf16 %v2490_v14 }
 0x124   :  { %v3696_v41 = vsel %vm1955_vm7, 1.0, %v4832_v58  ;;  %v2487_v32 = vunpack.i.h.bf16 %v2485_v56  ;;  %v2486_v12 = vunpack.i.l.bf16 %v2485_v56  ;;  %v922_v54 = vmul.f32 %v2803_v43, %v4837_v16  ;;  %v2808_v16 = vld [vmem:[%s4757_s2] sm:$0xff] }
 0x125   :  { %v2513_v60 = vpack.i.bf16 %v3696_v41, %v3693_v50  ;;  %v1146_v42 = vsel %vm78_vm15, %v2492_v6, %v2491_v29 }
 0x126   :  { %v1137_v56 = vsel %vm67_vm12, %v2486_v12, %v2487_v32  ;;  %v1138_v14 = vsel %vm67_vm12, %v2487_v32, %v2486_v12  ;;  %v2806_v32 = vld [vmem:[%s4757_s2 + $0x10] sm:$0xff] }
 0x127   :  { %v2495_v37 = vpop.permute.xlu0 %2494  ;;  %v1147_v12 = vmul.f32 %v2806_v32, %v1146_v42 }
 0x12b   :  { %2499 = vrot.lane.b32.xlu1 %v4833_v53, %s2840_s14 }
 0x12f   :  { %2509 = vrot.lane.b32.xlu1 %v2503_v8, %s2840_s14 }
 0x133   :  { %2519 = vrot.lane.b32.xlu1 %v2513_v60, %s2840_s14 }
 0x137   :  { %2529 = vrot.lane.b32.xlu1 %v4833_v53, %s2837_s7 }
 0x139   :  { %2504 = vrot.lane.b32.xlu0 %v2503_v8, %s2838_s8 }
 0x13b   :  { %2539 = vrot.lane.b32.xlu1 %v2513_v60, %s2837_s7 }
 0x13d   :  { %2514 = vrot.lane.b32.xlu0 %v2513_v60, %s2838_s8 }
 0x13f   :  { %2549 = vrot.lane.b32.xlu1 %v4833_v53, %s2839_s13 }
 0x141   :  { %2524 = vrot.lane.b32.xlu0 %v4834_v24, %s2837_s7 }
 0x143   :  { %2559 = vrot.lane.b32.xlu1 %v2513_v60, %s2839_s13 }
 0x145   :  { %2534 = vrot.lane.b32.xlu0 %v2503_v8, %s2837_s7 }
 0x147   :  { %2569 = vrot.lane.b32.xlu1 %v4833_v53, %s2842_s16 }
 0x149   :  { %2544 = vrot.lane.b32.xlu0 %v4834_v24, %s2839_s13 }
 0x14b   :  { %2579 = vrot.lane.b32.xlu1 %v2513_v60, %s2842_s16 }
 0x14d   :  { %2554 = vrot.lane.b32.xlu0 %v2503_v8, %s2839_s13 }
 0x14f   :  { %2589 = vrot.lane.b32.xlu1 %v4834_v24, %s2841_s15 }
 0x151   :  { %2564 = vrot.lane.b32.xlu0 %v4834_v24, %s2842_s16 }
 0x153   :  { %2599 = vrot.lane.b32.xlu1 %v2503_v8, %s2841_s15 }
 0x155   :  { %2574 = vrot.lane.b32.xlu0 %v2503_v8, %s2842_s16 }
 0x157   :  { %2609 = vrot.lane.b32.xlu1 %v4835_v48, %s2844_s18 }
 0x159   :  { %2584 = vrot.lane.b32.xlu0 %v4835_v48, %s2841_s15 }
 0x15b   :  { %2619 = vrot.lane.b32.xlu1 %v4833_v53, %s2844_s18 }
 0x15d   :  { %2594 = vrot.lane.b32.xlu0 %v4833_v53, %s2841_s15 }
 0x15f   :  { %2629 = vrot.lane.b32.xlu1 %v2513_v60, %s2844_s18 }
 0x161   :  { %2604 = vrot.lane.b32.xlu0 %v2513_v60, %s2841_s15 }
 0x163   :  { %2639 = vrot.lane.b32.xlu1 %v4834_v24, %s2843_s17 }
 0x165   :  { %2614 = vrot.lane.b32.xlu0 %v4834_v24, %s2844_s18  ;;  %v2496_v24 = vunpack.i.l.bf16 %v2495_v37 }
 0x167   :  { %2649 = vrot.lane.b32.xlu1 %v2503_v8, %s2843_s17 }
 0x169   :  { %2624 = vrot.lane.b32.xlu0 %v2503_v8, %s2844_s18  ;;  %v930_v8 = vsel %vm127_vm1, %v2482_v36, %v2481_v28 }
 0x16d   :  { %2634 = vrot.lane.b32.xlu0 %v4835_v48, %s2843_s17  ;;  %v1145_v48 = vsel %vm78_vm15, %v2491_v29, %v2492_v6 }
 0x171   :  { %2644 = vrot.lane.b32.xlu0 %v4833_v53, %s2843_s17  ;;  %v929_v53 = vsel %vm127_vm1, %v2481_v28, %v2482_v36 }
 0x174   :  { %v329_v3 = vpop.xlane.xlu1 %328 }
 0x175   :  { %2654 = vrot.lane.b32.xlu0 %v2513_v60, %s2843_s17  ;;  %v2497_v60 = vunpack.i.h.bf16 %v2495_v37  ;;  %v3775_v37 = vld [vmem:[%s4757_s2 + $0x50] sm:$0xff] }
 0x177   :  { %v1400_v42 = vsel %vm67_vm12, %v2496_v24, %v2497_v60 }
 0x184   :  { %v326_v27 = vpop.xlane.xlu0 %325 }
 0x185   :  { %v3746_v62 = vadd.f32 %v329_v3, %v326_v27  ;;  %v923_v3 = vadd.f32 %v921_v0, %v3630_v1  ;;  %v924_v27 = vadd.f32 %v922_v54, %v3632_v10  ;;  %v3787_v1 = vld [vmem:[%s4757_s2] sm:$0xff]  ;;  %v1401_v10 = vsel %vm67_vm12, %v2497_v60, %v2496_v24  ;;  %v2264_v60 = vld [vmem:[%s4757_s2 + $0x10] sm:$0xff]  ;;  %v2265_v24 = vld [vmem:[%s4757_s2 + $0x18] sm:$0xff] }
 0x186   :  { %v1148_v0 = vmul.f32 %v2807_v15, %v1145_v48  ;;  %v1139_v54 = vmul.f32 %v2808_v16, %v1138_v14  ;;  %v1404_v15 = vmul.f32 %v3787_v1, %v1401_v10  ;;  %v2270_v16 = vld [vmem:[%s4757_s2 + $0x40] sm:$0xff] }
 0x187   :  { %v3845_v61 = vmul.f32 %v2270_v16, %v4830_v46  ;;  %v3855_v23 = vmul.f32 %v2270_v16, %v3681_v59 }
 0x188   :  { %v3831_v10 = vadd.f32 %v1147_v12, %v1139_v54 }
 0x197   :  { %v577_v49 = vpop.xlane.xlu1 %576 }
 0x19f   :  { %v580_v26 = vpop.xlane.xlu0 %579 }
 0x1a0   :  { %v3748_v25 = vadd.f32 %v580_v26, %v577_v49  ;;  %v931_v49 = vmul.f32 %v3775_v37, %v929_v53  ;;  %v3781_v26 = vld [vmem:[%s4757_s2 + $0x58] sm:$0xff]  ;;  %v2809_v53 = vld [vmem:[%s4757_s2 + $0x8] sm:$0xff] }
 0x1a1   :  { %v932_v36 = vmul.f32 %v3781_v26, %v930_v8  ;;  %v1140_v8 = vmul.f32 %v2809_v53, %v1137_v56  ;;  %v2271_v56 = vld [vmem:[%s4757_s2 + $0x48] sm:$0xff] }
 0x1a2   :  { %v3810_v32 = vadd.f32 %v931_v49, %v923_v3  ;;  %v3858_v46 = vmul.f32 %v2271_v56, %v3684_v63 }
 0x1a3   :  { %v3812_v48 = vadd.f32 %v932_v36, %v924_v27  ;;  %v3833_v30 = vadd.f32 %v1148_v0, %v1140_v8 }
 0x1a7   :  { %v835_v58 = vpop.xlane.xlu1 %834 }
 0x1ab   :  { %v2500_v28 = vpop.permute.xlu1 %2499 }
 0x1ac   :  { %v2502_v6 = vunpack.i.h.bf16 %v2500_v28  ;;  %v2501_v29 = vunpack.i.l.bf16 %v2500_v28  ;;  %v3806_v28 = vld [vmem:[%s4757_s2 + $0x8] sm:$0xff] }
 0x1ad   :  { %v1405_v13 = vmul.f32 %v3806_v28, %v1400_v42  ;;  %v3861_v42 = vmul.f32 %v2270_v16, %v3693_v50 }
 0x1ae   :  { %v1410_v3 = vsel %vm78_vm15, %v2501_v29, %v2502_v6  ;;  %v1411_v27 = vsel %vm78_vm15, %v2502_v6, %v2501_v29  ;;  %v3848_v6 = vmul.f32 %v2271_v56, %v4831_v44 }
 0x1af   :  { %v2510_v14 = vpop.permute.xlu1 %2509  ;;  %v1414_v29 = vmul.f32 %v2264_v60, %v1411_v27  ;;  %v1415_v12 = vmul.f32 %v2265_v24, %v1410_v3 }
 0x1b0   :  { %v832_v53 = vpop.xlane.xlu0 %831  ;;  %v2512_v49 = vunpack.i.h.bf16 %v2510_v14  ;;  %v2511_v36 = vunpack.i.l.bf16 %v2510_v14  ;;  %v3864_v14 = vmul.f32 %v2271_v56, %v3696_v41 }
 0x1b1   :  { %v3836_v7 = vadd.f32 %v835_v58, %v832_v53 }
 0x1b2   :  { %v1691_v0 = vsel %vm78_vm15, %v2511_v36, %v2512_v49  ;;  %v1692_v58 = vsel %vm78_vm15, %v2512_v49, %v2511_v36  ;;  %v1416_v49 = vadd.f32 %v1414_v29, %v1404_v15  ;;  %v1417_v36 = vadd.f32 %v1415_v12, %v1405_v13  ;;  %v2267_v13 = vld [vmem:[%s4757_s2 + $0x28] sm:$0xff] }
 0x1b3   :  { %4838 = vst [vmem:[#allocation10_spill] sm:$0xff] %v3836_v7  ;;  %v2520_v54 = vpop.permute.xlu1 %2519  ;;  %v1695_v53 = vmul.f32 %v2264_v60, %v1692_v58  ;;  %v1696_v3 = vmul.f32 %v2265_v24, %v1691_v0  ;;  %v2266_v58 = vld [vmem:[%s4757_s2 + $0x20] sm:$0xff] }
 0x1b4   :  { %v2505_v31 = vpop.permute.xlu0 %2504  ;;  %v2522_v47 = vunpack.i.h.bf16 %v2520_v54  ;;  %v2521_v8 = vunpack.i.l.bf16 %v2520_v54 }
 0x1b5   :  { %v2507_v44 = vunpack.i.h.bf16 %v2505_v31  ;;  %v2506_v43 = vunpack.i.l.bf16 %v2505_v31 }
 0x1b6   :  { %v1972_v27 = vsel %vm78_vm15, %v2521_v8, %v2522_v47  ;;  %v1973_v59 = vsel %vm78_vm15, %v2522_v47, %v2521_v8 }
 0x1b7   :  { %v1681_v63 = vsel %vm67_vm12, %v2506_v43, %v2507_v44  ;;  %v1682_v50 = vsel %vm67_vm12, %v2507_v44, %v2506_v43  ;;  %v2530_v16 = vpop.permute.xlu1 %2529  ;;  %v1976_v31 = vmul.f32 %v2264_v60, %v1973_v59  ;;  %v1977_v47 = vmul.f32 %v2265_v24, %v1972_v27 }
 0x1b8   :  { %v1685_v41 = vmul.f32 %v1682_v50, %v3787_v1  ;;  %v1686_v56 = vmul.f32 %v1681_v63, %v3806_v28  ;;  %v2515_v0 = vpop.permute.xlu0 %2514  ;;  %v2532_v15 = vunpack.i.h.bf16 %v2530_v16  ;;  %v2531_v29 = vunpack.i.l.bf16 %v2530_v16 }
 0x1b9   :  { %v2517_v12 = vunpack.i.h.bf16 %v2515_v0  ;;  %v2516_v54 = vunpack.i.l.bf16 %v2515_v0 }
 0x1ba   :  { %v1697_v8 = vadd.f32 %v1695_v53, %v1685_v41  ;;  %v1698_v44 = vadd.f32 %v1696_v3, %v1686_v56  ;;  %v1422_v43 = vsel %vm92_vm13, %v2531_v29, %v2532_v15  ;;  %v1423_v63 = vsel %vm92_vm13, %v2532_v15, %v2531_v29 }
 0x1bb   :  { %v1962_v50 = vsel %vm67_vm12, %v2516_v54, %v2517_v12  ;;  %v1963_v7 = vsel %vm67_vm12, %v2517_v12, %v2516_v54  ;;  %v1426_v51 = vmul.f32 %v2266_v58, %v1423_v63  ;;  %v1427_v16 = vmul.f32 %v2267_v13, %v1422_v43  ;;  %v2540_v40 = vpop.permute.xlu1 %2539  ;;  %v2268_v43 = vld [vmem:[%s4757_s2 + $0x30] sm:$0xff] }
 0x1bc   :  { %v1966_v60 = vmul.f32 %v1963_v7, %v3787_v1  ;;  %v1967_v24 = vmul.f32 %v1962_v50, %v3806_v28  ;;  %v2525_v53 = vpop.permute.xlu0 %2524  ;;  %v2542_v3 = vunpack.i.h.bf16 %v2540_v40  ;;  %v2541_v27 = vunpack.i.l.bf16 %v2540_v40 }
 0x1bd   :  { %v2527_v59 = vunpack.i.h.bf16 %v2525_v53  ;;  %v2526_v41 = vunpack.i.l.bf16 %v2525_v53  ;;  %v1428_v56 = vadd.f32 %v1426_v51, %v1416_v49  ;;  %v1429_v0 = vadd.f32 %v1427_v16, %v1417_v36  ;;  %v2810_v51 = vld [vmem:[%s4757_s2 + $0x20] sm:$0xff]  ;;  %v2811_v36 = vld [vmem:[%s4757_s2 + $0x28] sm:$0xff] }
 0x1be   :  { %v1978_v15 = vadd.f32 %v1976_v31, %v1966_v60  ;;  %v1979_v29 = vadd.f32 %v1977_v47, %v1967_v24  ;;  %v1984_v9 = vsel %vm92_vm13, %v2541_v27, %v2542_v3  ;;  %v1985_v12 = vsel %vm92_vm13, %v2542_v3, %v2541_v27 }
 0x1bf   :  { %v1155_v7 = vsel %vm92_vm13, %v2526_v41, %v2527_v59  ;;  %v1156_v1 = vsel %vm92_vm13, %v2527_v59, %v2526_v41  ;;  %v1988_v28 = vmul.f32 %v2266_v58, %v1985_v12  ;;  %v1989_v40 = vmul.f32 %v2267_v13, %v1984_v9  ;;  %v2550_v54 = vpop.permute.xlu1 %2549  ;;  %v2269_v9 = vld [vmem:[%s4757_s2 + $0x38] sm:$0xff] }
 0x1c0   :  { %v1157_v49 = vmul.f32 %v2810_v51, %v1156_v1  ;;  %v1158_v31 = vmul.f32 %v2811_v36, %v1155_v7  ;;  %v2535_v47 = vpop.permute.xlu0 %2534  ;;  %v2552_v63 = vunpack.i.h.bf16 %v2550_v54  ;;  %v2551_v50 = vunpack.i.l.bf16 %v2550_v54 }
 0x1c1   :  { %v2537_v16 = vunpack.i.h.bf16 %v2535_v47  ;;  %v2536_v60 = vunpack.i.l.bf16 %v2535_v47  ;;  %v1990_v24 = vadd.f32 %v1988_v28, %v1978_v15  ;;  %v1991_v53 = vadd.f32 %v1989_v40, %v1979_v29 }
 0x1c2   :  { %v1159_v3 = vadd.f32 %v1157_v49, %v3831_v10  ;;  %v1160_v27 = vadd.f32 %v1158_v31, %v3833_v30  ;;  %v1434_v59 = vsel %vm106_vm14, %v2551_v50, %v2552_v63  ;;  %v1435_v41 = vsel %vm106_vm14, %v2552_v63, %v2551_v50 }
 0x1c3   :  { %v1703_v12 = vsel %vm92_vm13, %v2536_v60, %v2537_v16  ;;  %v1704_v7 = vsel %vm92_vm13, %v2537_v16, %v2536_v60  ;;  %v1438_v1 = vmul.f32 %v2268_v43, %v1435_v41  ;;  %v1439_v54 = vmul.f32 %v2269_v9, %v1434_v59  ;;  %v2560_v15 = vpop.permute.xlu1 %2559 }
 0x1c4   :  { %v1707_v29 = vmul.f32 %v2266_v58, %v1704_v7  ;;  %v1708_v28 = vmul.f32 %v2267_v13, %v1703_v12  ;;  %v2545_v10 = vpop.permute.xlu0 %2544  ;;  %v2562_v40 = vunpack.i.h.bf16 %v2560_v15  ;;  %v2561_v30 = vunpack.i.l.bf16 %v2560_v15 }
 0x1c5   :  { %v2547_v51 = vunpack.i.h.bf16 %v2545_v10  ;;  %v2546_v49 = vunpack.i.l.bf16 %v2545_v10  ;;  %v1440_v36 = vadd.f32 %v1438_v1, %v1428_v56  ;;  %v1441_v31 = vadd.f32 %v1439_v54, %v1429_v0  ;;  %v2813_v56 = vld [vmem:[%s4757_s2 + $0x38] sm:$0xff] }
 0x1c6   :  { %v1709_v47 = vadd.f32 %v1707_v29, %v1697_v8  ;;  %v1710_v63 = vadd.f32 %v1708_v28, %v1698_v44  ;;  %v1996_v50 = vsel %vm106_vm14, %v2561_v30, %v2562_v40  ;;  %v1997_v16 = vsel %vm106_vm14, %v2562_v40, %v2561_v30  ;;  %v2812_v8 = vld [vmem:[%s4757_s2 + $0x30] sm:$0xff] }
 0x1c7   :  { %v1165_v60 = vsel %vm106_vm14, %v2546_v49, %v2547_v51  ;;  %v1166_v58 = vsel %vm106_vm14, %v2547_v51, %v2546_v49  ;;  %v2000_v13 = vmul.f32 %v2268_v43, %v1997_v16  ;;  %v2001_v59 = vmul.f32 %v2269_v9, %v1996_v50  ;;  %v2570_v41 = vpop.permute.xlu1 %2569  ;;  %v2272_v30 = vld [vmem:[%s4757_s2 + $0x50] sm:$0xff]  ;;  %v2273_v51 = vld [vmem:[%s4757_s2 + $0x58] sm:$0xff] }
 0x1c8   :  { %v1167_v44 = vmul.f32 %v2812_v8, %v1166_v58  ;;  %v1168_v0 = vmul.f32 %v2813_v56, %v1165_v60  ;;  %v2555_v12 = vpop.permute.xlu0 %2554  ;;  %v2572_v7 = vunpack.i.h.bf16 %v2570_v41  ;;  %v2571_v1 = vunpack.i.l.bf16 %v2570_v41 }
 0x1c9   :  { %v2557_v54 = vunpack.i.h.bf16 %v2555_v12  ;;  %v2556_v15 = vunpack.i.l.bf16 %v2555_v12  ;;  %v2002_v29 = vadd.f32 %v2000_v13, %v1990_v24  ;;  %v2003_v28 = vadd.f32 %v2001_v59, %v1991_v53 }
 0x1ca   :  { %v1169_v10 = vadd.f32 %v1167_v44, %v1159_v3  ;;  %v1170_v40 = vadd.f32 %v1168_v0, %v1160_v27  ;;  %v1446_v49 = vadd.f32 %v3845_v61, %v1440_v36  ;;  %v1447_v50 = vadd.f32 %v3848_v6, %v1441_v31 }
 0x1cb   :  { %v1715_v16 = vsel %vm106_vm14, %v2556_v15, %v2557_v54  ;;  %v1716_v24 = vsel %vm106_vm14, %v2557_v54, %v2556_v15  ;;  %v1452_v53 = vsel %vm127_vm1, %v2571_v1, %v2572_v7  ;;  %v1453_v3 = vsel %vm127_vm1, %v2572_v7, %v2571_v1  ;;  %v2580_v27 = vpop.permute.xlu1 %2579 }
 0x1cc   :  { %v1719_v60 = vmul.f32 %v2268_v43, %v1716_v24  ;;  %v1720_v58 = vmul.f32 %v2269_v9, %v1715_v16  ;;  %v2565_v13 = vpop.permute.xlu0 %2564  ;;  %v1173_v61 = vadd.f32 %v3839_v38, %v1169_v10  ;;  %v1174_v6 = vadd.f32 %v3842_v22, %v1170_v40 }
 0x1cd   :  { %v2567_v36 = vunpack.i.h.bf16 %v2565_v13  ;;  %v2566_v31 = vunpack.i.l.bf16 %v2565_v13  ;;  %v1456_v59 = vmul.f32 %v2272_v30, %v1452_v53  ;;  %v1457_v41 = vmul.f32 %v2273_v51, %v1453_v3 }
 0x1ce   :  { %v1721_v8 = vadd.f32 %v1719_v60, %v1709_v47  ;;  %v1722_v44 = vadd.f32 %v1720_v58, %v1710_v63  ;;  %v2582_v56 = vunpack.i.h.bf16 %v2580_v27  ;;  %v2581_v0 = vunpack.i.l.bf16 %v2580_v27 }
 0x1cf   :  { %v1179_v12 = vsel %vm127_vm1, %v2566_v31, %v2567_v36  ;;  %v1180_v43 = vsel %vm127_vm1, %v2567_v36, %v2566_v31  ;;  %v3958_v9 = vadd.f32 %v1456_v59, %v1446_v49  ;;  %v3960_v7 = vadd.f32 %v1457_v41, %v1447_v50  ;;  %v2590_v38 = vpop.permute.xlu1 %2589  ;;  %v2814_v41 = vld [vmem:[%s4757_s2 + $0x60] sm:$0xff] }
 0x1d0   :  { %v1181_v22 = vmul.f32 %v3775_v37, %v1179_v12  ;;  %v1182_v1 = vmul.f32 %v3781_v26, %v1180_v43  ;;  %v2575_v54 = vpop.permute.xlu0 %2574  ;;  %v1727_v47 = vadd.f32 %v3855_v23, %v1721_v8  ;;  %v1728_v63 = vadd.f32 %v3858_v46, %v1722_v44  ;;  %v2815_v44 = vld [vmem:[%s4757_s2 + $0x68] sm:$0xff] }
 0x1d1   :  { %v2577_v15 = vunpack.i.h.bf16 %v2575_v54  ;;  %v2576_v10 = vunpack.i.l.bf16 %v2575_v54  ;;  %v2008_v40 = vadd.f32 %v3861_v42, %v2002_v29  ;;  %v2009_v16 = vadd.f32 %v3864_v14, %v2003_v28 }
 0x1d2   :  { %v1183_v49 = vadd.f32 %v1181_v22, %v1173_v61  ;;  %v1184_v24 = vadd.f32 %v1182_v1, %v1174_v6  ;;  %v2014_v50 = vsel %vm127_vm1, %v2581_v0, %v2582_v56  ;;  %v2015_v37 = vsel %vm127_vm1, %v2582_v56, %v2581_v0 }
 0x1d3   :  { %v1733_v26 = vsel %vm127_vm1, %v2576_v10, %v2577_v15  ;;  %v1734_v23 = vsel %vm127_vm1, %v2577_v15, %v2576_v10  ;;  %v2018_v46 = vmul.f32 %v2272_v30, %v2014_v50  ;;  %v2019_v53 = vmul.f32 %v2273_v51, %v2015_v37  ;;  %v2600_v3 = vpop.permute.xlu1 %2599  ;;  %v2275_v15 = vld [vmem:[%s4757_s2 + $0x68] sm:$0xff] }
 0x1d4   :  { %v1737_v42 = vmul.f32 %v2272_v30, %v1733_v26  ;;  %v1738_v29 = vmul.f32 %v2273_v51, %v1734_v23  ;;  %v2585_v14 = vpop.permute.xlu0 %2584  ;;  %v2592_v28 = vunpack.i.h.bf16 %v2590_v38  ;;  %v2591_v27 = vunpack.i.l.bf16 %v2590_v38 }
 0x1d5   :  { %v3976_v60 = vadd.f32 %v2018_v46, %v2008_v40  ;;  %v3978_v58 = vadd.f32 %v2019_v53, %v2009_v16  ;;  %v2587_v13 = vunpack.i.h.bf16 %v2585_v14  ;;  %v2586_v61 = vunpack.i.l.bf16 %v2585_v14 }
 0x1d6   :  { %v1739_v6 = vadd.f32 %v1737_v42, %v1727_v47  ;;  %v1740_v36 = vadd.f32 %v1738_v29, %v1728_v63  ;;  %v1189_v31 = vsel %vm141_vm0, %v2591_v27, %v2592_v28  ;;  %v1190_v59 = vsel %vm141_vm0, %v2592_v28, %v2591_v27  ;;  %v2274_v63 = vld [vmem:[%s4757_s2 + $0x60] sm:$0xff] }
 0x1d7   :  { %v939_v30 = vsel %vm141_vm0, %v2586_v61, %v2587_v13  ;;  %v940_v51 = vsel %vm141_vm0, %v2587_v13, %v2586_v61  ;;  %v1191_v8 = vmul.f32 %v2814_v41, %v1189_v31  ;;  %v1192_v56 = vmul.f32 %v2815_v44, %v1190_v59  ;;  %v2610_v0 = vpop.permute.xlu1 %2609 }
 0x1d8   :  { %v941_v12 = vmul.f32 %v2814_v41, %v939_v30  ;;  %v942_v43 = vmul.f32 %v2815_v44, %v940_v51  ;;  %v2595_v38 = vpop.permute.xlu0 %2594  ;;  %v2602_v22 = vunpack.i.h.bf16 %v2600_v3  ;;  %v2601_v1 = vunpack.i.l.bf16 %v2600_v3 }
 0x1d9   :  { %v3994_v54 = vadd.f32 %v1191_v8, %v1183_v49  ;;  %v3996_v47 = vadd.f32 %v1192_v56, %v1184_v24  ;;  %v2597_v10 = vunpack.i.h.bf16 %v2595_v38  ;;  %v2596_v40 = vunpack.i.l.bf16 %v2595_v38 }
 0x1da   :  { %v943_v16 = vadd.f32 %v941_v12, %v3810_v32  ;;  %v944_v50 = vadd.f32 %v942_v43, %v3812_v48  ;;  %v1745_v49 = vsel %vm141_vm0, %v2601_v1, %v2602_v22  ;;  %v1746_v24 = vsel %vm141_vm0, %v2602_v22, %v2601_v1  ;;  %v2276_v12 = vld [vmem:[%s4757_s2 + $0x70] sm:$0xff]  ;;  %v2277_v43 = vld [vmem:[%s4757_s2 + $0x78] sm:$0xff] }
 0x1db   :  { %v1464_v37 = vsel %vm141_vm0, %v2596_v40, %v2597_v10  ;;  %v1465_v26 = vsel %vm141_vm0, %v2597_v10, %v2596_v40  ;;  %v1749_v23 = vmul.f32 %v2274_v63, %v1745_v49  ;;  %v1750_v46 = vmul.f32 %v2275_v15, %v1746_v24  ;;  %v2620_v53 = vpop.permute.xlu1 %2619 }
 0x1dc   :  { %v1468_v3 = vmul.f32 %v2274_v63, %v1464_v37  ;;  %v1469_v42 = vmul.f32 %v2275_v15, %v1465_v26  ;;  %v2605_v32 = vpop.permute.xlu0 %2604  ;;  %v2612_v29 = vunpack.i.h.bf16 %v2610_v0  ;;  %v2611_v48 = vunpack.i.l.bf16 %v2610_v0 }
 0x1dd   :  { %v1751_v14 = vadd.f32 %v1749_v23, %v1739_v6  ;;  %v1752_v28 = vadd.f32 %v1750_v46, %v1740_v36  ;;  %v2607_v27 = vunpack.i.h.bf16 %v2605_v32  ;;  %v2606_v13 = vunpack.i.l.bf16 %v2605_v32  ;;  %v2816_v6 = vld [vmem:[%s4757_s2 + $0x70] sm:$0xff] }
 0x1de   :  { %v1470_v61 = vadd.f32 %v1468_v3, %v3958_v9  ;;  %v1471_v31 = vadd.f32 %v1469_v42, %v3960_v7  ;;  %v949_v59 = vsel %vm155_vm2, %v2611_v48, %v2612_v29  ;;  %v950_v30 = vsel %vm155_vm2, %v2612_v29, %v2611_v48  ;;  %v2817_v9 = vld [vmem:[%s4757_s2 + $0x78] sm:$0xff] }
 0x1df   :  { %v2026_v51 = vsel %vm141_vm0, %v2606_v13, %v2607_v27  ;;  %v2027_v41 = vsel %vm141_vm0, %v2607_v27, %v2606_v13  ;;  %v951_v36 = vmul.f32 %v2816_v6, %v949_v59  ;;  %v952_v7 = vmul.f32 %v2817_v9, %v950_v30  ;;  %v2630_v8 = vpop.permute.xlu1 %2629 }
 0x1e0   :  { %v2030_v44 = vmul.f32 %v2274_v63, %v2026_v51  ;;  %v2031_v56 = vmul.f32 %v2275_v15, %v2027_v41  ;;  %v2615_v0 = vpop.permute.xlu0 %2614  ;;  %v2622_v38 = vunpack.i.h.bf16 %v2620_v53  ;;  %v2621_v22 = vunpack.i.l.bf16 %v2620_v53 }
 0x1e1   :  { %v953_v1 = vadd.f32 %v951_v36, %v943_v16  ;;  %v954_v10 = vadd.f32 %v952_v7, %v944_v50  ;;  %v2617_v40 = vunpack.i.h.bf16 %v2615_v0  ;;  %v2616_v49 = vunpack.i.l.bf16 %v2615_v0 }
 0x1e2   :  { %v2032_v24 = vadd.f32 %v2030_v44, %v3976_v60  ;;  %v2033_v63 = vadd.f32 %v2031_v56, %v3978_v58  ;;  %v1476_v15 = vsel %vm155_vm2, %v2621_v22, %v2622_v38  ;;  %v1477_v37 = vsel %vm155_vm2, %v2622_v38, %v2621_v22 }
 0x1e3   :  { %v1199_v26 = vsel %vm155_vm2, %v2616_v49, %v2617_v40  ;;  %v1200_v23 = vsel %vm155_vm2, %v2617_v40, %v2616_v49  ;;  %v1480_v16 = vmul.f32 %v2276_v12, %v1476_v15  ;;  %v1481_v50 = vmul.f32 %v2277_v43, %v1477_v37  ;;  %v2640_v46 = vpop.permute.xlu1 %2639 }
 0x1e4   :  { %v1201_v53 = vmul.f32 %v2816_v6, %v1199_v26  ;;  %v1202_v3 = vmul.f32 %v2817_v9, %v1200_v23  ;;  %v2625_v60 = vpop.permute.xlu0 %2624  ;;  %v2632_v42 = vunpack.i.h.bf16 %v2630_v8  ;;  %v2631_v58 = vunpack.i.l.bf16 %v2630_v8 }
 0x1e5   :  { %v1482_v32 = vadd.f32 %v1480_v16, %v1470_v61  ;;  %v1483_v29 = vadd.f32 %v1481_v50, %v1471_v31  ;;  %v2627_v48 = vunpack.i.h.bf16 %v2625_v60  ;;  %v2626_v27 = vunpack.i.l.bf16 %v2625_v60  ;;  %v2279_v60 = vld [vmem:[%s4757_s2 + $0x88] sm:$0xff] }
 0x1e6   :  { %v1203_v13 = vadd.f32 %v1201_v53, %v3994_v54  ;;  %v1204_v59 = vadd.f32 %v1202_v3, %v3996_v47  ;;  %v2038_v30 = vsel %vm155_vm2, %v2631_v58, %v2632_v42  ;;  %v2039_v51 = vsel %vm155_vm2, %v2632_v42, %v2631_v58  ;;  %v2278_v3 = vld [vmem:[%s4757_s2 + $0x80] sm:$0xff] }
 0x1e7   :  { %v1757_v41 = vsel %vm155_vm2, %v2626_v27, %v2627_v48  ;;  %v1758_v6 = vsel %vm155_vm2, %v2627_v48, %v2626_v27  ;;  %v2042_v61 = vmul.f32 %v2276_v12, %v2038_v30  ;;  %v2043_v31 = vmul.f32 %v2277_v43, %v2039_v51  ;;  %v2650_v38 = vpop.permute.xlu1 %2649 }
 0x1e8   :  { %v1761_v36 = vmul.f32 %v2276_v12, %v1757_v41  ;;  %v1762_v9 = vmul.f32 %v2277_v43, %v1758_v6  ;;  %v2635_v7 = vpop.permute.xlu0 %2634  ;;  %v2642_v54 = vunpack.i.h.bf16 %v2640_v46  ;;  %v2641_v8 = vunpack.i.l.bf16 %v2640_v46 }
 0x1e9   :  { %v2044_v47 = vadd.f32 %v2042_v61, %v2032_v24  ;;  %v2045_v44 = vadd.f32 %v2043_v31, %v2033_v63  ;;  %v2637_v56 = vunpack.i.h.bf16 %v2635_v7  ;;  %v2636_v0 = vunpack.i.l.bf16 %v2635_v7  ;;  %v2818_v24 = vld [vmem:[%s4757_s2 + $0x80] sm:$0xff] }
 0x1ea   :  { %v1763_v22 = vadd.f32 %v1761_v36, %v1751_v14  ;;  %v1764_v40 = vadd.f32 %v1762_v9, %v1752_v28  ;;  %v1209_v49 = vsel %vm169_vm3, %v2641_v8, %v2642_v54  ;;  %v1210_v15 = vsel %vm169_vm3, %v2642_v54, %v2641_v8  ;;  %v2819_v14 = vld [vmem:[%s4757_s2 + $0x88] sm:$0xff] }
 0x1eb   :  { %v959_v12 = vsel %vm169_vm3, %v2636_v0, %v2637_v56  ;;  %v960_v43 = vsel %vm169_vm3, %v2637_v56, %v2636_v0  ;;  %v1211_v63 = vmul.f32 %v2818_v24, %v1209_v49  ;;  %v1212_v28 = vmul.f32 %v2819_v14, %v1210_v15 }
 0x1ec   :  { %v961_v37 = vmul.f32 %v2818_v24, %v959_v12  ;;  %v962_v26 = vmul.f32 %v2819_v14, %v960_v43  ;;  %v2645_v23 = vpop.permute.xlu0 %2644  ;;  %v2652_v16 = vunpack.i.h.bf16 %v2650_v38  ;;  %v2651_v50 = vunpack.i.l.bf16 %v2650_v38 }
 0x1ed   :  { %v4070_v46 = vadd.f32 %v1211_v63, %v1203_v13  ;;  %v4072_v53 = vadd.f32 %v1212_v28, %v1204_v59  ;;  %v2647_v42 = vunpack.i.h.bf16 %v2645_v23  ;;  %v2646_v58 = vunpack.i.l.bf16 %v2645_v23 }
 0x1ee   :  { %v4080_v48 = vadd.f32 %v961_v37, %v953_v1  ;;  %v4082_v27 = vadd.f32 %v962_v26, %v954_v10  ;;  %v1769_v13 = vsel %vm169_vm3, %v2651_v50, %v2652_v16  ;;  %v1770_v59 = vsel %vm169_vm3, %v2652_v16, %v2651_v50 }
 0x1ef   :  { %v1488_v30 = vsel %vm169_vm3, %v2646_v58, %v2647_v42  ;;  %v1489_v51 = vsel %vm169_vm3, %v2647_v42, %v2646_v58  ;;  %v1773_v41 = vmul.f32 %v2278_v3, %v1769_v13  ;;  %v1774_v6 = vmul.f32 %v2279_v60, %v1770_v59 }
 0x1f0   :  { %v1492_v61 = vmul.f32 %v2278_v3, %v1488_v30  ;;  %v1493_v31 = vmul.f32 %v2279_v60, %v1489_v51  ;;  %v2655_v1 = vpop.permute.xlu0 %2654  ;;  %v1028_v10 = vrot.slane %v4080_v48, %v3224_v52  ;;  %v1032_v36 = vrot.slane %v4082_v27, %v3224_v52 }
 0x1f1   :  { %v4096_v9 = vadd.f32 %v1773_v41, %v1763_v22  ;;  %v4098_v7 = vadd.f32 %v1774_v6, %v1764_v40  ;;  %v2657_v54 = vunpack.i.h.bf16 %v2655_v1  ;;  %v2656_v8 = vunpack.i.l.bf16 %v2655_v1 }
 0x1f2   :  { %v4100_v56 = vadd.f32 %v1492_v61, %v1482_v32  ;;  %v4102_v0 = vadd.f32 %v1493_v31, %v1483_v29  ;;  %v1033_v38 = vmul.f32 %v1028_v10, %v3258_v35  ;;  %v1034_v49 = vmul.f32 %v1032_v36, %v3258_v35 }
 0x1f3   :  { %v2050_v15 = vsel %vm169_vm3, %v2656_v8, %v2657_v54  ;;  %v2051_v12 = vsel %vm169_vm3, %v2657_v54, %v2656_v8  ;;  %v1040_v22 = vrot.slane %v4080_v48, %v3234_v55  ;;  %v1044_v40 = vrot.slane %v4082_v27, %v3234_v55 }
 0x1f4   :  { %v2054_v32 = vmul.f32 %v2278_v3, %v2050_v15  ;;  %v2055_v43 = vmul.f32 %v2279_v60, %v2051_v12  ;;  %v1035_v29 = vadd.f32 %v1033_v38, %v3256_v34  ;;  %v1036_v24 = vadd.f32 %v1034_v49, %v3256_v34 }
 0x1f5   :  { %v1045_v63 = vmul.f32 %v1040_v22, %v3292_v33  ;;  %v1046_v14 = vmul.f32 %v1044_v40, %v3292_v33  ;;  %v1052_v19 = vrot.slane %v4080_v48, %v3236_v18  ;;  %v1056_v28 = vrot.slane %v4082_v27, %v3236_v18 }
 0x1f6   :  { %v4122_v37 = vadd.f32 %v2054_v32, %v2044_v47  ;;  %v4124_v26 = vadd.f32 %v2055_v43, %v2045_v44  ;;  %v1064_v23 = vrot.slane %v4080_v48, %v3238_v57  ;;  %v1068_v16 = vrot.slane %v4082_v27, %v3238_v57 }
 0x1f7   :  { %v1047_v50 = vadd.f32 %v1045_v63, %v1035_v29  ;;  %v1048_v3 = vadd.f32 %v1046_v14, %v1036_v24  ;;  %v1057_v60 = vmul.f32 %v1052_v19, %v3294_v11  ;;  %v1058_v42 = vmul.f32 %v1056_v28, %v3294_v11 }
 0x1f8   :  { %v1069_v58 = vmul.f32 %v1064_v23, %v3314_v4  ;;  %v1070_v13 = vmul.f32 %v1068_v16, %v3314_v4  ;;  %v968_v47 = vrot.slane %v4080_v48, %v3230_v2  ;;  %v972_v44 = vrot.slane %v4082_v27, %v3230_v2 }
 0x1f9   :  { %v1059_v59 = vadd.f32 %v1057_v60, %v1047_v50  ;;  %v1060_v30 = vadd.f32 %v1058_v42, %v1048_v3  ;;  %v980_v51 = vrot.slane %v4080_v48, %v3232_v5  ;;  %v984_v41 = vrot.slane %v4082_v27, %v3232_v5 }
 0x1fa   :  { %v973_v6 = vmul.f32 %v968_v47, %v3258_v35  ;;  %v974_v61 = vmul.f32 %v972_v44, %v3258_v35  ;;  %v992_v31 = vrot.slane %v4080_v48, %v3240_v20  ;;  %v996_v1 = vrot.slane %v4082_v27, %v3240_v20 }
 0x1fb   :  { %v4148_v10 = vadd.f32 %v1069_v58, %v1059_v59  ;;  %v4150_v36 = vadd.f32 %v1070_v13, %v1060_v30  ;;  %v985_v54 = vmul.f32 %v980_v51, %v3292_v33  ;;  %v986_v8 = vmul.f32 %v984_v41, %v3292_v33 }
 0x1fc   :  { %v975_v38 = vadd.f32 %v973_v6, %v3256_v34  ;;  %v976_v49 = vadd.f32 %v974_v61, %v3256_v34  ;;  %v997_v15 = vmul.f32 %v992_v31, %v3294_v11  ;;  %v998_v12 = vmul.f32 %v996_v1, %v3294_v11 }
 0x1fd   :  { %v1073_v22 = vsub.f32 0.0, %v4148_v10  ;;  %v1074_v40 = vsub.f32 0.0, %v4150_v36  ;;  %v1004_v32 = vrot.slane %v4080_v48, %v3242_v21  ;;  %v1008_v43 = vrot.slane %v4082_v27, %v3242_v21 }
 0x1fe   :  { %v987_v29 = vadd.f32 %v985_v54, %v975_v38  ;;  %v988_v24 = vadd.f32 %v986_v8, %v976_v49  ;;  %v1278_v63 = vrot.slane %v4070_v46, %v3224_v52  ;;  %v1282_v14 = vrot.slane %v4072_v53, %v3224_v52 }
 0x1ff   :  { %v1075_v19 = vmul.f32 1.442695, %v1073_v22  ;;  %v1077_v28 = vmul.f32 1.442695, %v1074_v40  ;;  %v1009_v23 = vmul.f32 %v1004_v32, %v3314_v4  ;;  %v1010_v16 = vmul.f32 %v1008_v43, %v3314_v4 }
 0x200   :  { %v999_v50 = vadd.f32 %v997_v15, %v987_v29  ;;  %v1000_v3 = vadd.f32 %v998_v12, %v988_v24  ;;  %v1283_v48 = vmul.f32 %v1278_v63, %v3258_v35  ;;  %v1284_v27 = vmul.f32 %v1282_v14, %v3258_v35 }
 0x201   :  { %2706 = vpow2.f32 %v1075_v19  ;;  %v1290_v60 = vrot.slane %v4070_v46, %v3234_v55  ;;  %v1294_v42 = vrot.slane %v4072_v53, %v3234_v55  ;;  %v1302_v58 = vrot.slane %v4070_v46, %v3236_v18 }
 0x202   :  { %2708 = vpow2.f32 %v1077_v28  ;;  %v4178_v13 = vadd.f32 %v1009_v23, %v999_v50  ;;  %v4180_v47 = vadd.f32 %v1010_v16, %v1000_v3  ;;  %v1285_v44 = vadd.f32 %v1283_v48, %v3256_v34 }
 0x203   :  { %v1286_v59 = vadd.f32 %v1284_v27, %v3256_v34  ;;  %v1295_v30 = vmul.f32 %v1290_v60, %v3292_v33  ;;  %v1296_v51 = vmul.f32 %v1294_v42, %v3292_v33  ;;  %v1306_v41 = vrot.slane %v4072_v53, %v3236_v18 }
 0x204   :  { %v1013_v6 = vsub.f32 0.0, %v4178_v13  ;;  %v1014_v61 = vsub.f32 0.0, %v4180_v47  ;;  %v1307_v31 = vmul.f32 %v1302_v58, %v3294_v11  ;;  %v1314_v1 = vrot.slane %v4070_v46, %v3238_v57 }
 0x205   :  { %v1297_v54 = vadd.f32 %v1295_v30, %v1285_v44  ;;  %v1298_v8 = vadd.f32 %v1296_v51, %v1286_v59  ;;  %v1308_v38 = vmul.f32 %v1306_v41, %v3294_v11  ;;  %v1318_v49 = vrot.slane %v4072_v53, %v3238_v57 }
 0x206   :  { %v1015_v15 = vmul.f32 1.442695, %v1013_v6  ;;  %v1017_v12 = vmul.f32 1.442695, %v1014_v61  ;;  %v1319_v22 = vmul.f32 %v1314_v1, %v3314_v4  ;;  %v1218_v40 = vrot.slane %v4070_v46, %v3230_v2 }
 0x207   :  { %v1309_v32 = vadd.f32 %v1307_v31, %v1297_v54  ;;  %v1310_v43 = vadd.f32 %v1308_v38, %v1298_v8  ;;  %v1320_v29 = vmul.f32 %v1318_v49, %v3314_v4  ;;  %v1222_v24 = vrot.slane %v4072_v53, %v3230_v2 }
 0x208   :  { %2710 = vpow2.f32 %v1015_v15  ;;  %v1223_v63 = vmul.f32 %v1218_v40, %v3258_v35  ;;  %v1230_v14 = vrot.slane %v4070_v46, %v3232_v5  ;;  %v1234_v19 = vrot.slane %v4072_v53, %v3232_v5 }
 0x209   :  { %2712 = vpow2.f32 %v1017_v12  ;;  %v4207_v28 = vadd.f32 %v1319_v22, %v1309_v32  ;;  %v4209_v23 = vadd.f32 %v1320_v29, %v1310_v43  ;;  %v1224_v16 = vmul.f32 %v1222_v24, %v3258_v35 }
 0x20a   :  { %v1225_v50 = vadd.f32 %v1223_v63, %v3256_v34  ;;  %v1235_v3 = vmul.f32 %v1230_v14, %v3292_v33  ;;  %v1236_v48 = vmul.f32 %v1234_v19, %v3292_v33  ;;  %v1242_v27 = vrot.slane %v4070_v46, %v3240_v20 }
 0x20b   :  { %v2707_v60 = vpop.eup %2706  ;;  %v1323_v42 = vsub.f32 0.0, %v4207_v28  ;;  %v1324_v58 = vsub.f32 0.0, %v4209_v23  ;;  %v1226_v44 = vadd.f32 %v1224_v16, %v3256_v34  ;;  %v1246_v59 = vrot.slane %v4072_v53, %v3240_v20 }
 0x20c   :  { %v2709_v30 = vpop.eup %2708  ;;  %v1079_v51 = vadd.f32 1.0, %v2707_v60  ;;  %v1237_v41 = vadd.f32 %v1235_v3, %v1225_v50  ;;  %v1247_v6 = vmul.f32 %v1242_v27, %v3294_v11  ;;  %v1254_v61 = vrot.slane %v4070_v46, %v3242_v21 }
 0x20d   :  { %v1080_v31 = vadd.f32 1.0, %v2709_v30  ;;  %v1325_v1 = vmul.f32 1.442695, %v1323_v42  ;;  %v1327_v54 = vmul.f32 1.442695, %v1324_v58  ;;  %v1238_v8 = vadd.f32 %v1236_v48, %v1226_v44 }
 0x20e   :  { %2714 = vrcp.f32 %v1079_v51  ;;  %v1248_v38 = vmul.f32 %v1246_v59, %v3294_v11  ;;  %v1249_v49 = vadd.f32 %v1247_v6, %v1237_v41  ;;  %v1258_v15 = vrot.slane %v4072_v53, %v3242_v21 }
 0x20f   :  { %2716 = vrcp.f32 %v1080_v31  ;;  %v1259_v12 = vmul.f32 %v1254_v61, %v3314_v4  ;;  %v1559_v22 = vrot.slane %v4100_v56, %v3224_v52  ;;  %v1563_v46 = vrot.slane %v4102_v0, %v3224_v52 }
 0x210   :  { %2718 = vpow2.f32 %v1325_v1  ;;  %v1250_v40 = vadd.f32 %v1248_v38, %v1238_v8  ;;  %v1260_v32 = vmul.f32 %v1258_v15, %v3314_v4  ;;  %v1571_v43 = vrot.slane %v4100_v56, %v3234_v55 }
 0x211   :  { %2720 = vpow2.f32 %v1327_v54  ;;  %v4236_v29 = vadd.f32 %v1259_v12, %v1249_v49  ;;  %v1564_v53 = vmul.f32 %v1559_v22, %v3258_v35  ;;  %v1565_v24 = vmul.f32 %v1563_v46, %v3258_v35 }
 0x212   :  { %v2711_v63 = vpop.eup %2710  ;;  %v4240_v14 = vadd.f32 %v1260_v32, %v1250_v40  ;;  %v1575_v19 = vrot.slane %v4102_v0, %v3234_v55  ;;  %v1576_v16 = vmul.f32 %v1571_v43, %v3292_v33  ;;  %v1583_v50 = vrot.slane %v4100_v56, %v3236_v18 }
 0x213   :  { %v2713_v3 = vpop.eup %2712  ;;  %v1019_v48 = vadd.f32 1.0, %v2711_v63  ;;  %v1263_v27 = vsub.f32 0.0, %v4236_v29  ;;  %v1566_v60 = vadd.f32 %v1564_v53, %v3256_v34  ;;  %v1567_v42 = vadd.f32 %v1565_v24, %v3256_v34 }
 0x214   :  { %v1020_v58 = vadd.f32 1.0, %v2713_v3  ;;  %v1264_v44 = vsub.f32 0.0, %v4240_v14  ;;  %v1577_v59 = vmul.f32 %v1575_v19, %v3292_v33  ;;  %v1587_v30 = vrot.slane %v4102_v0, %v3236_v18 }
 0x215   :  { %2722 = vrcp.f32 %v1019_v48  ;;  %v1265_v51 = vmul.f32 1.442695, %v1263_v27  ;;  %v1578_v41 = vadd.f32 %v1576_v16, %v1566_v60  ;;  %v1588_v6 = vmul.f32 %v1583_v50, %v3294_v11 }
 0x216   :  { %2724 = vrcp.f32 %v1020_v58  ;;  %v1267_v61 = vmul.f32 1.442695, %v1264_v44  ;;  %v1579_v31 = vadd.f32 %v1577_v59, %v1567_v42  ;;  %v1589_v1 = vmul.f32 %v1587_v30, %v3294_v11 }
 0x217   :  { %2726 = vpow2.f32 %v1265_v51  ;;  %v1590_v54 = vadd.f32 %v1588_v6, %v1578_v41  ;;  %v1595_v8 = vrot.slane %v4100_v56, %v3238_v57  ;;  %v1599_v38 = vrot.slane %v4102_v0, %v3238_v57 }
 0x218   :  { %v2715_v49 = vpop.eup %2714  ;;  %2728 = vpow2.f32 %v1267_v61  ;;  %v1591_v15 = vadd.f32 %v1589_v1, %v1579_v31  ;;  %v1499_v12 = vrot.slane %v4100_v56, %v3230_v2  ;;  %v1503_v22 = vrot.slane %v4102_v0, %v3230_v2 }
 0x219   :  { %v2717_v46 = vpop.eup %2716  ;;  %v4265_v40 = vmul.f32 %v2715_v49, %v4148_v10  ;;  %v1600_v32 = vmul.f32 %v1595_v8, %v3314_v4  ;;  %v1601_v43 = vmul.f32 %v1599_v38, %v3314_v4  ;;  %v1511_v53 = vrot.slane %v4100_v56, %v3232_v5 }
 0x21a   :  { %v2719_v24 = vpop.eup %2718  ;;  %v4272_v63 = vmul.f32 %v2717_v46, %v4150_v36  ;;  %v1504_v19 = vmul.f32 %v1499_v12, %v3258_v35  ;;  %v1505_v16 = vmul.f32 %v1503_v22, %v3258_v35  ;;  %v1515_v50 = vrot.slane %v4102_v0, %v3232_v5 }
 0x21b   :  { %v2721_v10 = vpop.eup %2720  ;;  %v1329_v3 = vadd.f32 1.0, %v2719_v24  ;;  %v4278_v48 = vadd.f32 %v1600_v32, %v1590_v54  ;;  %v4280_v27 = vadd.f32 %v1601_v43, %v1591_v15  ;;  %v1516_v60 = vmul.f32 %v1511_v53, %v3292_v33 }
 0x21c   :  { %v1088_v42 = vadd.f32 %v4272_v63, %v4265_v40  ;;  %v1330_v36 = vadd.f32 1.0, %v2721_v10  ;;  %v1506_v58 = vadd.f32 %v1504_v19, %v3256_v34  ;;  %v1507_v44 = vadd.f32 %v1505_v16, %v3256_v34 }
 0x21d   :  { %2730 = vrcp.f32 %v1329_v3  ;;  %v1604_v59 = vsub.f32 0.0, %v4278_v48  ;;  %v1605_v30 = vsub.f32 0.0, %v4280_v27  ;;  %v1517_v51 = vmul.f32 %v1515_v50, %v3292_v33 }
 0x21e   :  { %1089 = vadd.xlane.f32.xlu0 %v1088_v42  ;;  %2732 = vrcp.f32 %v1330_v36  ;;  %v1518_v41 = vadd.f32 %v1516_v60, %v1506_v58  ;;  %v1523_v6 = vrot.slane %v4100_v56, %v3240_v20  ;;  %v1527_v61 = vrot.slane %v4102_v0, %v3240_v20 }
 0x21f   :  { %v2723_v31 = vpop.eup %2722  ;;  %v1606_v1 = vmul.f32 1.442695, %v1604_v59  ;;  %v1608_v54 = vmul.f32 1.442695, %v1605_v30  ;;  %v1519_v8 = vadd.f32 %v1517_v51, %v1507_v44  ;;  %v1535_v38 = vrot.slane %v4100_v56, %v3242_v21 }
 0x220   :  { %v2725_v49 = vpop.eup %2724  ;;  %v4297_v15 = vmul.f32 %v2723_v31, %v4178_v13  ;;  %v1528_v12 = vmul.f32 %v1523_v6, %v3294_v11  ;;  %v1529_v22 = vmul.f32 %v1527_v61, %v3294_v11  ;;  %v1539_v46 = vrot.slane %v4102_v0, %v3242_v21 }
 0x221   :  { %v2727_v32 = vpop.eup %2726  ;;  %v4304_v43 = vmul.f32 %v2725_v49, %v4180_v47  ;;  %2734 = vpow2.f32 %v1606_v1  ;;  %v1540_v53 = vmul.f32 %v1535_v38, %v3314_v4  ;;  %v1840_v56 = vrot.slane %v4096_v9, %v3224_v52 }
 0x222   :  { %v2729_v24 = vpop.eup %2728  ;;  %v1269_v13 = vadd.f32 1.0, %v2727_v32  ;;  %2736 = vpow2.f32 %v1608_v54  ;;  %v1530_v19 = vadd.f32 %v1528_v12, %v1518_v41  ;;  %v1531_v16 = vadd.f32 %v1529_v22, %v1519_v8 }
 0x223   :  { %v1085_v50 = vadd.f32 %v4304_v43, %v4297_v15  ;;  %v1270_v10 = vadd.f32 1.0, %v2729_v24  ;;  %v1541_v0 = vmul.f32 %v1539_v46, %v3314_v4  ;;  %v1844_v47 = vrot.slane %v4098_v7, %v3224_v52 }
 0x224   :  { %2738 = vrcp.f32 %v1269_v13  ;;  %v4314_v3 = vadd.f32 %v1540_v53, %v1530_v19  ;;  %v1845_v60 = vmul.f32 %v1840_v56, %v3258_v35  ;;  %v1852_v42 = vrot.slane %v4096_v9, %v3234_v55 }
 0x225   :  { %1086 = vadd.xlane.f32.xlu1 %v1085_v50  ;;  %2740 = vrcp.f32 %v1270_v10  ;;  %v4319_v36 = vadd.f32 %v1541_v0, %v1531_v16  ;;  %v1846_v58 = vmul.f32 %v1844_v47, %v3258_v35  ;;  %v1856_v44 = vrot.slane %v4098_v7, %v3234_v55 }
 0x226   :  { %v1544_v59 = vsub.f32 0.0, %v4314_v3  ;;  %v1847_v30 = vadd.f32 %v1845_v60, %v3256_v34  ;;  %v1857_v51 = vmul.f32 %v1852_v42, %v3292_v33  ;;  %v1864_v41 = vrot.slane %v4096_v9, %v3236_v18 }
 0x227   :  { %v2731_v6 = vpop.eup %2730  ;;  %v1545_v61 = vsub.f32 0.0, %v4319_v36  ;;  %v1848_v31 = vadd.f32 %v1846_v58, %v3256_v34  ;;  %v1858_v1 = vmul.f32 %v1856_v44, %v3292_v33  ;;  %v1868_v54 = vrot.slane %v4098_v7, %v3236_v18 }
 0x228   :  { %v2733_v8 = vpop.eup %2732  ;;  %v4335_v38 = vmul.f32 %v2731_v6, %v4207_v28  ;;  %v1546_v49 = vmul.f32 1.442695, %v1544_v59  ;;  %v1859_v12 = vadd.f32 %v1857_v51, %v1847_v30  ;;  %v1869_v22 = vmul.f32 %v1864_v41, %v3294_v11 }
 0x229   :  { %v4339_v46 = vmul.f32 %v2733_v8, %v4209_v23  ;;  %v1548_v32 = vmul.f32 1.442695, %v1545_v61  ;;  %v1860_v53 = vadd.f32 %v1858_v1, %v1848_v31  ;;  %v1870_v56 = vmul.f32 %v1868_v54, %v3294_v11 }
 0x22a   :  { %2742 = vpow2.f32 %v1546_v49  ;;  %v1871_v24 = vadd.f32 %v1869_v22, %v1859_v12  ;;  %v1876_v13 = vrot.slane %v4096_v9, %v3238_v57  ;;  %v1880_v28 = vrot.slane %v4098_v7, %v3238_v57 }
 0x22b   :  { %v2735_v19 = vpop.eup %2734  ;;  %v1338_v16 = vadd.f32 %v4339_v46, %v4335_v38  ;;  %2744 = vpow2.f32 %v1548_v32  ;;  %v1872_v50 = vadd.f32 %v1870_v56, %v1860_v53  ;;  %v1780_v23 = vrot.slane %v4096_v9, %v3230_v2 }
 0x22c   :  { %v2737_v10 = vpop.eup %2736  ;;  %v1610_v0 = vadd.f32 1.0, %v2735_v19  ;;  %v1881_v47 = vmul.f32 %v1876_v13, %v3314_v4  ;;  %v1882_v60 = vmul.f32 %v1880_v28, %v3314_v4  ;;  %v1784_v42 = vrot.slane %v4098_v7, %v3230_v2 }
 0x22d   :  { %1339 = vadd.xlane.f32.xlu1 %v1338_v16  ;;  %v1611_v58 = vadd.f32 1.0, %v2737_v10  ;;  %v1785_v44 = vmul.f32 %v1780_v23, %v3258_v35  ;;  %v1792_v59 = vrot.slane %v4096_v9, %v3232_v5  ;;  %v1796_v30 = vrot.slane %v4098_v7, %v3232_v5 }
 0x22e   :  { %v2739_v51 = vpop.eup %2738  ;;  %2746 = vrcp.f32 %v1610_v0  ;;  %v4359_v41 = vadd.f32 %v1881_v47, %v1871_v24  ;;  %v4361_v6 = vadd.f32 %v1882_v60, %v1872_v50  ;;  %v1786_v61 = vmul.f32 %v1784_v42, %v3258_v35 }
 0x22f   :  { %v2741_v31 = vpop.eup %2740  ;;  %v4365_v1 = vmul.f32 %v2739_v51, %v4236_v29  ;;  %2748 = vrcp.f32 %v1611_v58  ;;  %v1787_v54 = vadd.f32 %v1785_v44, %v3256_v34  ;;  %v1797_v8 = vmul.f32 %v1792_v59, %v3292_v33 }
 0x230   :  { %v4370_v49 = vmul.f32 %v2741_v31, %v4240_v14  ;;  %v1885_v12 = vsub.f32 0.0, %v4359_v41  ;;  %v1886_v22 = vsub.f32 0.0, %v4361_v6  ;;  %v1788_v32 = vadd.f32 %v1786_v61, %v3256_v34 }
 0x231   :  { %v1798_v53 = vmul.f32 %v1796_v30, %v3292_v33  ;;  %v1799_v56 = vadd.f32 %v1797_v8, %v1787_v54  ;;  %v1804_v29 = vrot.slane %v4096_v9, %v3240_v20  ;;  %v1808_v24 = vrot.slane %v4098_v7, %v3240_v20 }
 0x232   :  { %v1335_v13 = vadd.f32 %v4370_v49, %v4365_v1  ;;  %v1887_v14 = vmul.f32 1.442695, %v1885_v12  ;;  %v1889_v28 = vmul.f32 1.442695, %v1886_v22  ;;  %v1816_v19 = vrot.slane %v4096_v9, %v3242_v21 }
 0x233   :  { %v1800_v16 = vadd.f32 %v1798_v53, %v1788_v32  ;;  %v1809_v50 = vmul.f32 %v1804_v29, %v3294_v11  ;;  %v1810_v23 = vmul.f32 %v1808_v24, %v3294_v11  ;;  %v1820_v10 = vrot.slane %v4098_v7, %v3242_v21 }
 0x234   :  { %v2743_v0 = vpop.eup %2742  ;;  %1336 = vadd.xlane.f32.xlu0 %v1335_v13  ;;  %2750 = vpow2.f32 %v1887_v14  ;;  %v1821_v47 = vmul.f32 %v1816_v19, %v3314_v4  ;;  %v2121_v60 = vrot.slane %v4122_v37, %v3224_v52  ;;  %v2125_v42 = vrot.slane %v4124_v26, %v3224_v52 }
 0x235   :  { %v2745_v9 = vpop.eup %2744  ;;  %v1550_v58 = vadd.f32 1.0, %v2743_v0  ;;  %2752 = vpow2.f32 %v1889_v28  ;;  %v1811_v44 = vadd.f32 %v1809_v50, %v1799_v56  ;;  %v1812_v59 = vadd.f32 %v1810_v23, %v1800_v16 }
 0x236   :  { %v1551_v30 = vadd.f32 1.0, %v2745_v9  ;;  %v1822_v51 = vmul.f32 %v1820_v10, %v3314_v4  ;;  %v2126_v7 = vmul.f32 %v2121_v60, %v3258_v35  ;;  %v2127_v61 = vmul.f32 %v2125_v42, %v3258_v35 }
 0x237   :  { %2754 = vrcp.f32 %v1550_v58  ;;  %v4396_v31 = vadd.f32 %v1821_v47, %v1811_v44  ;;  %v2133_v54 = vrot.slane %v4122_v37, %v3234_v55  ;;  %v2137_v52 = vrot.slane %v4124_v26, %v3234_v55 }
 0x238   :  { %v2747_v8 = vpop.eup %2746  ;;  %2756 = vrcp.f32 %v1551_v30  ;;  %v4402_v12 = vadd.f32 %v1822_v51, %v1812_v59  ;;  %v2128_v22 = vadd.f32 %v2126_v7, %v3256_v34  ;;  %v2129_v32 = vadd.f32 %v2127_v61, %v3256_v34 }
 0x239   :  { %v2749_v53 = vpop.eup %2748  ;;  %v4407_v56 = vmul.f32 %v2747_v8, %v4278_v48  ;;  %v1825_v29 = vsub.f32 0.0, %v4396_v31  ;;  %v2138_v24 = vmul.f32 %v2133_v54, %v3292_v33  ;;  %v2139_v13 = vmul.f32 %v2137_v52, %v3292_v33 }
 0x23a   :  { %v4413_v55 = vmul.f32 %v2749_v53, %v4280_v27  ;;  %v1826_v14 = vsub.f32 0.0, %v4402_v12  ;;  %v2145_v28 = vrot.slane %v4122_v37, %v3236_v18  ;;  %v2149_v19 = vrot.slane %v4124_v26, %v3236_v18 }
 0x23b   :  { %v1827_v16 = vmul.f32 1.442695, %v1825_v29  ;;  %v2140_v48 = vadd.f32 %v2138_v24, %v2128_v22  ;;  %v2141_v50 = vadd.f32 %v2139_v13, %v2129_v32  ;;  %v2157_v23 = vrot.slane %v4122_v37, %v3238_v57 }
 0x23c   :  { %v1619_v10 = vadd.f32 %v4413_v55, %v4407_v56  ;;  %v1829_v0 = vmul.f32 1.442695, %v1826_v14  ;;  %v2150_v27 = vmul.f32 %v2145_v28, %v3294_v11  ;;  %v2151_v47 = vmul.f32 %v2149_v19, %v3294_v11 }
 0x23d   :  { %2758 = vpow2.f32 %v1827_v16  ;;  %v2161_v60 = vrot.slane %v4124_v26, %v3238_v57  ;;  %v2162_v18 = vmul.f32 %v2157_v23, %v3314_v4  ;;  %v2061_v42 = vrot.slane %v4122_v37, %v3230_v2 }
 0x23e   :  { %v2751_v9 = vpop.eup %2750  ;;  %1620 = vadd.xlane.f32.xlu1 %v1619_v10  ;;  %2760 = vpow2.f32 %v1829_v0  ;;  %v2152_v58 = vadd.f32 %v2150_v27, %v2140_v48  ;;  %v2153_v44 = vadd.f32 %v2151_v47, %v2141_v50  ;;  %v2065_v59 = vrot.slane %v4124_v26, %v3230_v2 }
 0x23f   :  { %v2753_v30 = vpop.eup %2752  ;;  %v1891_v51 = vadd.f32 1.0, %v2751_v9  ;;  %v2163_v7 = vmul.f32 %v2161_v60, %v3314_v4  ;;  %v2066_v61 = vmul.f32 %v2061_v42, %v3258_v35  ;;  %v2073_v57 = vrot.slane %v4122_v37, %v3232_v5 }
 0x240   :  { %v1892_v54 = vadd.f32 1.0, %v2753_v30  ;;  %v4437_v52 = vadd.f32 %v2162_v18, %v2152_v58  ;;  %v2067_v8 = vmul.f32 %v2065_v59, %v3258_v35  ;;  %v2077_v22 = vrot.slane %v4124_v26, %v3232_v5 }
 0x241   :  { %v2755_v32 = vpop.eup %2754  ;;  %2762 = vrcp.f32 %v1891_v51  ;;  %v4442_v2 = vadd.f32 %v2163_v7, %v2153_v44  ;;  %v2068_v53 = vadd.f32 %v2066_v61, %v3256_v34  ;;  %v2078_v29 = vmul.f32 %v2073_v57, %v3292_v33 }
 0x242   :  { %v2757_v24 = vpop.eup %2756  ;;  %v4447_v13 = vmul.f32 %v2755_v32, %v4314_v3  ;;  %2764 = vrcp.f32 %v1892_v54  ;;  %v2166_v14 = vsub.f32 0.0, %v4437_v52  ;;  %v2069_v35 = vadd.f32 %v2067_v8, %v3256_v34 }
 0x243   :  { %v4452_v28 = vmul.f32 %v2757_v24, %v4319_v36  ;;  %v2167_v5 = vsub.f32 0.0, %v4442_v2  ;;  %v2079_v19 = vmul.f32 %v2077_v22, %v3292_v33  ;;  %v2080_v16 = vadd.f32 %v2078_v29, %v2068_v53 }
 0x244   :  { %v2168_v48 = vmul.f32 1.442695, %v2166_v14  ;;  %v2085_v50 = vrot.slane %v4122_v37, %v3240_v20  ;;  %v2089_v3 = vrot.slane %v4124_v26, %v3240_v20  ;;  %v2097_v23 = vrot.slane %v4122_v37, %v3242_v21 }
 0x245   :  { %v1616_v34 = vadd.f32 %v4452_v28, %v4447_v13  ;;  %v2170_v36 = vmul.f32 1.442695, %v2167_v5  ;;  %v2081_v10 = vadd.f32 %v2079_v19, %v2069_v35  ;;  %v2101_v0 = vrot.slane %v4124_v26, %v3242_v21 }
 0x246   :  { %2766 = vpow2.f32 %v2168_v48  ;;  %v2090_v33 = vmul.f32 %v2085_v50, %v3294_v11  ;;  %v2091_v27 = vmul.f32 %v2089_v3, %v3294_v11  ;;  %v2102_v20 = vmul.f32 %v2097_v23, %v3314_v4 }
 0x247   :  { %v2759_v47 = vpop.eup %2758  ;;  %1617 = vadd.xlane.f32.xlu0 %v1616_v34  ;;  %2768 = vpow2.f32 %v2170_v36  ;;  %v2103_v9 = vmul.f32 %v2101_v0, %v3314_v4  ;;  %v582_v14 = vmul.f32 0.001953125, %v3748_v25 }
 0x248   :  { %v2761_v60 = vpop.eup %2760  ;;  %v1831_v37 = vadd.f32 1.0, %v2759_v47  ;;  %v2092_v18 = vadd.f32 %v2090_v33, %v2080_v16  ;;  %v2093_v42 = vadd.f32 %v2091_v27, %v2081_v10 }
 0x249   :  { %v1832_v58 = vadd.f32 1.0, %v2761_v60  ;;  %v4488_v50 = vsub.f32 %v3621_v39, %v582_v14 }
 0x24a   :  { %2770 = vrcp.f32 %v1831_v37  ;;  %v2104_v44 = vadd.f32 %v2102_v20, %v2092_v18  ;;  %v2105_v21 = vadd.f32 %v2103_v9, %v2093_v42  ;;  %v4840_v20 = vld [vmem:[#allocation20_spill] sm:$0xff]  ;;  %v4841_v18 = vld [vmem:[#allocation21_spill] sm:$0xff]  ;;  %v4842_v9 = vld [vmem:[#allocation23_spill] sm:$0xff] }
 0x24b   :  { %v2763_v26 = vpop.eup %2762  ;;  %2772 = vrcp.f32 %v1832_v58  ;;  %v592_v34 = vmul.f32 %v4488_v50, %v4488_v50  ;;  %v4529_v58 = vsub.f32 %v4842_v9, %v582_v14 }
 0x24c   :  { %v2765_v59 = vpop.eup %2764  ;;  %v4471_v11 = vmul.f32 %v2763_v26, %v4359_v41  ;;  %v2106_v30 = vsub.f32 0.0, %v2104_v44  ;;  %v2107_v51 = vsub.f32 0.0, %v2105_v21  ;;  %v4844_v26 = vld [vmem:[#allocation10_spill] sm:$0xff] }
 0x24d   :  { %v4474_v7 = vmul.f32 %v2765_v59, %v4361_v6  ;;  %v837_v59 = vmul.f32 0.001953125, %v4844_v26 }
 0x24e   :  { %v2108_v61 = vmul.f32 1.442695, %v2106_v30  ;;  %v2110_v57 = vmul.f32 1.442695, %v2107_v51 }
 0x24f   :  { %v1900_v4 = vadd.f32 %v4474_v7, %v4471_v11 }
 0x250   :  { %v2767_v54 = vpop.eup %2766  ;;  %2774 = vpow2.f32 %v2108_v61 }
 0x251   :  { %v2769_v8 = vpop.eup %2768  ;;  %1901 = vadd.xlane.f32.xlu1 %v1900_v4  ;;  %v2172_v22 = vadd.f32 1.0, %v2767_v54  ;;  %2776 = vpow2.f32 %v2110_v57  ;;  %v587_v57 = vmul.f32 %v4529_v58, %v4529_v58 }
 0x252   :  { %v2173_v32 = vadd.f32 1.0, %v2769_v8  ;;  %v4845_v8 = vld [vmem:[#allocation5_spill] sm:$0xff] }
 0x253   :  { %2778 = vrcp.f32 %v2172_v22  ;;  %v4544_v22 = vsub.f32 %v4845_v8, %v837_v59 }
 0x254   :  { %v2771_v41 = vpop.eup %2770  ;;  %2780 = vrcp.f32 %v2173_v32  ;;  %v4846_v32 = vld [vmem:[#allocation9_spill] sm:$0xff] }
 0x255   :  { %v2773_v53 = vpop.eup %2772  ;;  %v4479_v29 = vmul.f32 %v2771_v41, %v4396_v31  ;;  %v4491_v31 = vsub.f32 %v3626_v45, %v582_v14  ;;  %v331_v45 = vmul.f32 0.001953125, %v3746_v62  ;;  %v4547_v41 = vsub.f32 %v4846_v32, %v837_v59 }
 0x256   :  { %v4482_v6 = vmul.f32 %v2773_v53, %v4402_v12 }
 0x257   :  { %v593_v39 = vmul.f32 %v4491_v31, %v4491_v31  ;;  %v4517_v60 = vsub.f32 %v4840_v20, %v331_v45  ;;  %v4526_v42 = vsub.f32 %v4841_v18, %v331_v45 }
 0x258   :  { %v1897_v24 = vadd.f32 %v4482_v6, %v4479_v29 }
 0x259   :  { %v594_v36 = vadd.f32 %v593_v39, %v592_v34  ;;  %v341_v51 = vmul.f32 %v4517_v60, %v4517_v60  ;;  %v342_v61 = vmul.f32 %v4526_v42, %v4526_v42 }
 0x25a   :  { %v2775_v35 = vpop.eup %2774  ;;  %1898 = vadd.xlane.f32.xlu0 %v1897_v24  ;;  %v842_v24 = vmul.f32 %v4544_v22, %v4544_v22 }
 0x25b   :  { %v2777_v5 = vpop.eup %2776  ;;  %v2112_v19 = vadd.f32 1.0, %v2775_v35  ;;  %v343_v54 = vadd.f32 %v342_v61, %v341_v51  ;;  %v4847_v35 = vld [vmem:[#allocation25_spill] sm:$0xff] }
 0x25c   :  { %v2113_v16 = vadd.f32 1.0, %v2777_v5  ;;  %v4554_v5 = vsub.f32 %v4847_v35, %v837_v59 }
 0x25d   :  { %v2779_v48 = vpop.eup %2778  ;;  %2782 = vrcp.f32 %v2112_v19  ;;  %v4848_v19 = vld [vmem:[#allocation26_spill] sm:$0xff] }
 0x25e   :  { %v2781_v12 = vpop.eup %2780  ;;  %v4494_v3 = vmul.f32 %v2779_v48, %v4437_v52  ;;  %2784 = vrcp.f32 %v2113_v16  ;;  %v4507_v52 = vsub.f32 %v3534_v17, %v331_v45  ;;  %v4557_v16 = vsub.f32 %v4848_v19, %v837_v59 }
 0x25f   :  { %v4497_v25 = vmul.f32 %v2781_v12, %v4442_v2  ;;  %v4839_v2 = vld [vmem:[#allocation22_spill] sm:$0xff]  ;;  %v847_v12 = vmul.f32 %v4554_v5, %v4554_v5 }
 0x260   :  { %v4510_v0 = vsub.f32 %v4839_v2, %v331_v45  ;;  %v336_v37 = vmul.f32 %v4507_v52, %v4507_v52 }
 0x261   :  { %v2181_v23 = vadd.f32 %v4497_v25, %v4494_v3 }
 0x262   :  { %v337_v17 = vmul.f32 %v4510_v0, %v4510_v0 }
 0x263   :  { %2182 = vadd.xlane.f32.xlu1 %v2181_v23  ;;  %v848_v23 = vmul.f32 %v4557_v16, %v4557_v16 }
 0x264   :  { %v338_v30 = vadd.f32 %v337_v17, %v336_v37 }
 0x265   :  { %v849_v34 = vadd.f32 %v848_v23, %v847_v12 }
 0x267   :  { %v2783_v10 = vpop.eup %2782  ;;  %595 = vadd.xlane.f32.xlu1 %v594_v36 }
 0x268   :  { %v2785_v33 = vpop.eup %2784  ;;  %v4512_v27 = vmul.f32 %v2783_v10, %v2104_v44  ;;  %v4843_v44 = vld [vmem:[#allocation24_spill] sm:$0xff] }
 0x269   :  { %v4514_v47 = vmul.f32 %v2785_v33, %v2105_v21  ;;  %v4532_v21 = vsub.f32 %v4843_v44, %v582_v14  ;;  %v843_v14 = vmul.f32 %v4547_v41, %v4547_v41 }
 0x26b   :  { %v2178_v62 = vadd.f32 %v4514_v47, %v4512_v27  ;;  %v588_v4 = vmul.f32 %v4532_v21, %v4532_v21  ;;  %v844_v48 = vadd.f32 %v843_v14, %v842_v24 }
 0x26d   :  { %2179 = vadd.xlane.f32.xlu0 %v2178_v62  ;;  %v589_v53 = vadd.f32 %v588_v4, %v587_v57 }
 0x271   :  { %339 = vadd.xlane.f32.xlu0 %v338_v30 }
 0x275   :  { %344 = vadd.xlane.f32.xlu0 %v343_v54 }
 0x279   :  { %590 = vadd.xlane.f32.xlu0 %v589_v53 }
 0x27d   :  { %845 = vadd.xlane.f32.xlu0 %v844_v48 }
 0x281   :  { %850 = vadd.xlane.f32.xlu0 %v849_v34 }
 0x2ab   :  { %v1090_v39 = vpop.xlane.xlu0 %1089 }
 0x2b2   :  { %v1087_v45 = vpop.xlane.xlu1 %1086 }
 0x2b3   :  { %v1091_v36 = vadd.f32 %v1090_v39, %v1087_v45 }
 0x2b5   :  { %v1092_v10 = vmul.f32 0.001953125, %v1091_v36 }
 0x2b7   :  { %v4564_v2 = vsub.f32 %v4265_v40, %v1092_v10  ;;  %v4567_v33 = vsub.f32 %v4272_v63, %v1092_v10  ;;  %v4570_v20 = vsub.f32 %v4297_v15, %v1092_v10  ;;  %v4573_v62 = vsub.f32 %v4304_v43, %v1092_v10 }
 0x2b9   :  { %v1102_v37 = vmul.f32 %v4564_v2, %v4564_v2  ;;  %v1103_v17 = vmul.f32 %v4567_v33, %v4567_v33  ;;  %v1097_v18 = vmul.f32 %v4570_v20, %v4570_v20  ;;  %v1098_v40 = vmul.f32 %v4573_v62, %v4573_v62 }
 0x2ba   :  { %v1340_v15 = vpop.xlane.xlu1 %1339 }
 0x2bb   :  { %v1104_v63 = vadd.f32 %v1103_v17, %v1102_v37  ;;  %v1099_v9 = vadd.f32 %v1098_v40, %v1097_v18 }
 0x2bd   :  { %1105 = vadd.xlane.f32.xlu1 %v1104_v63  ;;  %1100 = vadd.xlane.f32.xlu0 %v1099_v9 }
 0x2c1   :  { %v1337_v44 = vpop.xlane.xlu0 %1336 }
 0x2c2   :  { %v1341_v43 = vadd.f32 %v1340_v15, %v1337_v44 }
 0x2c4   :  { %v1342_v26 = vmul.f32 0.001953125, %v1341_v43 }
 0x2c6   :  { %v4584_v59 = vsub.f32 %v4365_v1, %v1342_v26  ;;  %v4587_v30 = vsub.f32 %v4370_v49, %v1342_v26  ;;  %v4590_v51 = vsub.f32 %v4335_v38, %v1342_v26  ;;  %v4593_v61 = vsub.f32 %v4339_v46, %v1342_v26 }
 0x2c8   :  { %v1347_v57 = vmul.f32 %v4584_v59, %v4584_v59  ;;  %v1348_v4 = vmul.f32 %v4587_v30, %v4587_v30  ;;  %v1352_v1 = vmul.f32 %v4590_v51, %v4590_v51  ;;  %v1353_v49 = vmul.f32 %v4593_v61, %v4593_v61 }
 0x2ca   :  { %v1349_v54 = vadd.f32 %v1348_v4, %v1347_v57  ;;  %v1354_v8 = vadd.f32 %v1353_v49, %v1352_v1 }
 0x2cb   :  { %v1621_v38 = vpop.xlane.xlu1 %1620 }
 0x2cc   :  { %1350 = vadd.xlane.f32.xlu1 %v1349_v54 }
 0x2d0   :  { %1355 = vadd.xlane.f32.xlu1 %v1354_v8 }
 0x2d4   :  { %v1618_v32 = vpop.xlane.xlu0 %1617 }
 0x2d5   :  { %v1622_v46 = vadd.f32 %v1621_v38, %v1618_v32 }
 0x2d7   :  { %v1623_v53 = vmul.f32 0.001953125, %v1622_v46 }
 0x2d9   :  { %v4604_v24 = vsub.f32 %v4447_v13, %v1623_v53  ;;  %v4607_v14 = vsub.f32 %v4452_v28, %v1623_v53  ;;  %v4610_v35 = vsub.f32 %v4407_v56, %v1623_v53  ;;  %v4613_v19 = vsub.f32 %v4413_v55, %v1623_v53 }
 0x2db   :  { %v1628_v48 = vmul.f32 %v4604_v24, %v4604_v24  ;;  %v1629_v12 = vmul.f32 %v4607_v14, %v4607_v14  ;;  %v1633_v13 = vmul.f32 %v4610_v35, %v4610_v35  ;;  %v1634_v28 = vmul.f32 %v4613_v19, %v4613_v19 }
 0x2dd   :  { %v1630_v23 = vadd.f32 %v1629_v12, %v1628_v48  ;;  %v1635_v34 = vadd.f32 %v1634_v28, %v1633_v13 }
 0x2de   :  { %v1902_v56 = vpop.xlane.xlu1 %1901 }
 0x2df   :  { %1631 = vadd.xlane.f32.xlu1 %v1630_v23 }
 0x2e3   :  { %1636 = vadd.xlane.f32.xlu1 %v1635_v34 }
 0x2e7   :  { %v1899_v39 = vpop.xlane.xlu0 %1898 }
 0x2e8   :  { %v1903_v55 = vadd.f32 %v1902_v56, %v1899_v39 }
 0x2ea   :  { %v1904_v45 = vmul.f32 0.001953125, %v1903_v55  ;;  %v48_v55 = vld [vmem:[%s4760_s5] sm:$0xff] }
 0x2ec   :  { %v4624_v36 = vsub.f32 %v4479_v29, %v1904_v45  ;;  %v4627_v10 = vsub.f32 %v4482_v6, %v1904_v45  ;;  %v4630_v37 = vsub.f32 %v4471_v11, %v1904_v45  ;;  %v4633_v17 = vsub.f32 %v4474_v7, %v1904_v45 }
 0x2ee   :  { %v1909_v18 = vmul.f32 %v4624_v36, %v4624_v36  ;;  %v1910_v40 = vmul.f32 %v4627_v10, %v4627_v10  ;;  %v1914_v29 = vmul.f32 %v4630_v37, %v4630_v37  ;;  %v1915_v6 = vmul.f32 %v4633_v17, %v4633_v17 }
 0x2f0   :  { %v1911_v63 = vadd.f32 %v1910_v40, %v1909_v18  ;;  %v1916_v9 = vadd.f32 %v1915_v6, %v1914_v29  ;;  %v2183_v11 = vpop.xlane.xlu1 %2182 }
 0x2f2   :  { %1912 = vadd.xlane.f32.xlu1 %v1911_v63  ;;  %v2250_v63 = vld [vmem:[%s4760_s5 + $0x18] sm:$0xff] }
 0x2f6   :  { %1917 = vadd.xlane.f32.xlu1 %v1916_v9  ;;  %v2253_v9 = vld [vmem:[%s4760_s5 + $0x8] sm:$0xff] }
 0x2fa   :  { %v2180_v15 = vpop.xlane.xlu0 %2179 }
 0x2fb   :  { %v2184_v7 = vadd.f32 %v2183_v11, %v2180_v15 }
 0x2fd   :  { %v2185_v44 = vmul.f32 0.001953125, %v2184_v7 }
 0x2fe   :  { %v340_v43 = vpop.xlane.xlu0 %339 }
 0x2ff   :  { %v4644_v26 = vsub.f32 %v4512_v27, %v2185_v44  ;;  %v4647_v57 = vsub.f32 %v4514_v47, %v2185_v44  ;;  %v4650_v4 = vsub.f32 %v4494_v3, %v2185_v44  ;;  %v4653_v54 = vsub.f32 %v4497_v25, %v2185_v44  ;;  %v596_v25 = vpop.xlane.xlu1 %595 }
 0x301   :  { %v2190_v1 = vmul.f32 %v4644_v26, %v4644_v26  ;;  %v2191_v49 = vmul.f32 %v4647_v57, %v4647_v57  ;;  %v2195_v8 = vmul.f32 %v4650_v4, %v4650_v4  ;;  %v2196_v27 = vmul.f32 %v4653_v54, %v4653_v54 }
 0x302   :  { %v345_v47 = vpop.xlane.xlu0 %344 }
 0x303   :  { %v346_v38 = vadd.f32 %v345_v47, %v340_v43  ;;  %v2192_v32 = vadd.f32 %v2191_v49, %v2190_v1  ;;  %v2197_v3 = vadd.f32 %v2196_v27, %v2195_v8  ;;  %v2256_v27 = vld [vmem:[%s4760_s5 + $0x10] sm:$0xff] }
 0x305   :  { %v347_v46 = vmul.f32 0.001953125, %v346_v38  ;;  %2193 = vadd.xlane.f32.xlu0 %v2192_v32  ;;  %2198 = vadd.xlane.f32.xlu1 %v2197_v3 }
 0x306   :  { %v591_v53 = vpop.xlane.xlu0 %590 }
 0x307   :  { %v348_v48 = vadd.f32 1e-05, %v347_v46  ;;  %v597_v12 = vadd.f32 %v596_v25, %v591_v53 }
 0x309   :  { %2786 = vrsqrt.f32 %v348_v48  ;;  %v598_v23 = vmul.f32 0.001953125, %v597_v12 }
 0x30a   :  { %v846_v13 = vpop.xlane.xlu0 %845 }
 0x30b   :  { %v599_v28 = vadd.f32 1e-05, %v598_v23 }
 0x30d   :  { %2788 = vrsqrt.f32 %v599_v28 }
 0x30e   :  { %v851_v34 = vpop.xlane.xlu0 %850 }
 0x30f   :  { %v852_v56 = vadd.f32 %v851_v34, %v846_v13 }
 0x311   :  { %v853_v39 = vmul.f32 0.001953125, %v852_v56 }
 0x313   :  { %v2787_v45 = vpop.eup %2786  ;;  %v854_v18 = vadd.f32 1e-05, %v853_v39 }
 0x314   :  { %v350_v40 = vmul.f32 %v2787_v45, %v48_v55 }
 0x315   :  { %2790 = vrsqrt.f32 %v854_v18 }
 0x316   :  { %353 = vperm.xlu1 %2377, %v350_v40  }
 0x317   :  { %v2789_v29 = vpop.eup %2788 }
 0x318   :  { %v601_v6 = vmul.f32 %v2789_v29, %v2250_v63 }
 0x31b   :  { %604 = vperm.xlu0 %2371, %v601_v6  }
 0x31f   :  { %v2791_v11 = vpop.eup %2790 }
 0x320   :  { %v856_v15 = vmul.f32 %v2791_v11, %v2253_v9 }
 0x322   :  { %859 = vperm.xlu1 %2377, %v856_v15  }
 0x34a   :  { %v1106_v7 = vpop.xlane.xlu1 %1105  ;;  %v1101_v44 = vpop.xlane.xlu0 %1100 }
 0x34b   :  { %v1107_v43 = vadd.f32 %v1106_v7, %v1101_v44 }
 0x34d   :  { %v1108_v1 = vmul.f32 0.001953125, %v1107_v43 }
 0x34f   :  { %v1109_v49 = vadd.f32 1e-05, %v1108_v1 }
 0x351   :  { %2792 = vrsqrt.f32 %v1109_v49 }
 0x359   :  { %v1351_v8 = vpop.xlane.xlu1 %1350 }
 0x35b   :  { %v2793_v47 = vpop.eup %2792 }
 0x35c   :  { %v1111_v38 = vmul.f32 %v2793_v47, %v2256_v27 }
 0x35d   :  { %v1356_v32 = vpop.xlane.xlu1 %1355 }
 0x35e   :  { %v1357_v3 = vadd.f32 %v1356_v32, %v1351_v8  ;;  %1114 = vperm.xlu0 %2371, %v1111_v38  }
 0x360   :  { %v1358_v46 = vmul.f32 0.001953125, %v1357_v3 }
 0x362   :  { %v1359_v25 = vadd.f32 1e-05, %v1358_v46 }
 0x364   :  { %2794 = vrsqrt.f32 %v1359_v25 }
 0x36c   :  { %v1632_v53 = vpop.xlane.xlu1 %1631 }
 0x36e   :  { %v2795_v48 = vpop.eup %2794 }
 0x36f   :  { %v1361_v12 = vmul.f32 %v2795_v48, %v2256_v27 }
 0x370   :  { %v1637_v23 = vpop.xlane.xlu1 %1636 }
 0x371   :  { %v1638_v13 = vadd.f32 %v1637_v23, %v1632_v53  ;;  %1364 = vperm.xlu1 %2377, %v1361_v12  }
 0x373   :  { %v1639_v28 = vmul.f32 0.001953125, %v1638_v13 }
 0x375   :  { %v1640_v34 = vadd.f32 1e-05, %v1639_v28 }
 0x377   :  { %2796 = vrsqrt.f32 %v1640_v34 }
 0x37f   :  { %v1913_v56 = vpop.xlane.xlu1 %1912 }
 0x381   :  { %v2797_v39 = vpop.eup %2796 }
 0x382   :  { %v1642_v45 = vmul.f32 %v2797_v39, %v2253_v9 }
 0x383   :  { %v1918_v18 = vpop.xlane.xlu1 %1917 }
 0x384   :  { %v1919_v40 = vadd.f32 %v1918_v18, %v1913_v56  ;;  %1645 = vperm.xlu1 %2377, %v1642_v45  }
 0x386   :  { %v1920_v29 = vmul.f32 0.001953125, %v1919_v40 }
 0x388   :  { %v1921_v6 = vadd.f32 1e-05, %v1920_v29 }
 0x38a   :  { %2798 = vrsqrt.f32 %v1921_v6 }
 0x392   :  { %v2194_v11 = vpop.xlane.xlu0 %2193  ;;  %v2199_v15 = vpop.xlane.xlu1 %2198 }
 0x393   :  { %v2200_v7 = vadd.f32 %v2199_v15, %v2194_v11 }
 0x394   :  { %v2799_v44 = vpop.eup %2798 }
 0x395   :  { %v2201_v43 = vmul.f32 0.001953125, %v2200_v7  ;;  %v1923_v1 = vmul.f32 %v2799_v44, %v2250_v63 }
 0x396   :  { %v354_v47 = vpop.permute.xlu1 %353 }
 0x397   :  { %v2202_v49 = vadd.f32 1e-05, %v2201_v43  ;;  %1926 = vperm.xlu1 %2377, %v1923_v1  }
 0x399   :  { %2800 = vrsqrt.f32 %v2202_v49 }
 0x39a   :  { %v605_v9 = vpop.permute.xlu0 %604 }
 0x3a1   :  { %v860_v38 = vpop.permute.xlu1 %859 }
 0x3a3   :  { %v2801_v8 = vpop.eup %2800 }
 0x3a4   :  { %v2204_v27 = vmul.f32 %v2801_v8, %v48_v55 }
 0x3a6   :  { %2207 = vperm.xlu0 %2371, %v2204_v27  }
 0x3dd   :  { %v1115_v32 = vpop.permute.xlu0 %1114 }
 0x3de   :  { %v1117_v3 = vmul.f32 %v1115_v32, %v4570_v20  ;;  %v1118_v46 = vmul.f32 %v1115_v32, %v4573_v62  ;;  %v1119_v25 = vmul.f32 %v1115_v32, %v4564_v2  ;;  %v1120_v53 = vmul.f32 %v1115_v32, %v4567_v33 }
 0x3df   :  { %v862_v2 = vmul.f32 %v860_v38, %v4544_v22  ;;  %v863_v33 = vmul.f32 %v860_v38, %v4547_v41  ;;  %v864_v20 = vmul.f32 %v860_v38, %v4554_v5  ;;  %v865_v62 = vmul.f32 %v860_v38, %v4557_v16 }
 0x3e0   :  { %v607_v22 = vmul.f32 %v605_v9, %v4529_v58  ;;  %v608_v41 = vmul.f32 %v605_v9, %v4532_v21  ;;  %v609_v5 = vmul.f32 %v605_v9, %v4488_v50  ;;  %v610_v16 = vmul.f32 %v605_v9, %v4491_v31 }
 0x3e1   :  { %v356_v50 = vmul.f32 %v354_v47, %v4507_v52  ;;  %v357_v31 = vmul.f32 %v354_v47, %v4510_v0  ;;  %v358_v58 = vmul.f32 %v354_v47, %v4517_v60  ;;  %v359_v21 = vmul.f32 %v354_v47, %v4526_v42 }
 0x3f0   :  { %v1365_v48 = vpop.permute.xlu1 %1364 }
 0x3f1   :  { %v1367_v63 = vmul.f32 %v1365_v48, %v4584_v59  ;;  %v1368_v12 = vmul.f32 %v1365_v48, %v4587_v30  ;;  %v1369_v55 = vmul.f32 %v1365_v48, %v4590_v51  ;;  %v1370_v23 = vmul.f32 %v1365_v48, %v4593_v61 }
 0x3f3   :  { %v1371_v13 = vadd.f32 %v1367_v63, %v1117_v3  ;;  %v1372_v28 = vadd.f32 %v1368_v12, %v1118_v46  ;;  %v1376_v34 = vadd.f32 %v1369_v55, %v1119_v25  ;;  %v1377_v56 = vadd.f32 %v1370_v23, %v1120_v53 }
 0x3f5   :  { %2257 = vst [vmem:[%s4761_s6 + $0x20] sm:$0xff] %v1371_v13  ;;  %2258 = vst [vmem:[%s4761_s6 + $0x28] sm:$0xff] %v1372_v28 }
 0x3f6   :  { %2259 = vst [vmem:[%s4761_s6 + $0x60] sm:$0xff] %v1376_v34  ;;  %2260 = vst [vmem:[%s4761_s6 + $0x68] sm:$0xff] %v1377_v56 }
 0x403   :  { %v1646_v59 = vpop.permute.xlu1 %1645 }
 0x404   :  { %v1648_v30 = vmul.f32 %v1646_v59, %v4604_v24  ;;  %v1649_v51 = vmul.f32 %v1646_v59, %v4607_v14  ;;  %v1650_v61 = vmul.f32 %v1646_v59, %v4610_v35  ;;  %v1651_v39 = vmul.f32 %v1646_v59, %v4613_v19 }
 0x406   :  { %v1652_v45 = vadd.f32 %v1648_v30, %v862_v2  ;;  %v1653_v18 = vadd.f32 %v1649_v51, %v863_v33  ;;  %v1657_v40 = vadd.f32 %v1650_v61, %v864_v20  ;;  %v1658_v29 = vadd.f32 %v1651_v39, %v865_v62 }
 0x408   :  { %2280 = vst [vmem:[%s4761_s6 + $0x10] sm:$0xff] %v1652_v45  ;;  %2281 = vst [vmem:[%s4761_s6 + $0x18] sm:$0xff] %v1653_v18 }
 0x409   :  { %2282 = vst [vmem:[%s4761_s6 + $0x50] sm:$0xff] %v1657_v40  ;;  %2283 = vst [vmem:[%s4761_s6 + $0x58] sm:$0xff] %v1658_v29 }
 0x416   :  { %v1927_v24 = vpop.permute.xlu1 %1926 }
 0x417   :  { %v1929_v14 = vmul.f32 %v1927_v24, %v4624_v36  ;;  %v1930_v35 = vmul.f32 %v1927_v24, %v4627_v10  ;;  %v1931_v19 = vmul.f32 %v1927_v24, %v4630_v37  ;;  %v1932_v6 = vmul.f32 %v1927_v24, %v4633_v17 }
 0x419   :  { %v1933_v11 = vadd.f32 %v1929_v14, %v607_v22  ;;  %v1934_v15 = vadd.f32 %v1930_v35, %v608_v41  ;;  %v1938_v7 = vadd.f32 %v1931_v19, %v609_v5  ;;  %v1939_v44 = vadd.f32 %v1932_v6, %v610_v16 }
 0x41b   :  { %2303 = vst [vmem:[%s4761_s6 + $0x30] sm:$0xff] %v1933_v11  ;;  %2304 = vst [vmem:[%s4761_s6 + $0x38] sm:$0xff] %v1934_v15 }
 0x41c   :  { %2305 = vst [vmem:[%s4761_s6 + $0x70] sm:$0xff] %v1938_v7  ;;  %2306 = vst [vmem:[%s4761_s6 + $0x78] sm:$0xff] %v1939_v44 }
 0x425   :  { %v2208_v36 = vpop.permute.xlu0 %2207 }
 0x426   :  { %v2210_v10 = vmul.f32 %v2208_v36, %v4644_v26  ;;  %v2211_v37 = vmul.f32 %v2208_v36, %v4647_v57  ;;  %v2212_v17 = vmul.f32 %v2208_v36, %v4650_v4  ;;  %v2213_v43 = vmul.f32 %v2208_v36, %v4653_v54 }
 0x428   :  { %v2214_v1 = vadd.f32 %v2210_v10, %v356_v50  ;;  %v2215_v49 = vadd.f32 %v2211_v37, %v357_v31  ;;  %v2218_v8 = vadd.f32 %v2212_v17, %v358_v58  ;;  %v2219_v27 = vadd.f32 %v2213_v43, %v359_v21 }
 0x42a   :  { %2216 = vst [vmem:[%s4761_s6] sm:$0xff] %v2214_v1  ;;  %2217 = vst [vmem:[%s4761_s6 + $0x8] sm:$0xff] %v2215_v49 }
 0x42b   :  { %2323 = vst [vmem:[%s4761_s6 + $0x40] sm:$0xff] %v2218_v8  ;;  %2324 = vst [vmem:[%s4761_s6 + $0x48] sm:$0xff] %v2219_v27 }
 0x42c   :  { %2227 = vsyncpa [#allocation3], 1 }

</bundles_post_ra>
